<compile_context>
chip_gen: v7x
topology: tpu7x:2x2x1
jax: 0.10.0
libtpu: 0.0.40
codegen_flags: <defaults>
</compile_context>

<pallas_src>
import jax
import jax.numpy as jnp
from jax.experimental import pallas as pl
from jax.experimental.pallas import tpu as pltpu


FC_K_TILE = 512          # fc1 reduction tile (review: raise 128 -> 512-1024)


# ----------------------------- Pallas kernels ------------------------------ #

def _conv1_bn_relu_pool_kernel(x_ref, w_ref, shift_ref, o_ref):
    """Conv2d(1->C,3x3,pad=1) + folded BN + ReLU + MaxPool(2,2), one image (VPU).

    x_ref:     (1, 16, HO, WO, 1) bf16   shifted planes of the padded input:
               plane[hh*4+ww][u, j] = x_pad[2u+hh, 2j+ww],  hh, ww in 0..3
    w_ref:     (9, C)  f32   conv taps with the BN scale pre-folded
    shift_ref: (1, C)  f32   folded BN shift (includes the conv bias)
    o_ref:     (1, HO, WO, C) bf16
    """
    # Hoisted loads: 16 plane loads + 9 tap loads, reused across the 4 pool
    # phases (review: do not re-load/broadcast the taps 36x inside the loops).
    planes = [x_ref[0, i].astype(jnp.float32) for i in range(16)]   # (HO, WO, 1)
    taps = [w_ref[t] for t in range(9)]                             # (C,)
    best = None
    for ph in range(2):                    # 2x2 max-pool phases
        for pw in range(2):
            acc = None
            for dh in range(3):            # 3x3 taps as f32 VPU broadcast-FMAs
                for dw in range(3):
                    term = planes[(ph + dh) * 4 + (pw + dw)] * taps[dh * 3 + dw]
                    acc = term if acc is None else acc + term
            best = acc if best is None else jnp.maximum(best, acc)
    # relu(max(.)) == max(relu(.)); the per-channel shift commutes with max.
    o_ref[0] = jnp.maximum(best + shift_ref[0], 0.0).astype(o_ref.dtype)


def _conv2_bn_relu_pool_kernel(p_ref, w_ref, shift_ref, o_ref):
    """Conv2d(16->32,3x3) + folded BN + ReLU + MaxPool(2), one image (MXU).

    The 4 pool phases are packed into the weight columns at prep time, so the
    whole layer is ONE (M,256)x(256,4*C2) bf16 matmul with f32 accumulation
    (K = 16 planes * 16 ch = 256 = full MXU K, 128 lane-dense result columns),
    followed by a VPU max over the 4 phase column-groups.

    p_ref:     (1, M, 256)  bf16   shifted-plane features, M = HO2*WO2
    w_ref:     (256, 4*C2)  bf16   phase-packed, BN-folded weights
    shift_ref: (1, C2)      f32    folded BN shift (includes the conv bias)
    o_ref:     (1, M, C2)   bf16
    """
    c2 = o_ref.shape[2]
    allp = jnp.dot(p_ref[0], w_ref[...], preferred_element_type=jnp.float32)
    best = jnp.maximum(
        jnp.maximum(allp[:, 0 * c2:1 * c2], allp[:, 1 * c2:2 * c2]),
        jnp.maximum(allp[:, 2 * c2:3 * c2], allp[:, 3 * c2:4 * c2]))
    o_ref[0] = jnp.maximum(best + shift_ref[0], 0.0).astype(o_ref.dtype)


def _fc_fused_kernel(x_ref, w1_ref, b1_ref, w2_ref, b2_ref, o_ref, acc_ref):
    """fc1 (K-tiled, f32 VMEM accumulator) -> Dropout2d(eval: id) -> fc2."""
    k = pl.program_id(1)

    @pl.when(k == 0)
    def _():
        acc_ref[...] = jnp.zeros_like(acc_ref)

    acc_ref[...] += jnp.dot(x_ref[...], w1_ref[...],
                            preferred_element_type=jnp.float32)

    @pl.when(k == pl.num_programs(1) - 1)
    def _():
        h = acc_ref[...] + b1_ref[...]                # fc1 bias (f32)
        # TODO(synk): Dropout2d(0.2) after fc1 is identity in eval mode.
        o_ref[...] = (jnp.dot(h.astype(jnp.bfloat16), w2_ref[...],
                              preferred_element_type=jnp.float32)
                      + b2_ref[...]).astype(o_ref.dtype)


# ------------------------------ thin wrappers ------------------------------ #

def conv1_bn_relu_pool(x_nchw, w9c, shift):
    """layer1: Conv2d(1,16,3,pad=1)+BN+ReLU+MaxPool(2,2), fused, grid over N."""
    n, _, h, w = x_nchw.shape
    assert h % 2 == 0 and w % 2 == 0, "pool-phase decomposition assumes even H, W"
    ho, wo = h // 2, w // 2
    c = w9c.shape[-1]
    xp = jnp.pad(x_nchw.reshape(n, h, w), ((0, 0), (1, 1), (1, 1)))   # pad=1
    # 16 shifted planes: plane[hh*4+ww][n,u,j] = xp[n, 2u+hh, 2j+ww]
    planes = [xp[:, hh:hh + 2 * ho:2, ww:ww + 2 * wo:2]
              for hh in range(4) for ww in range(4)]
    xph = jnp.stack(planes, axis=1)[..., None].astype(jnp.bfloat16)   # (N,16,HO,WO,1)
    return pl.pallas_call(
        _conv1_bn_relu_pool_kernel,
        out_shape=jax.ShapeDtypeStruct((n, ho, wo, c), jnp.bfloat16),
        grid_spec=pltpu.PrefetchScalarGridSpec(
            num_scalar_prefetch=0,
            grid=(n,),
            in_specs=[pl.BlockSpec((1, 16, ho, wo, 1),
                                   lambda b: (b, 0, 0, 0, 0)),
                      pl.BlockSpec((9, c), lambda b: (0, 0)),
                      pl.BlockSpec((1, c), lambda b: (0, 0))],
            out_specs=pl.BlockSpec((1, ho, wo, c), lambda b: (b, 0, 0, 0))),
        compiler_params=pltpu.CompilerParams(
            dimension_semantics=("parallel",)),          # v7x: shard over 2 TCs
    )(xph, w9c, shift)


def conv2_bn_relu_pool(y1, wz, shift):
    """layer2: Conv2d(16,32,3)+BN+ReLU+MaxPool(2), fused, grid over N.

    Returns (N, HO2*WO2*C2) spatial-major / channel-minor features (fc1's
    weight rows are permuted at prep time to absorb the NCHW flatten order).
    """
    n, h1, w1_in, c1 = y1.shape
    assert (h1 - 2) % 2 == 0 and (w1_in - 2) % 2 == 0
    ho, wo = (h1 - 2) // 2, (w1_in - 2) // 2
    c2 = shift.shape[-1]
    # 16 shifted planes of y1 (pure relayout, ~2.25x y1 bytes -- NOT a 9x
    # im2col): plane[r0*4+c0][n,u,v,:] = y1[n, 2u+r0, 2v+c0, :]
    planes = [y1[:, r0:r0 + 2 * ho:2, c0:c0 + 2 * wo:2, :]
              for r0 in range(4) for c0 in range(4)]
    p2 = (jnp.concatenate(planes, axis=-1)
          .reshape(n, ho * wo, 16 * c1).astype(jnp.bfloat16))         # (N,M,256)
    assert wz.shape == (16 * c1, 4 * c2)
    out = pl.pallas_call(
        _conv2_bn_relu_pool_kernel,
        out_shape=jax.ShapeDtypeStruct((n, ho * wo, c2), jnp.bfloat16),
        grid_spec=pltpu.PrefetchScalarGridSpec(
            num_scalar_prefetch=0,
            grid=(n,),
            in_specs=[pl.BlockSpec((1, ho * wo, 16 * c1),
                                   lambda b: (b, 0, 0)),
                      pl.BlockSpec((16 * c1, 4 * c2), lambda b: (0, 0)),
                      pl.BlockSpec((1, c2), lambda b: (0, 0))],
            out_specs=pl.BlockSpec((1, ho * wo, c2), lambda b: (b, 0, 0))),
        compiler_params=pltpu.CompilerParams(
            dimension_semantics=("parallel",)),          # v7x: shard over 2 TCs
    )(p2, wz, shift)
    return out.reshape(n, ho * wo * c2)


def fc1_fc2(feats, w1, b1, w2, b2):
    """Fused fc1 (M x K tiled, bf16 MXU, f32 accum) + fc2."""
    n, flat = feats.shape
    kpad = w1.shape[0]                                   # padded to FC_K_TILE
    assert kpad % FC_K_TILE == 0
    tk = FC_K_TILE
    tm = n if n <= 256 else 256
    h1, no = w1.shape[1], w2.shape[1]
    x = jnp.pad(feats, ((0, 0), (0, kpad - flat))).astype(jnp.bfloat16)
    k_steps = kpad // tk
    m_steps = pl.cdiv(n, tm)
    # Deeper weight buffering only pays when the K loop is long (real fc1:
    # K=122112 -> 239 steps of 512); never triggered at the demo size.
    w1_extra = {}
    if k_steps > 2:
        w1_extra["pipeline_mode"] = pl.Buffered(3)
    return pl.pallas_call(
        _fc_fused_kernel,
        out_shape=jax.ShapeDtypeStruct((n, no), jnp.float32),
        grid_spec=pltpu.PrefetchScalarGridSpec(
            num_scalar_prefetch=0,
            grid=(m_steps, k_steps),
            in_specs=[pl.BlockSpec((tm, tk), lambda m, k: (m, k)),
                      pl.BlockSpec((tk, h1), lambda m, k: (k, 0), **w1_extra),
                      pl.BlockSpec((1, h1), lambda m, k: (0, 0)),
                      pl.BlockSpec((h1, no), lambda m, k: (0, 0)),
                      pl.BlockSpec((1, no), lambda m, k: (0, 0))],
            out_specs=pl.BlockSpec((tm, no), lambda m, k: (m, 0)),
            scratch_shapes=[pltpu.VMEM((tm, h1), jnp.float32)]),
        compiler_params=pltpu.CompilerParams(
            dimension_semantics=("parallel", "arbitrary"),
            # (512,600) bf16 weight tile x a few buffers << 32 MiB, which is
            # also within v7x's scoped-VMEM default (64 MiB physical).
            vmem_limit_bytes=32 * 1024 * 1024),
        cost_estimate=pl.CostEstimate(
            flops=2 * n * kpad * h1 + 2 * n * h1 * no,
            transcendentals=0,
            bytes_accessed=n * kpad * 2 + kpad * h1 * 2 + h1 * no * 2
                           + n * h1 * 4 + n * no * 4),
    )(x, w1, b1, w2, b2)


# --------------------------- parameter preparation ------------------------- #

def prepare_params(r, eps=1e-5):
    """Fold BN into the conv weights/bias (in f32, before any bf16 cast), build
    conv2's phase-packed (256, 128) weight, permute fc1's rows from the NCHW
    flatten to the kernels' spatial-major/channel-minor flatten, and pad fc1's
    K to a multiple of FC_K_TILE."""
    # layer1 fold (over the actual 16 conv channels, inference mode)
    s1 = r["bn1_g"] * jax.lax.rsqrt(r["bn1_var"] + eps)
    shift1 = s1 * (r["conv1_b"] - r["bn1_mean"]) + r["bn1_b"]
    w1 = jnp.transpose(r["conv1_w"], (2, 3, 1, 0)).reshape(9, -1) * s1   # (9,16)
    # layer2 fold + phase packing
    s2 = r["bn2_g"] * jax.lax.rsqrt(r["bn2_var"] + eps)
    shift2 = s2 * (r["conv2_b"] - r["bn2_mean"]) + r["bn2_b"]
    c2, c1 = r["conv2_w"].shape[0], r["conv2_w"].shape[1]
    w2f = jnp.transpose(r["conv2_w"], (2, 3, 1, 0)) * s2                 # (3,3,16,32)
    # Wz[(r0*4+c0)*c1 + ci, (ph*2+pw)*c2 + oc] = w2f[r0-ph, c0-pw, ci, oc] or 0
    wz = jnp.zeros((4, 4, c1, 2, 2, c2), jnp.float32)
    for ph in range(2):
        for pw in range(2):
            wz = wz.at[ph:ph + 3, pw:pw + 3, :, ph, pw, :].set(w2f)
    wz = wz.reshape(16 * c1, 4 * c2)
    # fc1: permute rows (chw-flatten -> hwc-flatten), pad K to FC_K_TILE-mult
    flat = r["fc1_w"].shape[0]
    hw = flat // c2
    idx = jnp.arange(flat)
    perm = (idx % c2) * hw + idx // c2                   # hwc row -> chw row
    w_fc1 = r["fc1_w"][perm]
    kpad = ((flat + FC_K_TILE - 1) // FC_K_TILE) * FC_K_TILE
    w_fc1 = jnp.pad(w_fc1, ((0, kpad - flat), (0, 0)))
    return {
        "conv1_w9c": w1.astype(jnp.float32),
        "conv1_shift": shift1.reshape(1, -1).astype(jnp.float32),
        "conv2_wz": wz.astype(jnp.bfloat16),
        "conv2_shift": shift2.reshape(1, -1).astype(jnp.float32),
        "fc1_w": w_fc1.astype(jnp.bfloat16),
        "fc1_b": r["fc1_b"].reshape(1, -1).astype(jnp.float32),
        "fc2_w": r["fc2_w"].astype(jnp.bfloat16),
        "fc2_b": r["fc2_b"].reshape(1, -1).astype(jnp.float32),
    }


# ------------------------------ full forward ------------------------------- #

def convnet_forward(x_nchw, p):
    y1 = conv1_bn_relu_pool(x_nchw, p["conv1_w9c"], p["conv1_shift"])
    feats = conv2_bn_relu_pool(y1, p["conv2_wz"], p["conv2_shift"])
    return fc1_fc2(feats, p["fc1_w"], p["fc1_b"], p["fc2_w"], p["fc2_b"])


# --------------------------------- main ------------------------------------ #

if __name__ == "__main__":
    key = jax.random.PRNGKey(0)
    ks = jax.random.split(key, 12)

    N, H, W = 2, 16, 16
    x = jax.random.normal(ks[0], (N, 1, H, W), dtype=jnp.float32)

    # flatten at this demo shape: conv1(pad1)->16x16x16, pool->8x8x16,
    # conv2(nopad)->6x6x32, pool->3x3x32 => 288
    flat = 32 * 3 * 3

    raw_params = {
        "conv1_w": 0.2 * jax.random.normal(ks[1], (16, 1, 3, 3), jnp.float32),
        "conv1_b": 0.1 * jax.random.normal(ks[2], (16,), jnp.float32),
        "bn1_g": jnp.ones((16,), jnp.float32),
        "bn1_b": jnp.zeros((16,), jnp.float32),
        "bn1_mean": jnp.zeros((16,), jnp.float32),
        "bn1_var": jnp.ones((16,), jnp.float32),
        "conv2_w": 0.1 * jax.random.normal(ks[3], (32, 16, 3, 3), jnp.float32),
        "conv2_b": 0.1 * jax.random.normal(ks[4], (32,), jnp.float32),
        "bn2_g": jnp.ones((32,), jnp.float32),
        "bn2_b": jnp.zeros((32,), jnp.float32),
        "bn2_mean": jnp.zeros((32,), jnp.float32),
        "bn2_var": jnp.ones((32,), jnp.float32),
        "fc1_w": 0.05 * jax.random.normal(ks[5], (flat, 600), jnp.float32),
        "fc1_b": 0.05 * jax.random.normal(ks[6], (600,), jnp.float32),
        "fc2_w": 0.05 * jax.random.normal(ks[7], (600, 16), jnp.float32),
        "fc2_b": 0.05 * jax.random.normal(ks[8], (16,), jnp.float32),
    }

    kparams = prepare_params(raw_params)
    out = jax.jit(convnet_forward)(x, kparams)
    out = jax.block_until_ready(out)
    assert out.shape == (N, 16), out.shape
    print("KERNEL_OK")
</pallas_src>

<mosaic_0001>
module attributes {stable_mosaic.version = 11 : i64} {
  func.func @_conv1_bn_relu_pool_kernel(%arg0: i32, %arg1: memref<1x16x8x8x1xbf16, #tpu.memory_space<vmem>>, %arg2: memref<9x16xf32, #tpu.memory_space<vmem>>, %arg3: memref<1x16xf32, #tpu.memory_space<vmem>>, %arg4: memref<1x8x8x16xbf16, #tpu.memory_space<vmem>>) attributes {dimension_semantics = [#tpu.dimension_semantics<parallel>], iteration_bounds = array<i64: 2>, scalar_prefetch = 0 : i64, scratch_operands = 0 : i64, tpu.core_type = #tpu.core_type<tc>, window_params = [{transform_indices = @transform_0, window_bounds = array<i64: 1, 16, 8, 8, 1>}, {pipeline_mode = #tpu.pipeline_mode<synchronous>, transform_indices = @transform_1, window_bounds = array<i64: 9, 16>}, {pipeline_mode = #tpu.pipeline_mode<synchronous>, transform_indices = @transform_2, window_bounds = array<i64: 1, 16>}, {transform_indices = @transform_3, window_bounds = array<i64: 1, 8, 8, 16>}]} {
    %c0 = arith.constant 0 : index
    %c0_0 = arith.constant 0 : index
    %c0_1 = arith.constant 0 : index
    %c0_2 = arith.constant 0 : index
    %c0_3 = arith.constant 0 : index
    %0 = vector.load %arg1[%c0, %c0_0, %c0_1, %c0_2, %c0_3] : memref<1x16x8x8x1xbf16, #tpu.memory_space<vmem>>, vector<1x1x8x8x1xbf16>
    %1 = vector.shape_cast %0 : vector<1x1x8x8x1xbf16> to vector<8x8x1xbf16>
    %2 = arith.extf %1 : vector<8x8x1xbf16> to vector<8x8x1xf32>
    %c0_4 = arith.constant 0 : index
    %c1 = arith.constant 1 : index
    %c0_5 = arith.constant 0 : index
    %c0_6 = arith.constant 0 : index
    %c0_7 = arith.constant 0 : index
    %3 = vector.load %arg1[%c0_4, %c1, %c0_5, %c0_6, %c0_7] : memref<1x16x8x8x1xbf16, #tpu.memory_space<vmem>>, vector<1x1x8x8x1xbf16>
    %4 = vector.shape_cast %3 : vector<1x1x8x8x1xbf16> to vector<8x8x1xbf16>
    %5 = arith.extf %4 : vector<8x8x1xbf16> to vector<8x8x1xf32>
    %c0_8 = arith.constant 0 : index
    %c2 = arith.constant 2 : index
    %c0_9 = arith.constant 0 : index
    %c0_10 = arith.constant 0 : index
    %c0_11 = arith.constant 0 : index
    %6 = vector.load %arg1[%c0_8, %c2, %c0_9, %c0_10, %c0_11] : memref<1x16x8x8x1xbf16, #tpu.memory_space<vmem>>, vector<1x1x8x8x1xbf16>
    %7 = vector.shape_cast %6 : vector<1x1x8x8x1xbf16> to vector<8x8x1xbf16>
    %8 = arith.extf %7 : vector<8x8x1xbf16> to vector<8x8x1xf32>
    %c0_12 = arith.constant 0 : index
    %c3 = arith.constant 3 : index
    %c0_13 = arith.constant 0 : index
    %c0_14 = arith.constant 0 : index
    %c0_15 = arith.constant 0 : index
    %9 = vector.load %arg1[%c0_12, %c3, %c0_13, %c0_14, %c0_15] : memref<1x16x8x8x1xbf16, #tpu.memory_space<vmem>>, vector<1x1x8x8x1xbf16>
    %10 = vector.shape_cast %9 : vector<1x1x8x8x1xbf16> to vector<8x8x1xbf16>
    %11 = arith.extf %10 : vector<8x8x1xbf16> to vector<8x8x1xf32>
    %c0_16 = arith.constant 0 : index
    %c4 = arith.constant 4 : index
    %c0_17 = arith.constant 0 : index
    %c0_18 = arith.constant 0 : index
    %c0_19 = arith.constant 0 : index
    %12 = vector.load %arg1[%c0_16, %c4, %c0_17, %c0_18, %c0_19] : memref<1x16x8x8x1xbf16, #tpu.memory_space<vmem>>, vector<1x1x8x8x1xbf16>
    %13 = vector.shape_cast %12 : vector<1x1x8x8x1xbf16> to vector<8x8x1xbf16>
    %14 = arith.extf %13 : vector<8x8x1xbf16> to vector<8x8x1xf32>
    %c0_20 = arith.constant 0 : index
    %c5 = arith.constant 5 : index
    %c0_21 = arith.constant 0 : index
    %c0_22 = arith.constant 0 : index
    %c0_23 = arith.constant 0 : index
    %15 = vector.load %arg1[%c0_20, %c5, %c0_21, %c0_22, %c0_23] : memref<1x16x8x8x1xbf16, #tpu.memory_space<vmem>>, vector<1x1x8x8x1xbf16>
    %16 = vector.shape_cast %15 : vector<1x1x8x8x1xbf16> to vector<8x8x1xbf16>
    %17 = arith.extf %16 : vector<8x8x1xbf16> to vector<8x8x1xf32>
    %c0_24 = arith.constant 0 : index
    %c6 = arith.constant 6 : index
    %c0_25 = arith.constant 0 : index
    %c0_26 = arith.constant 0 : index
    %c0_27 = arith.constant 0 : index
    %18 = vector.load %arg1[%c0_24, %c6, %c0_25, %c0_26, %c0_27] : memref<1x16x8x8x1xbf16, #tpu.memory_space<vmem>>, vector<1x1x8x8x1xbf16>
    %19 = vector.shape_cast %18 : vector<1x1x8x8x1xbf16> to vector<8x8x1xbf16>
    %20 = arith.extf %19 : vector<8x8x1xbf16> to vector<8x8x1xf32>
    %c0_28 = arith.constant 0 : index
    %c7 = arith.constant 7 : index
    %c0_29 = arith.constant 0 : index
    %c0_30 = arith.constant 0 : index
    %c0_31 = arith.constant 0 : index
    %21 = vector.load %arg1[%c0_28, %c7, %c0_29, %c0_30, %c0_31] : memref<1x16x8x8x1xbf16, #tpu.memory_space<vmem>>, vector<1x1x8x8x1xbf16>
    %22 = vector.shape_cast %21 : vector<1x1x8x8x1xbf16> to vector<8x8x1xbf16>
    %23 = arith.extf %22 : vector<8x8x1xbf16> to vector<8x8x1xf32>
    %c0_32 = arith.constant 0 : index
    %c8 = arith.constant 8 : index
    %c0_33 = arith.constant 0 : index
    %c0_34 = arith.constant 0 : index
    %c0_35 = arith.constant 0 : index
    %24 = vector.load %arg1[%c0_32, %c8, %c0_33, %c0_34, %c0_35] : memref<1x16x8x8x1xbf16, #tpu.memory_space<vmem>>, vector<1x1x8x8x1xbf16>
    %25 = vector.shape_cast %24 : vector<1x1x8x8x1xbf16> to vector<8x8x1xbf16>
    %26 = arith.extf %25 : vector<8x8x1xbf16> to vector<8x8x1xf32>
    %c0_36 = arith.constant 0 : index
    %c9 = arith.constant 9 : index
    %c0_37 = arith.constant 0 : index
    %c0_38 = arith.constant 0 : index
    %c0_39 = arith.constant 0 : index
    %27 = vector.load %arg1[%c0_36, %c9, %c0_37, %c0_38, %c0_39] : memref<1x16x8x8x1xbf16, #tpu.memory_space<vmem>>, vector<1x1x8x8x1xbf16>
    %28 = vector.shape_cast %27 : vector<1x1x8x8x1xbf16> to vector<8x8x1xbf16>
    %29 = arith.extf %28 : vector<8x8x1xbf16> to vector<8x8x1xf32>
    %c0_40 = arith.constant 0 : index
    %c10 = arith.constant 10 : index
    %c0_41 = arith.constant 0 : index
    %c0_42 = arith.constant 0 : index
    %c0_43 = arith.constant 0 : index
    %30 = vector.load %arg1[%c0_40, %c10, %c0_41, %c0_42, %c0_43] : memref<1x16x8x8x1xbf16, #tpu.memory_space<vmem>>, vector<1x1x8x8x1xbf16>
    %31 = vector.shape_cast %30 : vector<1x1x8x8x1xbf16> to vector<8x8x1xbf16>
    %32 = arith.extf %31 : vector<8x8x1xbf16> to vector<8x8x1xf32>
    %c0_44 = arith.constant 0 : index
    %c11 = arith.constant 11 : index
    %c0_45 = arith.constant 0 : index
    %c0_46 = arith.constant 0 : index
    %c0_47 = arith.constant 0 : index
    %33 = vector.load %arg1[%c0_44, %c11, %c0_45, %c0_46, %c0_47] : memref<1x16x8x8x1xbf16, #tpu.memory_space<vmem>>, vector<1x1x8x8x1xbf16>
    %34 = vector.shape_cast %33 : vector<1x1x8x8x1xbf16> to vector<8x8x1xbf16>
    %35 = arith.extf %34 : vector<8x8x1xbf16> to vector<8x8x1xf32>
    %c0_48 = arith.constant 0 : index
    %c12 = arith.constant 12 : index
    %c0_49 = arith.constant 0 : index
    %c0_50 = arith.constant 0 : index
    %c0_51 = arith.constant 0 : index
    %36 = vector.load %arg1[%c0_48, %c12, %c0_49, %c0_50, %c0_51] : memref<1x16x8x8x1xbf16, #tpu.memory_space<vmem>>, vector<1x1x8x8x1xbf16>
    %37 = vector.shape_cast %36 : vector<1x1x8x8x1xbf16> to vector<8x8x1xbf16>
    %38 = arith.extf %37 : vector<8x8x1xbf16> to vector<8x8x1xf32>
    %c0_52 = arith.constant 0 : index
    %c13 = arith.constant 13 : index
    %c0_53 = arith.constant 0 : index
    %c0_54 = arith.constant 0 : index
    %c0_55 = arith.constant 0 : index
    %39 = vector.load %arg1[%c0_52, %c13, %c0_53, %c0_54, %c0_55] : memref<1x16x8x8x1xbf16, #tpu.memory_space<vmem>>, vector<1x1x8x8x1xbf16>
    %40 = vector.shape_cast %39 : vector<1x1x8x8x1xbf16> to vector<8x8x1xbf16>
    %41 = arith.extf %40 : vector<8x8x1xbf16> to vector<8x8x1xf32>
    %c0_56 = arith.constant 0 : index
    %c14 = arith.constant 14 : index
    %c0_57 = arith.constant 0 : index
    %c0_58 = arith.constant 0 : index
    %c0_59 = arith.constant 0 : index
    %42 = vector.load %arg1[%c0_56, %c14, %c0_57, %c0_58, %c0_59] : memref<1x16x8x8x1xbf16, #tpu.memory_space<vmem>>, vector<1x1x8x8x1xbf16>
    %43 = vector.shape_cast %42 : vector<1x1x8x8x1xbf16> to vector<8x8x1xbf16>
    %44 = arith.extf %43 : vector<8x8x1xbf16> to vector<8x8x1xf32>
    %c0_60 = arith.constant 0 : index
    %c15 = arith.constant 15 : index
    %c0_61 = arith.constant 0 : index
    %c0_62 = arith.constant 0 : index
    %c0_63 = arith.constant 0 : index
    %45 = vector.load %arg1[%c0_60, %c15, %c0_61, %c0_62, %c0_63] : memref<1x16x8x8x1xbf16, #tpu.memory_space<vmem>>, vector<1x1x8x8x1xbf16>
    %46 = vector.shape_cast %45 : vector<1x1x8x8x1xbf16> to vector<8x8x1xbf16>
    %47 = arith.extf %46 : vector<8x8x1xbf16> to vector<8x8x1xf32>
    %c0_64 = arith.constant 0 : index
    %c0_65 = arith.constant 0 : index
    %48 = vector.load %arg2[%c0_64, %c0_65] : memref<9x16xf32, #tpu.memory_space<vmem>>, vector<1x16xf32>
    %49 = vector.shape_cast %48 : vector<1x16xf32> to vector<16xf32>
    %c1_66 = arith.constant 1 : index
    %c0_67 = arith.constant 0 : index
    %50 = vector.load %arg2[%c1_66, %c0_67] : memref<9x16xf32, #tpu.memory_space<vmem>>, vector<1x16xf32>
    %51 = vector.shape_cast %50 : vector<1x16xf32> to vector<16xf32>
    %c2_68 = arith.constant 2 : index
    %c0_69 = arith.constant 0 : index
    %52 = vector.load %arg2[%c2_68, %c0_69] : memref<9x16xf32, #tpu.memory_space<vmem>>, vector<1x16xf32>
    %53 = vector.shape_cast %52 : vector<1x16xf32> to vector<16xf32>
    %c3_70 = arith.constant 3 : index
    %c0_71 = arith.constant 0 : index
    %54 = vector.load %arg2[%c3_70, %c0_71] : memref<9x16xf32, #tpu.memory_space<vmem>>, vector<1x16xf32>
    %55 = vector.shape_cast %54 : vector<1x16xf32> to vector<16xf32>
    %c4_72 = arith.constant 4 : index
    %c0_73 = arith.constant 0 : index
    %56 = vector.load %arg2[%c4_72, %c0_73] : memref<9x16xf32, #tpu.memory_space<vmem>>, vector<1x16xf32>
    %57 = vector.shape_cast %56 : vector<1x16xf32> to vector<16xf32>
    %c5_74 = arith.constant 5 : index
    %c0_75 = arith.constant 0 : index
    %58 = vector.load %arg2[%c5_74, %c0_75] : memref<9x16xf32, #tpu.memory_space<vmem>>, vector<1x16xf32>
    %59 = vector.shape_cast %58 : vector<1x16xf32> to vector<16xf32>
    %c6_76 = arith.constant 6 : index
    %c0_77 = arith.constant 0 : index
    %60 = vector.load %arg2[%c6_76, %c0_77] : memref<9x16xf32, #tpu.memory_space<vmem>>, vector<1x16xf32>
    %61 = vector.shape_cast %60 : vector<1x16xf32> to vector<16xf32>
    %c7_78 = arith.constant 7 : index
    %c0_79 = arith.constant 0 : index
    %62 = vector.load %arg2[%c7_78, %c0_79] : memref<9x16xf32, #tpu.memory_space<vmem>>, vector<1x16xf32>
    %63 = vector.shape_cast %62 : vector<1x16xf32> to vector<16xf32>
    %c8_80 = arith.constant 8 : index
    %c0_81 = arith.constant 0 : index
    %64 = vector.load %arg2[%c8_80, %c0_81] : memref<9x16xf32, #tpu.memory_space<vmem>>, vector<1x16xf32>
    %65 = vector.shape_cast %64 : vector<1x16xf32> to vector<16xf32>
    %66 = vector.shape_cast %49 : vector<16xf32> to vector<1x1x16xf32>
    %67 = vector.broadcast %2 : vector<8x8x1xf32> to vector<8x8x16xf32>
    %68 = vector.broadcast %66 : vector<1x1x16xf32> to vector<8x8x16xf32>
    %69 = arith.mulf %67, %68 : vector<8x8x16xf32>
    %70 = vector.shape_cast %51 : vector<16xf32> to vector<1x1x16xf32>
    %71 = vector.broadcast %5 : vector<8x8x1xf32> to vector<8x8x16xf32>
    %72 = vector.broadcast %70 : vector<1x1x16xf32> to vector<8x8x16xf32>
    %73 = arith.mulf %71, %72 : vector<8x8x16xf32>
    %74 = arith.addf %69, %73 : vector<8x8x16xf32>
    %75 = vector.shape_cast %53 : vector<16xf32> to vector<1x1x16xf32>
    %76 = vector.broadcast %8 : vector<8x8x1xf32> to vector<8x8x16xf32>
    %77 = vector.broadcast %75 : vector<1x1x16xf32> to vector<8x8x16xf32>
    %78 = arith.mulf %76, %77 : vector<8x8x16xf32>
    %79 = arith.addf %74, %78 : vector<8x8x16xf32>
    %80 = vector.shape_cast %55 : vector<16xf32> to vector<1x1x16xf32>
    %81 = vector.broadcast %14 : vector<8x8x1xf32> to vector<8x8x16xf32>
    %82 = vector.broadcast %80 : vector<1x1x16xf32> to vector<8x8x16xf32>
    %83 = arith.mulf %81, %82 : vector<8x8x16xf32>
    %84 = arith.addf %79, %83 : vector<8x8x16xf32>
    %85 = vector.shape_cast %57 : vector<16xf32> to vector<1x1x16xf32>
    %86 = vector.broadcast %17 : vector<8x8x1xf32> to vector<8x8x16xf32>
    %87 = vector.broadcast %85 : vector<1x1x16xf32> to vector<8x8x16xf32>
    %88 = arith.mulf %86, %87 : vector<8x8x16xf32>
    %89 = arith.addf %84, %88 : vector<8x8x16xf32>
    %90 = vector.shape_cast %59 : vector<16xf32> to vector<1x1x16xf32>
    %91 = vector.broadcast %20 : vector<8x8x1xf32> to vector<8x8x16xf32>
    %92 = vector.broadcast %90 : vector<1x1x16xf32> to vector<8x8x16xf32>
    %93 = arith.mulf %91, %92 : vector<8x8x16xf32>
    %94 = arith.addf %89, %93 : vector<8x8x16xf32>
    %95 = vector.shape_cast %61 : vector<16xf32> to vector<1x1x16xf32>
    %96 = vector.broadcast %26 : vector<8x8x1xf32> to vector<8x8x16xf32>
    %97 = vector.broadcast %95 : vector<1x1x16xf32> to vector<8x8x16xf32>
    %98 = arith.mulf %96, %97 : vector<8x8x16xf32>
    %99 = arith.addf %94, %98 : vector<8x8x16xf32>
    %100 = vector.shape_cast %63 : vector<16xf32> to vector<1x1x16xf32>
    %101 = vector.broadcast %29 : vector<8x8x1xf32> to vector<8x8x16xf32>
    %102 = vector.broadcast %100 : vector<1x1x16xf32> to vector<8x8x16xf32>
    %103 = arith.mulf %101, %102 : vector<8x8x16xf32>
    %104 = arith.addf %99, %103 : vector<8x8x16xf32>
    %105 = vector.shape_cast %65 : vector<16xf32> to vector<1x1x16xf32>
    %106 = vector.broadcast %32 : vector<8x8x1xf32> to vector<8x8x16xf32>
    %107 = vector.broadcast %105 : vector<1x1x16xf32> to vector<8x8x16xf32>
    %108 = arith.mulf %106, %107 : vector<8x8x16xf32>
    %109 = arith.addf %104, %108 : vector<8x8x16xf32>
    %110 = vector.shape_cast %49 : vector<16xf32> to vector<1x1x16xf32>
    %111 = vector.broadcast %5 : vector<8x8x1xf32> to vector<8x8x16xf32>
    %112 = vector.broadcast %110 : vector<1x1x16xf32> to vector<8x8x16xf32>
    %113 = arith.mulf %111, %112 : vector<8x8x16xf32>
    %114 = vector.shape_cast %51 : vector<16xf32> to vector<1x1x16xf32>
    %115 = vector.broadcast %8 : vector<8x8x1xf32> to vector<8x8x16xf32>
    %116 = vector.broadcast %114 : vector<1x1x16xf32> to vector<8x8x16xf32>
    %117 = arith.mulf %115, %116 : vector<8x8x16xf32>
    %118 = arith.addf %113, %117 : vector<8x8x16xf32>
    %119 = vector.shape_cast %53 : vector<16xf32> to vector<1x1x16xf32>
    %120 = vector.broadcast %11 : vector<8x8x1xf32> to vector<8x8x16xf32>
    %121 = vector.broadcast %119 : vector<1x1x16xf32> to vector<8x8x16xf32>
    %122 = arith.mulf %120, %121 : vector<8x8x16xf32>
    %123 = arith.addf %118, %122 : vector<8x8x16xf32>
    %124 = vector.shape_cast %55 : vector<16xf32> to vector<1x1x16xf32>
    %125 = vector.broadcast %17 : vector<8x8x1xf32> to vector<8x8x16xf32>
    %126 = vector.broadcast %124 : vector<1x1x16xf32> to vector<8x8x16xf32>
    %127 = arith.mulf %125, %126 : vector<8x8x16xf32>
    %128 = arith.addf %123, %127 : vector<8x8x16xf32>
    %129 = vector.shape_cast %57 : vector<16xf32> to vector<1x1x16xf32>
    %130 = vector.broadcast %20 : vector<8x8x1xf32> to vector<8x8x16xf32>
    %131 = vector.broadcast %129 : vector<1x1x16xf32> to vector<8x8x16xf32>
    %132 = arith.mulf %130, %131 : vector<8x8x16xf32>
    %133 = arith.addf %128, %132 : vector<8x8x16xf32>
    %134 = vector.shape_cast %59 : vector<16xf32> to vector<1x1x16xf32>
    %135 = vector.broadcast %23 : vector<8x8x1xf32> to vector<8x8x16xf32>
    %136 = vector.broadcast %134 : vector<1x1x16xf32> to vector<8x8x16xf32>
    %137 = arith.mulf %135, %136 : vector<8x8x16xf32>
    %138 = arith.addf %133, %137 : vector<8x8x16xf32>
    %139 = vector.shape_cast %61 : vector<16xf32> to vector<1x1x16xf32>
    %140 = vector.broadcast %29 : vector<8x8x1xf32> to vector<8x8x16xf32>
    %141 = vector.broadcast %139 : vector<1x1x16xf32> to vector<8x8x16xf32>
    %142 = arith.mulf %140, %141 : vector<8x8x16xf32>
    %143 = arith.addf %138, %142 : vector<8x8x16xf32>
    %144 = vector.shape_cast %63 : vector<16xf32> to vector<1x1x16xf32>
    %145 = vector.broadcast %32 : vector<8x8x1xf32> to vector<8x8x16xf32>
    %146 = vector.broadcast %144 : vector<1x1x16xf32> to vector<8x8x16xf32>
    %147 = arith.mulf %145, %146 : vector<8x8x16xf32>
    %148 = arith.addf %143, %147 : vector<8x8x16xf32>
    %149 = vector.shape_cast %65 : vector<16xf32> to vector<1x1x16xf32>
    %150 = vector.broadcast %35 : vector<8x8x1xf32> to vector<8x8x16xf32>
    %151 = vector.broadcast %149 : vector<1x1x16xf32> to vector<8x8x16xf32>
    %152 = arith.mulf %150, %151 : vector<8x8x16xf32>
    %153 = arith.addf %148, %152 : vector<8x8x16xf32>
    %154 = arith.maximumf %109, %153 : vector<8x8x16xf32>
    %155 = vector.shape_cast %49 : vector<16xf32> to vector<1x1x16xf32>
    %156 = vector.broadcast %14 : vector<8x8x1xf32> to vector<8x8x16xf32>
    %157 = vector.broadcast %155 : vector<1x1x16xf32> to vector<8x8x16xf32>
    %158 = arith.mulf %156, %157 : vector<8x8x16xf32>
    %159 = vector.shape_cast %51 : vector<16xf32> to vector<1x1x16xf32>
    %160 = vector.broadcast %17 : vector<8x8x1xf32> to vector<8x8x16xf32>
    %161 = vector.broadcast %159 : vector<1x1x16xf32> to vector<8x8x16xf32>
    %162 = arith.mulf %160, %161 : vector<8x8x16xf32>
    %163 = arith.addf %158, %162 : vector<8x8x16xf32>
    %164 = vector.shape_cast %53 : vector<16xf32> to vector<1x1x16xf32>
    %165 = vector.broadcast %20 : vector<8x8x1xf32> to vector<8x8x16xf32>
    %166 = vector.broadcast %164 : vector<1x1x16xf32> to vector<8x8x16xf32>
    %167 = arith.mulf %165, %166 : vector<8x8x16xf32>
    %168 = arith.addf %163, %167 : vector<8x8x16xf32>
    %169 = vector.shape_cast %55 : vector<16xf32> to vector<1x1x16xf32>
    %170 = vector.broadcast %26 : vector<8x8x1xf32> to vector<8x8x16xf32>
    %171 = vector.broadcast %169 : vector<1x1x16xf32> to vector<8x8x16xf32>
    %172 = arith.mulf %170, %171 : vector<8x8x16xf32>
    %173 = arith.addf %168, %172 : vector<8x8x16xf32>
    %174 = vector.shape_cast %57 : vector<16xf32> to vector<1x1x16xf32>
    %175 = vector.broadcast %29 : vector<8x8x1xf32> to vector<8x8x16xf32>
    %176 = vector.broadcast %174 : vector<1x1x16xf32> to vector<8x8x16xf32>
    %177 = arith.mulf %175, %176 : vector<8x8x16xf32>
    %178 = arith.addf %173, %177 : vector<8x8x16xf32>
    %179 = vector.shape_cast %59 : vector<16xf32> to vector<1x1x16xf32>
    %180 = vector.broadcast %32 : vector<8x8x1xf32> to vector<8x8x16xf32>
    %181 = vector.broadcast %179 : vector<1x1x16xf32> to vector<8x8x16xf32>
    %182 = arith.mulf %180, %181 : vector<8x8x16xf32>
    %183 = arith.addf %178, %182 : vector<8x8x16xf32>
    %184 = vector.shape_cast %61 : vector<16xf32> to vector<1x1x16xf32>
    %185 = vector.broadcast %38 : vector<8x8x1xf32> to vector<8x8x16xf32>
    %186 = vector.broadcast %184 : vector<1x1x16xf32> to vector<8x8x16xf32>
    %187 = arith.mulf %185, %186 : vector<8x8x16xf32>
    %188 = arith.addf %183, %187 : vector<8x8x16xf32>
    %189 = vector.shape_cast %63 : vector<16xf32> to vector<1x1x16xf32>
    %190 = vector.broadcast %41 : vector<8x8x1xf32> to vector<8x8x16xf32>
    %191 = vector.broadcast %189 : vector<1x1x16xf32> to vector<8x8x16xf32>
    %192 = arith.mulf %190, %191 : vector<8x8x16xf32>
    %193 = arith.addf %188, %192 : vector<8x8x16xf32>
    %194 = vector.shape_cast %65 : vector<16xf32> to vector<1x1x16xf32>
    %195 = vector.broadcast %44 : vector<8x8x1xf32> to vector<8x8x16xf32>
    %196 = vector.broadcast %194 : vector<1x1x16xf32> to vector<8x8x16xf32>
    %197 = arith.mulf %195, %196 : vector<8x8x16xf32>
    %198 = arith.addf %193, %197 : vector<8x8x16xf32>
    %199 = arith.maximumf %154, %198 : vector<8x8x16xf32>
    %200 = vector.shape_cast %49 : vector<16xf32> to vector<1x1x16xf32>
    %201 = vector.broadcast %17 : vector<8x8x1xf32> to vector<8x8x16xf32>
    %202 = vector.broadcast %200 : vector<1x1x16xf32> to vector<8x8x16xf32>
    %203 = arith.mulf %201, %202 : vector<8x8x16xf32>
    %204 = vector.shape_cast %51 : vector<16xf32> to vector<1x1x16xf32>
    %205 = vector.broadcast %20 : vector<8x8x1xf32> to vector<8x8x16xf32>
    %206 = vector.broadcast %204 : vector<1x1x16xf32> to vector<8x8x16xf32>
    %207 = arith.mulf %205, %206 : vector<8x8x16xf32>
    %208 = arith.addf %203, %207 : vector<8x8x16xf32>
    %209 = vector.shape_cast %53 : vector<16xf32> to vector<1x1x16xf32>
    %210 = vector.broadcast %23 : vector<8x8x1xf32> to vector<8x8x16xf32>
    %211 = vector.broadcast %209 : vector<1x1x16xf32> to vector<8x8x16xf32>
    %212 = arith.mulf %210, %211 : vector<8x8x16xf32>
    %213 = arith.addf %208, %212 : vector<8x8x16xf32>
    %214 = vector.shape_cast %55 : vector<16xf32> to vector<1x1x16xf32>
    %215 = vector.broadcast %29 : vector<8x8x1xf32> to vector<8x8x16xf32>
    %216 = vector.broadcast %214 : vector<1x1x16xf32> to vector<8x8x16xf32>
    %217 = arith.mulf %215, %216 : vector<8x8x16xf32>
    %218 = arith.addf %213, %217 : vector<8x8x16xf32>
    %219 = vector.shape_cast %57 : vector<16xf32> to vector<1x1x16xf32>
    %220 = vector.broadcast %32 : vector<8x8x1xf32> to vector<8x8x16xf32>
    %221 = vector.broadcast %219 : vector<1x1x16xf32> to vector<8x8x16xf32>
    %222 = arith.mulf %220, %221 : vector<8x8x16xf32>
    %223 = arith.addf %218, %222 : vector<8x8x16xf32>
    %224 = vector.shape_cast %59 : vector<16xf32> to vector<1x1x16xf32>
    %225 = vector.broadcast %35 : vector<8x8x1xf32> to vector<8x8x16xf32>
    %226 = vector.broadcast %224 : vector<1x1x16xf32> to vector<8x8x16xf32>
    %227 = arith.mulf %225, %226 : vector<8x8x16xf32>
    %228 = arith.addf %223, %227 : vector<8x8x16xf32>
    %229 = vector.shape_cast %61 : vector<16xf32> to vector<1x1x16xf32>
    %230 = vector.broadcast %41 : vector<8x8x1xf32> to vector<8x8x16xf32>
    %231 = vector.broadcast %229 : vector<1x1x16xf32> to vector<8x8x16xf32>
    %232 = arith.mulf %230, %231 : vector<8x8x16xf32>
    %233 = arith.addf %228, %232 : vector<8x8x16xf32>
    %234 = vector.shape_cast %63 : vector<16xf32> to vector<1x1x16xf32>
    %235 = vector.broadcast %44 : vector<8x8x1xf32> to vector<8x8x16xf32>
    %236 = vector.broadcast %234 : vector<1x1x16xf32> to vector<8x8x16xf32>
    %237 = arith.mulf %235, %236 : vector<8x8x16xf32>
    %238 = arith.addf %233, %237 : vector<8x8x16xf32>
    %239 = vector.shape_cast %65 : vector<16xf32> to vector<1x1x16xf32>
    %240 = vector.broadcast %47 : vector<8x8x1xf32> to vector<8x8x16xf32>
    %241 = vector.broadcast %239 : vector<1x1x16xf32> to vector<8x8x16xf32>
    %242 = arith.mulf %240, %241 : vector<8x8x16xf32>
    %243 = arith.addf %238, %242 : vector<8x8x16xf32>
    %244 = arith.maximumf %199, %243 : vector<8x8x16xf32>
    %c0_82 = arith.constant 0 : index
    %c0_83 = arith.constant 0 : index
    %245 = vector.load %arg3[%c0_82, %c0_83] : memref<1x16xf32, #tpu.memory_space<vmem>>, vector<1x16xf32>
    %246 = vector.shape_cast %245 : vector<1x16xf32> to vector<16xf32>
    %247 = vector.shape_cast %246 : vector<16xf32> to vector<1x1x16xf32>
    %248 = vector.broadcast %247 : vector<1x1x16xf32> to vector<8x8x16xf32>
    %249 = arith.addf %244, %248 : vector<8x8x16xf32>
    %cst = arith.constant 0.000000e+00 : f32
    %250 = vector.broadcast %cst : f32 to vector<8x8x16xf32>
    %251 = arith.maximumf %249, %250 : vector<8x8x16xf32>
    %252 = arith.truncf %251 : vector<8x8x16xf32> to vector<8x8x16xbf16>
    %c0_84 = arith.constant 0 : index
    %c0_85 = arith.constant 0 : index
    %c0_86 = arith.constant 0 : index
    %c0_87 = arith.constant 0 : index
    %253 = vector.load %arg4[%c0_84, %c0_85, %c0_86, %c0_87] : memref<1x8x8x16xbf16, #tpu.memory_space<vmem>>, vector<1x8x8x16xbf16>
    %254 = vector.shape_cast %253 : vector<1x8x8x16xbf16> to vector<8x8x16xbf16>
    %255 = vector.shape_cast %252 : vector<8x8x16xbf16> to vector<1x8x8x16xbf16>
    tpu.vector_store %arg4[%c0_84, %c0_85, %c0_86, %c0_87], %255 {strides = array<i32>} : memref<1x8x8x16xbf16, #tpu.memory_space<vmem>>, vector<1x8x8x16xbf16>,
    return
  }
  func.func @transform_0(%arg0: i32) -> (i32, i32, i32, i32, i32) {
    %c0_i32 = arith.constant 0 : i32
    %c0_i32_0 = arith.constant 0 : i32
    %c0_i32_1 = arith.constant 0 : i32
    %c0_i32_2 = arith.constant 0 : i32
    %c0_i32_3 = arith.constant 0 : i32
    return %arg0, %c0_i32, %c0_i32_0, %c0_i32_1, %c0_i32_2 : i32, i32, i32, i32, i32
  }
  func.func @transform_1(%arg0: i32) -> (i32, i32) {
    %c0_i32 = arith.constant 0 : i32
    %c0_i32_0 = arith.constant 0 : i32
    %c0_i32_1 = arith.constant 0 : i32
    return %c0_i32, %c0_i32_0 : i32, i32
  }
  func.func @transform_2(%arg0: i32) -> (i32, i32) {
    %c0_i32 = arith.constant 0 : i32
    %c0_i32_0 = arith.constant 0 : i32
    %c0_i32_1 = arith.constant 0 : i32
    return %c0_i32, %c0_i32_0 : i32, i32
  }
  func.func @transform_3(%arg0: i32) -> (i32, i32, i32, i32) {
    %c0_i32 = arith.constant 0 : i32
    %c0_i32_0 = arith.constant 0 : i32
    %c0_i32_1 = arith.constant 0 : i32
    %c0_i32_2 = arith.constant 0 : i32
    return %arg0, %c0_i32, %c0_i32_0, %c0_i32_1 : i32, i32, i32, i32
  }
}

module attributes {stable_mosaic.version = 11 : i64} {
  func.func @_conv2_bn_relu_pool_kernel(%arg0: i32, %arg1: memref<1x9x256xbf16, #tpu.memory_space<vmem>>, %arg2: memref<256x128xbf16, #tpu.memory_space<vmem>>, %arg3: memref<1x32xf32, #tpu.memory_space<vmem>>, %arg4: memref<1x9x32xbf16, #tpu.memory_space<vmem>>) attributes {dimension_semantics = [#tpu.dimension_semantics<parallel>], iteration_bounds = array<i64: 2>, scalar_prefetch = 0 : i64, scratch_operands = 0 : i64, tpu.core_type = #tpu.core_type<tc>, window_params = [{transform_indices = @transform_0, window_bounds = array<i64: 1, 9, 256>}, {pipeline_mode = #tpu.pipeline_mode<synchronous>, transform_indices = @transform_1, window_bounds = array<i64: 256, 128>}, {pipeline_mode = #tpu.pipeline_mode<synchronous>, transform_indices = @transform_2, window_bounds = array<i64: 1, 32>}, {transform_indices = @transform_3, window_bounds = array<i64: 1, 9, 32>}]} {
    %c0 = arith.constant 0 : index
    %c0_0 = arith.constant 0 : index
    %c0_1 = arith.constant 0 : index
    %0 = vector.load %arg1[%c0, %c0_0, %c0_1] : memref<1x9x256xbf16, #tpu.memory_space<vmem>>, vector<1x9x256xbf16>
    %1 = vector.shape_cast %0 : vector<1x9x256xbf16> to vector<9x256xbf16>
    %c0_2 = arith.constant 0 : index
    %c0_3 = arith.constant 0 : index
    %2 = vector.load %arg2[%c0_2, %c0_3] : memref<256x128xbf16, #tpu.memory_space<vmem>>, vector<256x128xbf16>
    %cst = arith.constant dense<0.000000e+00> : vector<9x128xf32>
    %3 = tpu.matmul %1, %2, %cst {dimension_numbers = #tpu.dot_dimension_numbers<[1], [0], [0], [1], [0, 0, 1, 1], [], []>} : vector<9x256xbf16>, vector<256x128xbf16>, vector<9x128xf32> -> vector<9x128xf32>
    %4 = vector.extract_strided_slice %3 {offsets = [0, 0], sizes = [9, 32], strides = [1, 1]} : vector<9x128xf32> to vector<9x32xf32>
    %5 = vector.extract_strided_slice %3 {offsets = [0, 32], sizes = [9, 32], strides = [1, 1]} : vector<9x128xf32> to vector<9x32xf32>
    %6 = arith.maximumf %4, %5 : vector<9x32xf32>
    %7 = vector.extract_strided_slice %3 {offsets = [0, 64], sizes = [9, 32], strides = [1, 1]} : vector<9x128xf32> to vector<9x32xf32>
    %8 = vector.extract_strided_slice %3 {offsets = [0, 96], sizes = [9, 32], strides = [1, 1]} : vector<9x128xf32> to vector<9x32xf32>
    %9 = arith.maximumf %7, %8 : vector<9x32xf32>
    %10 = arith.maximumf %6, %9 : vector<9x32xf32>
    %c0_4 = arith.constant 0 : index
    %c0_5 = arith.constant 0 : index
    %11 = vector.load %arg3[%c0_4, %c0_5] : memref<1x32xf32, #tpu.memory_space<vmem>>, vector<1x32xf32>
    %12 = vector.shape_cast %11 : vector<1x32xf32> to vector<32xf32>
    %13 = vector.shape_cast %12 : vector<32xf32> to vector<1x32xf32>
    %14 = vector.broadcast %13 : vector<1x32xf32> to vector<9x32xf32>
    %15 = arith.addf %10, %14 : vector<9x32xf32>
    %cst_6 = arith.constant 0.000000e+00 : f32
    %16 = vector.broadcast %cst_6 : f32 to vector<9x32xf32>
    %17 = arith.maximumf %15, %16 : vector<9x32xf32>
    %18 = arith.truncf %17 : vector<9x32xf32> to vector<9x32xbf16>
    %c0_7 = arith.constant 0 : index
    %c0_8 = arith.constant 0 : index
    %c0_9 = arith.constant 0 : index
    %19 = vector.load %arg4[%c0_7, %c0_8, %c0_9] : memref<1x9x32xbf16, #tpu.memory_space<vmem>>, vector<1x9x32xbf16>
    %20 = vector.shape_cast %19 : vector<1x9x32xbf16> to vector<9x32xbf16>
    %21 = vector.shape_cast %18 : vector<9x32xbf16> to vector<1x9x32xbf16>
    tpu.vector_store %arg4[%c0_7, %c0_8, %c0_9], %21 {strides = array<i32>} : memref<1x9x32xbf16, #tpu.memory_space<vmem>>, vector<1x9x32xbf16>,
    return
  }
  func.func @transform_0(%arg0: i32) -> (i32, i32, i32) {
    %c0_i32 = arith.constant 0 : i32
    %c0_i32_0 = arith.constant 0 : i32
    %c0_i32_1 = arith.constant 0 : i32
    return %arg0, %c0_i32, %c0_i32_0 : i32, i32, i32
  }
  func.func @transform_1(%arg0: i32) -> (i32, i32) {
    %c0_i32 = arith.constant 0 : i32
    %c0_i32_0 = arith.constant 0 : i32
    %c0_i32_1 = arith.constant 0 : i32
    return %c0_i32, %c0_i32_0 : i32, i32
  }
  func.func @transform_2(%arg0: i32) -> (i32, i32) {
    %c0_i32 = arith.constant 0 : i32
    %c0_i32_0 = arith.constant 0 : i32
    %c0_i32_1 = arith.constant 0 : i32
    return %c0_i32, %c0_i32_0 : i32, i32
  }
  func.func @transform_3(%arg0: i32) -> (i32, i32, i32) {
    %c0_i32 = arith.constant 0 : i32
    %c0_i32_0 = arith.constant 0 : i32
    %c0_i32_1 = arith.constant 0 : i32
    return %arg0, %c0_i32, %c0_i32_0 : i32, i32, i32
  }
}

module attributes {stable_mosaic.version = 11 : i64} {
  func.func @_fc_fused_kernel(%arg0: i32, %arg1: i32, %arg2: memref<2x512xbf16, #tpu.memory_space<vmem>>, %arg3: memref<512x600xbf16, #tpu.memory_space<vmem>>, %arg4: memref<1x600xf32, #tpu.memory_space<vmem>>, %arg5: memref<600x16xbf16, #tpu.memory_space<vmem>>, %arg6: memref<1x16xf32, #tpu.memory_space<vmem>>, %arg7: memref<2x16xf32, #tpu.memory_space<vmem>>, %arg8: memref<2x600xf32, #tpu.memory_space<vmem>>) attributes {dimension_semantics = [#tpu.dimension_semantics<parallel>, #tpu.dimension_semantics<arbitrary>], iteration_bounds = array<i64: 1, 1>, scalar_prefetch = 0 : i64, scratch_operands = 1 : i64, tpu.core_type = #tpu.core_type<tc>, window_params = [{transform_indices = @transform_0, window_bounds = array<i64: 2, 512>}, {transform_indices = @transform_1, window_bounds = array<i64: 512, 600>}, {pipeline_mode = #tpu.pipeline_mode<synchronous>, transform_indices = @transform_2, window_bounds = array<i64: 1, 600>}, {pipeline_mode = #tpu.pipeline_mode<synchronous>, transform_indices = @transform_3, window_bounds = array<i64: 600, 16>}, {pipeline_mode = #tpu.pipeline_mode<synchronous>, transform_indices = @transform_4, window_bounds = array<i64: 1, 16>}, {transform_indices = @transform_5, window_bounds = array<i64: 2, 16>}]} {
    %c0_i32 = arith.constant 0 : i32
    %0 = arith.cmpi eq, %arg1, %c0_i32 : i32
    %1 = arith.extui %0 : i1 to i32
    %c0_i32_0 = arith.constant 0 : i32
    %2 = arith.cmpi ne, %1, %c0_i32_0 : i32
    scf.if %2 {
      %cst_10 = arith.constant 0.000000e+00 : f32
      %12 = vector.broadcast %cst_10 : f32 to vector<2x600xf32>
      %c0_11 = arith.constant 0 : index
      %c0_12 = arith.constant 0 : index
      %13 = vector.load %arg8[%c0_11, %c0_12] : memref<2x600xf32, #tpu.memory_space<vmem>>, vector<2x600xf32>
      tpu.vector_store %arg8[%c0_11, %c0_12], %12 {strides = array<i32>} : memref<2x600xf32, #tpu.memory_space<vmem>>, vector<2x600xf32>,
    } else {
    }
    %c0 = arith.constant 0 : index
    %c0_1 = arith.constant 0 : index
    %3 = vector.load %arg8[%c0, %c0_1] : memref<2x600xf32, #tpu.memory_space<vmem>>, vector<2x600xf32>
    %c0_2 = arith.constant 0 : index
    %c0_3 = arith.constant 0 : index
    %4 = vector.load %arg2[%c0_2, %c0_3] : memref<2x512xbf16, #tpu.memory_space<vmem>>, vector<2x512xbf16>
    %c0_4 = arith.constant 0 : index
    %c0_5 = arith.constant 0 : index
    %5 = vector.load %arg3[%c0_4, %c0_5] : memref<512x600xbf16, #tpu.memory_space<vmem>>, vector<512x600xbf16>
    %cst = arith.constant dense<0.000000e+00> : vector<2x600xf32>
    %6 = tpu.matmul %4, %5, %cst {dimension_numbers = #tpu.dot_dimension_numbers<[1], [0], [0], [1], [0, 0, 1, 1], [], []>} : vector<2x512xbf16>, vector<512x600xbf16>, vector<2x600xf32> -> vector<2x600xf32>
    %7 = arith.addf %3, %6 : vector<2x600xf32>
    %c0_6 = arith.constant 0 : index
    %c0_7 = arith.constant 0 : index
    %8 = vector.load %arg8[%c0_6, %c0_7] : memref<2x600xf32, #tpu.memory_space<vmem>>, vector<2x600xf32>
    tpu.vector_store %arg8[%c0_6, %c0_7], %7 {strides = array<i32>} : memref<2x600xf32, #tpu.memory_space<vmem>>, vector<2x600xf32>,
    %c0_i32_8 = arith.constant 0 : i32
    %9 = arith.cmpi eq, %arg1, %c0_i32_8 : i32
    %10 = arith.extui %9 : i1 to i32
    %c0_i32_9 = arith.constant 0 : i32
    %11 = arith.cmpi ne, %10, %c0_i32_9 : i32
    scf.if %11 {
      %c0_10 = arith.constant 0 : index
      %c0_11 = arith.constant 0 : index
      %12 = vector.load %arg8[%c0_10, %c0_11] : memref<2x600xf32, #tpu.memory_space<vmem>>, vector<2x600xf32>
      %c0_12 = arith.constant 0 : index
      %c0_13 = arith.constant 0 : index
      %13 = vector.load %arg4[%c0_12, %c0_13] : memref<1x600xf32, #tpu.memory_space<vmem>>, vector<1x600xf32>
      %14 = vector.broadcast %13 : vector<1x600xf32> to vector<2x600xf32>
      %15 = arith.addf %12, %14 : vector<2x600xf32>
      %16 = arith.truncf %15 : vector<2x600xf32> to vector<2x600xbf16>
      %c0_14 = arith.constant 0 : index
      %c0_15 = arith.constant 0 : index
      %17 = vector.load %arg5[%c0_14, %c0_15] : memref<600x16xbf16, #tpu.memory_space<vmem>>, vector<600x16xbf16>
      %cst_16 = arith.constant dense<0.000000e+00> : vector<2x16xf32>
      %18 = tpu.matmul %16, %17, %cst_16 {dimension_numbers = #tpu.dot_dimension_numbers<[1], [0], [0], [1], [0, 0, 1, 1], [], []>} : vector<2x600xbf16>, vector<600x16xbf16>, vector<2x16xf32> -> vector<2x16xf32>
      %c0_17 = arith.constant 0 : index
      %c0_18 = arith.constant 0 : index
      %19 = vector.load %arg6[%c0_17, %c0_18] : memref<1x16xf32, #tpu.memory_space<vmem>>, vector<1x16xf32>
      %20 = vector.broadcast %19 : vector<1x16xf32> to vector<2x16xf32>
      %21 = arith.addf %18, %20 : vector<2x16xf32>
      %c0_19 = arith.constant 0 : index
      %c0_20 = arith.constant 0 : index
      %22 = vector.load %arg7[%c0_19, %c0_20] : memref<2x16xf32, #tpu.memory_space<vmem>>, vector<2x16xf32>
      tpu.vector_store %arg7[%c0_19, %c0_20], %21 {strides = array<i32>} : memref<2x16xf32, #tpu.memory_space<vmem>>, vector<2x16xf32>,
    } else {
    }
    return
  }
  func.func @transform_0(%arg0: i32, %arg1: i32) -> (i32, i32) {
    %c0_i32 = arith.constant 0 : i32
    return %arg0, %arg1 : i32, i32
  }
  func.func @transform_1(%arg0: i32, %arg1: i32) -> (i32, i32) {
    %c0_i32 = arith.constant 0 : i32
    %c0_i32_0 = arith.constant 0 : i32
    return %arg1, %c0_i32 : i32, i32
  }
  func.func @transform_2(%arg0: i32, %arg1: i32) -> (i32, i32) {
    %c0_i32 = arith.constant 0 : i32
    %c0_i32_0 = arith.constant 0 : i32
    %c0_i32_1 = arith.constant 0 : i32
    return %c0_i32, %c0_i32_0 : i32, i32
  }
  func.func @transform_3(%arg0: i32, %arg1: i32) -> (i32, i32) {
    %c0_i32 = arith.constant 0 : i32
    %c0_i32_0 = arith.constant 0 : i32
    %c0_i32_1 = arith.constant 0 : i32
    return %c0_i32, %c0_i32_0 : i32, i32
  }
  func.func @transform_4(%arg0: i32, %arg1: i32) -> (i32, i32) {
    %c0_i32 = arith.constant 0 : i32
    %c0_i32_0 = arith.constant 0 : i32
    %c0_i32_1 = arith.constant 0 : i32
    return %c0_i32, %c0_i32_0 : i32, i32
  }
  func.func @transform_5(%arg0: i32, %arg1: i32) -> (i32, i32) {
    %c0_i32 = arith.constant 0 : i32
    %c0_i32_0 = arith.constant 0 : i32
    return %arg0, %c0_i32 : i32, i32
  }
}

</mosaic_0001>

<bundles_post_ra>
// kernel: convnet_forward.4
= control target key start
LH: loop header
LB: loop body
LE: loop exit
PB: predicated region body
PF: predicated region fallthrough
CT: control target
= control target key end

     0   :  { %s572_s12 = smov 0   ;;  %s644_s0 = inlined_call_operand.vmem [shape: bf16[2,9,256], index: 0, kind: input, shape index: {}]   ;;  %s645_s1 = inlined_call_operand.vmem [shape: bf16[256,128], index: 1, kind: input, shape index: {}]   ;;  %s646_s2 = inlined_call_operand.vmem [shape: f32[1,32], index: 2, kind: input, shape index: {}]   ;;  %s647_s3 = inlined_call_operand.vmem [shape: bf16[2,9,32], index: 3, kind: output, shape index: {}]  }
   0x1 LB: > { %s455_s13 = sadd.s32 4294967295, %s548_s12   ;;  %p459_p0 = scmp.ge.s32.totalorder %s548_s12, 1  ;;  %s548_s12 = sphi %s572_s12, %s13_s12  }
   0x2   : > { %p137_p1 = scmp.lt.s32.totalorder %s548_s12, 3 }
   0x4   : > { %p138_p2 = pnand %p459_p0, %p137_p1 }
   0x5   : > { %v523_v0 = vld [vmem:[%s645_s1 + $0x40] sm:$0xff] (!%p138_p2)   ;;  %v525_v2 = vld [vmem:[%s645_s1 + $0x48] sm:$0xff] (!%p138_p2)   ;;  %p161_p3 = scmp.lt.s32.totalorder (!%p138_p2), %s455_s13, 1  ;;  %v527_v4 = vld [vmem:[%s645_s1 + $0x50] sm:$0xff] (!%p138_p2)   ;;  %s550_s25 = smov (!%p138_p2), 96   ;;  %vm394_vm0 = vcmask (!%p138_p2), 253952  }
   0x6   : > { %141 = sbr.rel (%p138_p2) target bundleno = 500 (0x1f4), region = 32  ;;  %v524_v1 = vld [vmem:[%s645_s1] sm:$0xff] (!%p138_p2)   ;;  %491 = vmatprep.subr.bf16.mxu0 (!%p138_p2), %v523_v0  ;;  %v526_v3 = vld [vmem:[%s645_s1 + $0x8] sm:$0xff] (!%p138_p2)   ;;  %v528_v5 = vld [vmem:[%s645_s1 + $0x10] sm:$0xff] (!%p138_p2)   ;;  %s551_s26 = smov (!%p138_p2), 64   ;;  %vm392_vm3 = vcmask (!%p138_p2), 257024  }
   0x7   : > { %492 = vmatpush3.bf16.msra.mxu0 (!%p138_p2), %v524_v1  ;;  %v529_v6 = vld [vmem:[%s645_s1 + $0x58] sm:$0xff] (!%p138_p2)   ;;  %v531_v8 = vld [vmem:[%s645_s1 + $0x60] sm:$0xff] (!%p138_p2)   ;;  %v533_v10 = vld [vmem:[%s645_s1 + $0x68] sm:$0xff] (!%p138_p2)   ;;  %vm395_vm1 = vsmask.f32 (!%p138_p2), 256 }
   0x8   : > { %493 = vmatprep.subr.bf16.mxu0 (!%p138_p2), %v525_v2  ;;  %v530_v7 = vld [vmem:[%s645_s1 + $0x18] sm:$0xff] (!%p138_p2)   ;;  %v532_v9 = vld [vmem:[%s645_s1 + $0x20] sm:$0xff] (!%p138_p2)   ;;  %v534_v12 = vld [vmem:[%s645_s1 + $0x28] sm:$0xff] (!%p138_p2)  }
   0x9   : > { %v535_v13 = vld [vmem:[%s645_s1 + $0x70] sm:$0xff] (!%p138_p2)   ;;  %v537_v15 = vld [vmem:[%s645_s1 + $0x78] sm:$0xff] (!%p138_p2)   ;;  %v482_v28 = vld [vmem:[%s646_s2] ss:$0 sm:$0xff] (!%p138_p2) }
   0xa   : > { %v536_v14 = vld [vmem:[%s645_s1 + $0x30] sm:$0xff] (!%p138_p2)   ;;  %v538_v16 = vld [vmem:[%s645_s1 + $0x38] sm:$0xff] (!%p138_p2)   ;;  %vm396_vm2 = vmand (!%p138_p2), %vm394_vm0, %vm395_vm1 }
   0xb   : > { %494 = vmatpush3.bf16.msra.mxu0 (!%p138_p2), %v526_v3 }
   0xc   : > { %495 = vmatprep.subr.bf16.mxu0 (!%p138_p2), %v527_v4 }
   0xd   : > { %s649_s13 = smov (!%p161_p3, %s455_s13), 1 }
   0xe   : > { %s487_s30 = sshll.u32 %s649_s13, 4  ;;  %s488_s27 = sshll.u32 %s649_s13, 3 }
   0xf   : > { %496 = vmatpush3.bf16.msra.mxu0 %v528_v5  ;;  %s165_s8 = scalar_lea.vmem %s644_s0, %s487_s30  ;;  %s170_s5 = scalar_lea.vmem %s647_s3, %s488_s27 }
  0x10   : > { %497 = vmatprep.subr.bf16.mxu0 %v529_v6  ;;  %v541_v11 = vld [vmem:[%s165_s8 + $0x4] ss:$8 sps:$4 sm:$0x1f]   ;;  %v539_v17 = vld [vmem:[%s165_s8] ss:$8 sps:$4 sm:$0x1f]  }
  0x11   : > { %344 = vmatprep.mubr.bf16.mxu0 %v541_v11  ;;  %v397_v35 = vld [vmem:[%s170_s5 + $0x4] sm:$0x1] }
  0x13   : > { %498 = vmatpush3.bf16.msra.mxu0 %v530_v7 }
  0x14   : > { %499 = vmatprep.subr.bf16.mxu0 %v531_v8 }
  0x17   : > { %500 = vmatpush3.bf16.msra.mxu0 %v532_v9 }
  0x18   : > { %501 = vmatprep.subr.bf16.mxu0 %v533_v10 }
  0x1b   : > { %502 = vmatpush3.bf16.msra.mxu0 %v534_v12 }
  0x1c   : > { %503 = vmatprep.subr.bf16.mxu0 %v535_v13 }
  0x1f   : > { %504 = vmatpush3.bf16.msra.mxu0 %v536_v14 }
  0x20   : > { %505 = vmatprep.subr.bf16.mxu0 %v537_v15 }
  0x23   : > { %506 = vmatpush3.bf16.msra.mxu0 %v538_v16 }
  0x26   : > { %345 = vmatmul.mubr.bf16.vlgmr.msra.gmra.mrb[0].mxu0 %v539_v17 }
  0xf9   : > { %v507_v18 = vpop.f32.mrb[0].mxu0 }
  0xfa   : > { %v508_v19 = vpop.f32.mrb[1].mxu0 }
  0xfb   : > { %v509_v20 = vadd.f32 %v508_v19, %v507_v18  ;;  %v510_v21 = vpop.f32.mrb[2].mxu0 }
  0xfc   : > { %v511_v22 = vpop.f32.mrb[3].mxu0 }
  0xfd   : > { %v512_v23 = vadd.f32 %v511_v22, %v510_v21 }
  0xff   : > { %357 = vrot.lane.b32.xlu0 %v512_v23, %s550_s25 }
 0x103   : > { %355 = vrot.lane.b32.xlu0 %v509_v20, %s550_s25 }
 0x171   : > { %v358_v24 = vpop.permute.xlu0 %357 }
 0x172   : > { %v362_v25 = vmax.f32 %v512_v23, %v358_v24 }
 0x174   : > { %367 = vrot.lane.b32.xlu1 %v362_v25, %s551_s26 }
 0x175   : > { %v356_v26 = vpop.permute.xlu0 %355 }
 0x176   : > { %v361_v27 = vmax.f32 %v509_v20, %v356_v26 }
 0x178   : > { %365 = vrot.lane.b32.xlu1 %v361_v27, %s551_s26 }
 0x1e6   : > { %v368_v29 = vpop.permute.xlu1 %367 }
 0x1e7   : > { %v372_v30 = vmax.f32 %v362_v25, %v368_v29 }
 0x1e9   : > { %v381_v31 = vadd.f32 %v482_v28, %v372_v30 }
 0x1ea   : > { %v366_v32 = vpop.permute.xlu1 %365 }
 0x1eb   : > { %v383_v33 = vmax.f32 %v381_v31, 0.0  ;;  %v371_v34 = vmax.f32 %v361_v27, %v366_v32 }
 0x1ed   : > { %v490_v36 = vpack.c.bf16 %v383_v33, %v383_v33  ;;  %v380_v37 = vadd.f32 %v482_v28, %v371_v34 }
 0x1ef   : > { %v398_v38 = vsel %vm396_vm2, %v490_v36, %v397_v35  ;;  %v382_v39 = vmax.f32 %v380_v37, 0.0 }
 0x1f0   : > { %399 = vst [vmem:[%s170_s5 + $0x4] sm:$0x1] %v398_v38 }
 0x1f1   : > { %v489_v40 = vpack.c.bf16 %v382_v39, %v382_v39 }
 0x1f3   : > { %393 = vst.msk [vmem:[%s170_s5] sm:$0xf] %vm392_vm3, %v489_v40 }
 0x1f4 PF: > { %s13_s12 = sadd.s32 1, %s548_s12  }
 0x1f5   : > { %p10_p4 = scmp.ge.s32.totalorder %s13_s12, 4  }
 0x1f7   :  { %12 = sbr.rel (!%p10_p4) target bundleno = 1 (0x1), region = 62 }

// kernel: convnet_forward.3
= control target key start
LH: loop header
LB: loop body
LE: loop exit
PB: predicated region body
PF: predicated region fallthrough
CT: control target
= control target key end

     0   :  { %s2612_s12 = smov 0   ;;  %s3598_s0 = inlined_call_operand.vmem [shape: bf16[2,16,8,8,1], index: 0, kind: input, shape index: {}]   ;;  %s3599_s1 = inlined_call_operand.vmem [shape: f32[9,16], index: 1, kind: input, shape index: {}]   ;;  %s3600_s2 = inlined_call_operand.vmem [shape: f32[1,16], index: 2, kind: input, shape index: {}]   ;;  %s3601_s3 = inlined_call_operand.vmem [shape: bf16[2,8,8,16], index: 3, kind: output, shape index: {}]  }
   0x1 LB: > { %s1790_s13 = sadd.s32 4294967295, %s2589_s12   ;;  %p1794_p0 = scmp.ge.s32.totalorder %s2589_s12, 1  ;;  %s2589_s12 = sphi %s2612_s12, %s13_s12  }
   0x2   : > { %p137_p1 = scmp.lt.s32.totalorder %s2589_s12, 3 }
   0x4   : > { %p138_p2 = pnand %p1794_p0, %p137_p1 }
   0x6   : > { %141 = sbr.rel (%p138_p2) target bundleno = 344 (0x158), region = 32 }
   0xd   : > { %p161_p3 = scmp.lt.s32.totalorder %s1790_s13, 1  ;;  %v2591_v0 = vmov 0   ;;  %vm1726_vm0 = vcmask 125952  }
   0xe   : > { %2272 = vset.pattern.permute.xlu1 %v2591_v0  ;;  %2261 = vset.pattern.permute.xlu0 %v2591_v0 }
   0xf   : > { %s3753_s13 = smov (!%p161_p3, %s1790_s13), 1 }
  0x10   : > { %s1931_s14 = sshll.u32 %s3753_s13, 9  ;;  %s1932_s11 = sshll.u32 %s3753_s13, 5 }
  0x11   : > { %s2626_s17 = scalar_lea.vmem %s3598_s0, %s1931_s14  ;;  %s170_s16 = scalar_lea.vmem %s3601_s3, %s1932_s11 }
  0x12   : > { %v2190_v1 = vld [vmem:[%s2626_s17 + $0x10] sm:$0xff]   ;;  %v1934_v2 = vld [vmem:[%s2626_s17] sm:$0xff]   ;;  %v2191_v3 = vld [vmem:[%s2626_s17 + $0x18] sm:$0xff]  }
  0x13   : > { %v1943_v4 = vunpack.c.l.bf16 %v2190_v1  ;;  %v1944_v5 = vunpack.c.h.bf16 %v2190_v1  ;;  %v1935_v6 = vunpack.c.l.bf16 %v1934_v2  ;;  %v1936_v7 = vunpack.c.h.bf16 %v1934_v2  ;;  %v2189_v8 = vld [vmem:[%s2626_s17 + $0x8] sm:$0xff]   ;;  %v2192_v14 = vld [vmem:[%s2626_s17 + $0x20] sm:$0xff]   ;;  %v2195_v23 = vld [vmem:[%s2626_s17 + $0x38] sm:$0xff]  }
  0x14   : > { %v2193_v9 = vld [vmem:[%s2626_s17 + $0x28] sm:$0xff]   ;;  %v1947_v10 = vunpack.c.l.bf16 %v2191_v3  ;;  %v1948_v11 = vunpack.c.h.bf16 %v2191_v3  ;;  %v1939_v12 = vunpack.c.l.bf16 %v2189_v8  ;;  %v1940_v13 = vunpack.c.h.bf16 %v2189_v8  ;;  %v2194_v24 = vld [vmem:[%s2626_s17 + $0x30] sm:$0xff]   ;;  %v2196_v32 = vld [vmem:[%s2626_s17 + $0x40] sm:$0xff]  }
  0x15   : > { %v2273_v15 = vpack.i.bf16 %v1944_v5, %v1943_v4  ;;  %v2262_v16 = vpack.i.bf16 %v1936_v7, %v1935_v6  ;;  %v1955_v17 = vunpack.c.l.bf16 %v2193_v9  ;;  %v1956_v18 = vunpack.c.h.bf16 %v2193_v9  ;;  %v2197_v31 = vld [vmem:[%s2626_s17 + $0x48] sm:$0xff]   ;;  %v2199_v39 = vld [vmem:[%s2626_s17 + $0x58] sm:$0xff]   ;;  %v2198_v40 = vld [vmem:[%s2626_s17 + $0x50] sm:$0xff]  }
  0x16   : > { %v2278_v19 = vpack.i.bf16 %v1948_v11, %v1947_v10  ;;  %v2267_v20 = vpack.i.bf16 %v1940_v13, %v1939_v12  ;;  %v1951_v21 = vunpack.c.l.bf16 %v2192_v14  ;;  %v1952_v22 = vunpack.c.h.bf16 %v2192_v14  ;;  %v2205_v47 = vld [vmem:[%s2626_s17 + $0x88] sm:$0xff]   ;;  %v2204_v48 = vld [vmem:[%s2626_s17 + $0x80] sm:$0xff]   ;;  %v2207_v55 = vld [vmem:[%s2626_s17 + $0x98] sm:$0xff]  }
  0x17   : > { %2274 = vperm.xlu1 %2272, %v2273_v15   ;;  %2263 = vperm.xlu0 %2261, %v2262_v16   ;;  %v2288_v25 = vpack.i.bf16 %v1956_v18, %v1955_v17  ;;  %v1963_v26 = vunpack.c.l.bf16 %v2195_v23  ;;  %v1964_v28 = vunpack.c.h.bf16 %v2195_v23  ;;  %v1959_v29 = vunpack.c.l.bf16 %v2194_v24  ;;  %v2206_v56 = vld [vmem:[%s2626_s17 + $0x90] sm:$0xff]   ;;  %v2209_v63 = vld [vmem:[%s2626_s17 + $0xa8] sm:$0xff]   ;;  %v2208_v0 = vld [vmem:[%s2626_s17 + $0xa0] sm:$0xff]  }
  0x18   : > { %v2283_v27 = vpack.i.bf16 %v1952_v22, %v1951_v21  ;;  %v1960_v30 = vunpack.c.h.bf16 %v2194_v24  ;;  %v1971_v33 = vunpack.c.l.bf16 %v2197_v31  ;;  %v1972_v34 = vunpack.c.h.bf16 %v2197_v31  ;;  %v2211_v7 = vld [vmem:[%s2626_s17 + $0xb8] sm:$0xff]   ;;  %v2210_v8 = vld [vmem:[%s2626_s17 + $0xb0] sm:$0xff]   ;;  %v2213_v15 = vld [vmem:[%s2626_s17 + $0xc8] sm:$0xff]  }
  0x19   : > { %v2298_v35 = vpack.i.bf16 %v1964_v28, %v1963_v26  ;;  %v1967_v37 = vunpack.c.l.bf16 %v2196_v32  ;;  %v1968_v38 = vunpack.c.h.bf16 %v2196_v32  ;;  %v1979_v42 = vunpack.c.l.bf16 %v2199_v39  ;;  %v2212_v16 = vld [vmem:[%s2626_s17 + $0xc0] sm:$0xff]   ;;  %v2215_v23 = vld [vmem:[%s2626_s17 + $0xd8] sm:$0xff]   ;;  %v2214_v24 = vld [vmem:[%s2626_s17 + $0xd0] sm:$0xff]  }
  0x1a   : > { %v2293_v36 = vpack.i.bf16 %v1960_v30, %v1959_v29  ;;  %v2308_v41 = vpack.i.bf16 %v1972_v34, %v1971_v33  ;;  %v1980_v44 = vunpack.c.h.bf16 %v2199_v39  ;;  %v1975_v45 = vunpack.c.l.bf16 %v2198_v40  ;;  %v2221_v31 = vld [vmem:[%s2626_s17 + $0x108] sm:$0xff]   ;;  %v2220_v32 = vld [vmem:[%s2626_s17 + $0x100] sm:$0xff]   ;;  %v2223_v39 = vld [vmem:[%s2626_s17 + $0x118] sm:$0xff]  }
  0x1b   : > { %2279 = vperm.xlu1 %2272, %v2278_v19   ;;  %2268 = vperm.xlu0 %2261, %v2267_v20   ;;  %v2303_v43 = vpack.i.bf16 %v1968_v38, %v1967_v37  ;;  %v1976_v46 = vunpack.c.h.bf16 %v2198_v40  ;;  %v2003_v49 = vunpack.c.l.bf16 %v2205_v47  ;;  %v2004_v50 = vunpack.c.h.bf16 %v2205_v47  ;;  %v2222_v40 = vld [vmem:[%s2626_s17 + $0x110] sm:$0xff]   ;;  %v2225_v47 = vld [vmem:[%s2626_s17 + $0x128] sm:$0xff]  }
  0x1c   : > { %v2318_v51 = vpack.i.bf16 %v1980_v44, %v1979_v42  ;;  %v1999_v53 = vunpack.c.l.bf16 %v2204_v48  ;;  %v2000_v54 = vunpack.c.h.bf16 %v2204_v48  ;;  %v2011_v58 = vunpack.c.l.bf16 %v2207_v55  ;;  %v2224_v48 = vld [vmem:[%s2626_s17 + $0x120] sm:$0xff]  }
  0x1d   : > { %v2313_v52 = vpack.i.bf16 %v1976_v46, %v1975_v45  ;;  %v2328_v57 = vpack.i.bf16 %v2004_v50, %v2003_v49  ;;  %v2012_v60 = vunpack.c.h.bf16 %v2207_v55  ;;  %v2007_v61 = vunpack.c.l.bf16 %v2206_v56  ;;  %v2227_v55 = vld [vmem:[%s2626_s17 + $0x138] sm:$0xff]  }
  0x1e   : > { %v2323_v59 = vpack.i.bf16 %v2000_v54, %v1999_v53  ;;  %v2008_v62 = vunpack.c.h.bf16 %v2206_v56  ;;  %v2019_v1 = vunpack.c.l.bf16 %v2209_v63  ;;  %v2020_v2 = vunpack.c.h.bf16 %v2209_v63  ;;  %v2226_v56 = vld [vmem:[%s2626_s17 + $0x130] sm:$0xff]   ;;  %v2229_v63 = vld [vmem:[%s2626_s17 + $0x148] sm:$0xff]  }
  0x1f   : > { %2289 = vperm.xlu1 %2272, %v2288_v25   ;;  %2284 = vperm.xlu0 %2261, %v2283_v27   ;;  %v2338_v3 = vpack.i.bf16 %v2012_v60, %v2011_v58  ;;  %v2015_v5 = vunpack.c.l.bf16 %v2208_v0  ;;  %v2016_v6 = vunpack.c.h.bf16 %v2208_v0  ;;  %v2027_v10 = vunpack.c.l.bf16 %v2211_v7  ;;  %v2228_v0 = vld [vmem:[%s2626_s17 + $0x140] sm:$0xff]  }
  0x20   : > { %v2333_v4 = vpack.i.bf16 %v2008_v62, %v2007_v61  ;;  %v2348_v9 = vpack.i.bf16 %v2020_v2, %v2019_v1  ;;  %v2028_v12 = vunpack.c.h.bf16 %v2211_v7  ;;  %v2023_v13 = vunpack.c.l.bf16 %v2210_v8  ;;  %v2231_v7 = vld [vmem:[%s2626_s17 + $0x158] sm:$0xff]  }
  0x21   : > { %v2343_v11 = vpack.i.bf16 %v2016_v6, %v2015_v5  ;;  %v2024_v14 = vunpack.c.h.bf16 %v2210_v8  ;;  %v2035_v17 = vunpack.c.l.bf16 %v2213_v15  ;;  %v2036_v18 = vunpack.c.h.bf16 %v2213_v15  ;;  %v2230_v8 = vld [vmem:[%s2626_s17 + $0x150] sm:$0xff]   ;;  %v2201_v15 = vld [vmem:[%s2626_s17 + $0x68] sm:$0xff]  }
  0x22   : > { %v2358_v19 = vpack.i.bf16 %v2028_v12, %v2027_v10  ;;  %v2031_v21 = vunpack.c.l.bf16 %v2212_v16  ;;  %v2032_v22 = vunpack.c.h.bf16 %v2212_v16  ;;  %v2043_v26 = vunpack.c.l.bf16 %v2215_v23  ;;  %v2200_v16 = vld [vmem:[%s2626_s17 + $0x60] sm:$0xff]  }
  0x23   : > { %2299 = vperm.xlu1 %2272, %v2298_v35   ;;  %2294 = vperm.xlu0 %2261, %v2293_v36   ;;  %v2353_v20 = vpack.i.bf16 %v2024_v14, %v2023_v13  ;;  %v2368_v25 = vpack.i.bf16 %v2036_v18, %v2035_v17  ;;  %v2044_v28 = vunpack.c.h.bf16 %v2215_v23  ;;  %v2039_v29 = vunpack.c.l.bf16 %v2214_v24  ;;  %v2203_v23 = vld [vmem:[%s2626_s17 + $0x78] sm:$0xff]  }
  0x24   : > { %v2363_v27 = vpack.i.bf16 %v2032_v22, %v2031_v21  ;;  %v2040_v30 = vunpack.c.h.bf16 %v2214_v24  ;;  %v2067_v33 = vunpack.c.l.bf16 %v2221_v31  ;;  %v2068_v34 = vunpack.c.h.bf16 %v2221_v31  ;;  %v2202_v24 = vld [vmem:[%s2626_s17 + $0x70] sm:$0xff]   ;;  %v2217_v31 = vld [vmem:[%s2626_s17 + $0xe8] sm:$0xff]  }
  0x25   : > { %v2378_v35 = vpack.i.bf16 %v2044_v28, %v2043_v26  ;;  %v2063_v37 = vunpack.c.l.bf16 %v2220_v32  ;;  %v2064_v38 = vunpack.c.h.bf16 %v2220_v32  ;;  %v2075_v42 = vunpack.c.l.bf16 %v2223_v39  ;;  %v2216_v32 = vld [vmem:[%s2626_s17 + $0xe0] sm:$0xff]  }
  0x26   : > { %v2373_v36 = vpack.i.bf16 %v2040_v30, %v2039_v29  ;;  %v2076_v44 = vunpack.c.h.bf16 %v2223_v39  ;;  %v2071_v45 = vunpack.c.l.bf16 %v2222_v40  ;;  %v2072_v46 = vunpack.c.h.bf16 %v2222_v40  ;;  %v2219_v39 = vld [vmem:[%s2626_s17 + $0xf8] sm:$0xff]   ;;  %v2218_v40 = vld [vmem:[%s2626_s17 + $0xf0] sm:$0xff]  }
  0x27   : > { %2309 = vperm.xlu1 %2272, %v2308_v41   ;;  %2304 = vperm.xlu0 %2261, %v2303_v43   ;;  %v2388_v41 = vpack.i.bf16 %v2068_v34, %v2067_v33  ;;  %v2383_v43 = vpack.i.bf16 %v2064_v38, %v2063_v37  ;;  %v2083_v49 = vunpack.c.l.bf16 %v2225_v47  ;;  %v2084_v50 = vunpack.c.h.bf16 %v2225_v47  ;;  %v2233_v47 = vld [vmem:[%s2626_s17 + $0x168] sm:$0xff]  }
  0x28   : > { %v2079_v53 = vunpack.c.l.bf16 %v2224_v48  ;;  %v2080_v54 = vunpack.c.h.bf16 %v2224_v48  ;;  %v2091_v58 = vunpack.c.l.bf16 %v2227_v55  ;;  %v2092_v60 = vunpack.c.h.bf16 %v2227_v55  ;;  %v2232_v48 = vld [vmem:[%s2626_s17 + $0x160] sm:$0xff]   ;;  %v2235_v55 = vld [vmem:[%s2626_s17 + $0x178] sm:$0xff]  }
  0x29   : > { %v2087_v61 = vunpack.c.l.bf16 %v2226_v56  ;;  %v2088_v62 = vunpack.c.h.bf16 %v2226_v56  ;;  %v2099_v1 = vunpack.c.l.bf16 %v2229_v63  ;;  %v2100_v2 = vunpack.c.h.bf16 %v2229_v63  ;;  %v2234_v56 = vld [vmem:[%s2626_s17 + $0x170] sm:$0xff]   ;;  %v2237_v63 = vld [vmem:[%s2626_s17 + $0x188] sm:$0xff]  }
  0x2a   : > { %v2095_v5 = vunpack.c.l.bf16 %v2228_v0  ;;  %v2096_v6 = vunpack.c.h.bf16 %v2228_v0  ;;  %v2107_v10 = vunpack.c.l.bf16 %v2231_v7  ;;  %v2108_v12 = vunpack.c.h.bf16 %v2231_v7  ;;  %v2236_v0 = vld [vmem:[%s2626_s17 + $0x180] sm:$0xff]   ;;  %v2239_v7 = vld [vmem:[%s2626_s17 + $0x198] sm:$0xff]  }
  0x2b   : > { %2319 = vperm.xlu1 %2272, %v2318_v51   ;;  %2314 = vperm.xlu0 %2261, %v2313_v52   ;;  %v2398_v51 = vpack.i.bf16 %v2076_v44, %v2075_v42  ;;  %v2393_v52 = vpack.i.bf16 %v2072_v46, %v2071_v45  ;;  %v2103_v13 = vunpack.c.l.bf16 %v2230_v8  ;;  %v2104_v14 = vunpack.c.h.bf16 %v2230_v8  ;;  %v2238_v8 = vld [vmem:[%s2626_s17 + $0x190] sm:$0xff]  }
  0x2c   : > { %v1987_v17 = vunpack.c.l.bf16 %v2201_v15  ;;  %v1988_v18 = vunpack.c.h.bf16 %v2201_v15  ;;  %v1983_v21 = vunpack.c.l.bf16 %v2200_v16  ;;  %v1984_v22 = vunpack.c.h.bf16 %v2200_v16  ;;  %v2241_v15 = vld [vmem:[%s2626_s17 + $0x1a8] sm:$0xff]   ;;  %v2240_v16 = vld [vmem:[%s2626_s17 + $0x1a0] sm:$0xff]  }
  0x2d   : > { %v1995_v26 = vunpack.c.l.bf16 %v2203_v23  ;;  %v1996_v28 = vunpack.c.h.bf16 %v2203_v23  ;;  %v1991_v29 = vunpack.c.l.bf16 %v2202_v24  ;;  %v1992_v30 = vunpack.c.h.bf16 %v2202_v24  ;;  %v2243_v23 = vld [vmem:[%s2626_s17 + $0x1b8] sm:$0xff]   ;;  %v2242_v24 = vld [vmem:[%s2626_s17 + $0x1b0] sm:$0xff]  }
  0x2e   : > { %v2051_v33 = vunpack.c.l.bf16 %v2217_v31  ;;  %v2052_v34 = vunpack.c.h.bf16 %v2217_v31  ;;  %v2047_v37 = vunpack.c.l.bf16 %v2216_v32  ;;  %v2048_v38 = vunpack.c.h.bf16 %v2216_v32  ;;  %v2245_v31 = vld [vmem:[%s2626_s17 + $0x1c8] sm:$0xff]   ;;  %v2244_v32 = vld [vmem:[%s2626_s17 + $0x1c0] sm:$0xff]  }
  0x2f   : > { %2329 = vperm.xlu1 %2272, %v2328_v57   ;;  %2324 = vperm.xlu0 %2261, %v2323_v59   ;;  %v2408_v57 = vpack.i.bf16 %v2084_v50, %v2083_v49  ;;  %v2403_v59 = vpack.i.bf16 %v2080_v54, %v2079_v53  ;;  %v2059_v42 = vunpack.c.l.bf16 %v2219_v39  ;;  %v2060_v44 = vunpack.c.h.bf16 %v2219_v39  ;;  %v2247_v39 = vld [vmem:[%s2626_s17 + $0x1d8] sm:$0xff]  }
  0x30   : > { %v2055_v45 = vunpack.c.l.bf16 %v2218_v40  ;;  %v2056_v46 = vunpack.c.h.bf16 %v2218_v40  ;;  %v2115_v49 = vunpack.c.l.bf16 %v2233_v47  ;;  %v2116_v50 = vunpack.c.h.bf16 %v2233_v47  ;;  %v2246_v40 = vld [vmem:[%s2626_s17 + $0x1d0] sm:$0xff]   ;;  %v2249_v47 = vld [vmem:[%s2626_s17 + $0x1e8] sm:$0xff]  }
  0x31   : > { %v2111_v53 = vunpack.c.l.bf16 %v2232_v48  ;;  %v2112_v54 = vunpack.c.h.bf16 %v2232_v48  ;;  %v2248_v48 = vld [vmem:[%s2626_s17 + $0x1e0] sm:$0xff]  }
  0x33   : > { %2339 = vperm.xlu1 %2272, %v2338_v3   ;;  %2334 = vperm.xlu0 %2261, %v2333_v4   ;;  %v2418_v3 = vpack.i.bf16 %v2092_v60, %v2091_v58  ;;  %v2413_v4 = vpack.i.bf16 %v2088_v62, %v2087_v61  ;;  %v2123_v58 = vunpack.c.l.bf16 %v2235_v55  ;;  %v2124_v60 = vunpack.c.h.bf16 %v2235_v55  ;;  %v2251_v55 = vld [vmem:[%s2626_s17 + $0x1f8] sm:$0xff]  }
  0x34   : > { %v2119_v61 = vunpack.c.l.bf16 %v2234_v56  ;;  %v2120_v62 = vunpack.c.h.bf16 %v2234_v56  ;;  %v2250_v56 = vld [vmem:[%s2626_s17 + $0x1f0] sm:$0xff]  }
  0x37   : > { %2349 = vperm.xlu1 %2272, %v2348_v9   ;;  %2344 = vperm.xlu0 %2261, %v2343_v11   ;;  %v2428_v9 = vpack.i.bf16 %v2100_v2, %v2099_v1  ;;  %v2423_v11 = vpack.i.bf16 %v2096_v6, %v2095_v5  ;;  %v2131_v1 = vunpack.c.l.bf16 %v2237_v63  ;;  %v2132_v2 = vunpack.c.h.bf16 %v2237_v63 }
  0x38   : > { %v2127_v5 = vunpack.c.l.bf16 %v2236_v0  ;;  %v2128_v6 = vunpack.c.h.bf16 %v2236_v0 }
  0x3b   : > { %2359 = vperm.xlu1 %2272, %v2358_v19   ;;  %2354 = vperm.xlu0 %2261, %v2353_v20   ;;  %v2438_v19 = vpack.i.bf16 %v2108_v12, %v2107_v10  ;;  %v2433_v20 = vpack.i.bf16 %v2104_v14, %v2103_v13  ;;  %v2139_v10 = vunpack.c.l.bf16 %v2239_v7  ;;  %v2140_v12 = vunpack.c.h.bf16 %v2239_v7 }
  0x3c   : > { %v2135_v13 = vunpack.c.l.bf16 %v2238_v8  ;;  %v2136_v14 = vunpack.c.h.bf16 %v2238_v8 }
  0x3f   : > { %2369 = vperm.xlu1 %2272, %v2368_v25   ;;  %2364 = vperm.xlu0 %2261, %v2363_v27   ;;  %v2448_v25 = vpack.i.bf16 %v1988_v18, %v1987_v17  ;;  %v2443_v27 = vpack.i.bf16 %v1984_v22, %v1983_v21  ;;  %v2147_v17 = vunpack.c.l.bf16 %v2241_v15  ;;  %v2148_v18 = vunpack.c.h.bf16 %v2241_v15 }
  0x40   : > { %v2143_v21 = vunpack.c.l.bf16 %v2240_v16  ;;  %v2144_v22 = vunpack.c.h.bf16 %v2240_v16 }
  0x43   : > { %2379 = vperm.xlu1 %2272, %v2378_v35   ;;  %2374 = vperm.xlu0 %2261, %v2373_v36   ;;  %v2458_v35 = vpack.i.bf16 %v1996_v28, %v1995_v26  ;;  %v2453_v36 = vpack.i.bf16 %v1992_v30, %v1991_v29  ;;  %v2155_v26 = vunpack.c.l.bf16 %v2243_v23  ;;  %v2156_v28 = vunpack.c.h.bf16 %v2243_v23 }
  0x44   : > { %v2151_v29 = vunpack.c.l.bf16 %v2242_v24  ;;  %v2152_v30 = vunpack.c.h.bf16 %v2242_v24 }
  0x47   : > { %2389 = vperm.xlu1 %2272, %v2388_v41   ;;  %2384 = vperm.xlu0 %2261, %v2383_v43   ;;  %v2468_v41 = vpack.i.bf16 %v2052_v34, %v2051_v33  ;;  %v2463_v43 = vpack.i.bf16 %v2048_v38, %v2047_v37  ;;  %v2163_v33 = vunpack.c.l.bf16 %v2245_v31  ;;  %v2164_v34 = vunpack.c.h.bf16 %v2245_v31 }
  0x48   : > { %v2159_v37 = vunpack.c.l.bf16 %v2244_v32  ;;  %v2160_v38 = vunpack.c.h.bf16 %v2244_v32 }
  0x4b   : > { %2399 = vperm.xlu1 %2272, %v2398_v51   ;;  %2394 = vperm.xlu0 %2261, %v2393_v52   ;;  %v2478_v51 = vpack.i.bf16 %v2060_v44, %v2059_v42  ;;  %v2473_v52 = vpack.i.bf16 %v2056_v46, %v2055_v45  ;;  %v2171_v42 = vunpack.c.l.bf16 %v2247_v39  ;;  %v2172_v44 = vunpack.c.h.bf16 %v2247_v39 }
  0x4c   : > { %v2167_v45 = vunpack.c.l.bf16 %v2246_v40  ;;  %v2168_v46 = vunpack.c.h.bf16 %v2246_v40 }
  0x4f   : > { %2409 = vperm.xlu1 %2272, %v2408_v57   ;;  %2404 = vperm.xlu0 %2261, %v2403_v59   ;;  %v2488_v57 = vpack.i.bf16 %v2116_v50, %v2115_v49  ;;  %v2483_v59 = vpack.i.bf16 %v2112_v54, %v2111_v53  ;;  %v2179_v49 = vunpack.c.l.bf16 %v2249_v47  ;;  %v2180_v50 = vunpack.c.h.bf16 %v2249_v47 }
  0x50   : > { %v2175_v53 = vunpack.c.l.bf16 %v2248_v48  ;;  %v2176_v54 = vunpack.c.h.bf16 %v2248_v48 }
  0x53   : > { %2419 = vperm.xlu1 %2272, %v2418_v3   ;;  %2414 = vperm.xlu0 %2261, %v2413_v4   ;;  %v2498_v3 = vpack.i.bf16 %v2124_v60, %v2123_v58  ;;  %v2493_v4 = vpack.i.bf16 %v2120_v62, %v2119_v61  ;;  %v2187_v58 = vunpack.c.l.bf16 %v2251_v55  ;;  %v2188_v60 = vunpack.c.h.bf16 %v2251_v55 }
  0x54   : > { %v2183_v61 = vunpack.c.l.bf16 %v2250_v56  ;;  %v2184_v62 = vunpack.c.h.bf16 %v2250_v56 }
  0x55   : > { %v2578_v63 = vpack.i.bf16 %v2188_v60, %v2187_v58 }
  0x56   : > { %v2573_v0 = vpack.i.bf16 %v2184_v62, %v2183_v61 }
  0x57   : > { %2429 = vperm.xlu1 %2272, %v2428_v9   ;;  %2424 = vperm.xlu0 %2261, %v2423_v11   ;;  %v2508_v9 = vpack.i.bf16 %v2132_v2, %v2131_v1  ;;  %v2503_v11 = vpack.i.bf16 %v2128_v6, %v2127_v5 }
  0x5b   : > { %2439 = vperm.xlu1 %2272, %v2438_v19   ;;  %2434 = vperm.xlu0 %2261, %v2433_v20   ;;  %v2518_v19 = vpack.i.bf16 %v2140_v12, %v2139_v10  ;;  %v2513_v20 = vpack.i.bf16 %v2136_v14, %v2135_v13  ;;  %v2700_v14 = vld [vmem:[%s3599_s1 + $0x1] ss:$0 sm:$0xff] }
  0x5c   : > { %3633 = vst [vmem:[#allocation3_spill] sm:$0xff] %v2700_v14 }
  0x5f   : > { %2449 = vperm.xlu1 %2272, %v2448_v25   ;;  %2444 = vperm.xlu0 %2261, %v2443_v27   ;;  %v2528_v25 = vpack.i.bf16 %v2148_v18, %v2147_v17  ;;  %v2523_v27 = vpack.i.bf16 %v2144_v22, %v2143_v21 }
  0x63   : > { %2459 = vperm.xlu1 %2272, %v2458_v35   ;;  %2454 = vperm.xlu0 %2261, %v2453_v36   ;;  %v2538_v35 = vpack.i.bf16 %v2156_v28, %v2155_v26  ;;  %v2533_v36 = vpack.i.bf16 %v2152_v30, %v2151_v29 }
  0x67   : > { %2469 = vperm.xlu1 %2272, %v2468_v41   ;;  %2464 = vperm.xlu0 %2261, %v2463_v43   ;;  %v2548_v41 = vpack.i.bf16 %v2164_v34, %v2163_v33  ;;  %v2543_v43 = vpack.i.bf16 %v2160_v38, %v2159_v37 }
  0x6b   : > { %2479 = vperm.xlu1 %2272, %v2478_v51   ;;  %2474 = vperm.xlu0 %2261, %v2473_v52   ;;  %v2558_v51 = vpack.i.bf16 %v2172_v44, %v2171_v42  ;;  %v2553_v52 = vpack.i.bf16 %v2168_v46, %v2167_v45 }
  0x6f   : > { %2489 = vperm.xlu1 %2272, %v2488_v57   ;;  %2484 = vperm.xlu0 %2261, %v2483_v59   ;;  %v2568_v57 = vpack.i.bf16 %v2180_v50, %v2179_v49  ;;  %v2563_v59 = vpack.i.bf16 %v2176_v54, %v2175_v53 }
  0x73   : > { %2499 = vperm.xlu1 %2272, %v2498_v3   ;;  %2494 = vperm.xlu0 %2261, %v2493_v4  }
  0x77   : > { %2509 = vperm.xlu1 %2272, %v2508_v9   ;;  %2504 = vperm.xlu0 %2261, %v2503_v11   ;;  %v2695_v9 = vld [vmem:[%s3599_s1] ss:$0 sm:$0xff] }
  0x78   : > { %3632 = vst [vmem:[#allocation2_spill] sm:$0xff] %v2695_v9 }
  0x7b   : > { %2519 = vperm.xlu1 %2272, %v2518_v19   ;;  %2514 = vperm.xlu0 %2261, %v2513_v20  }
  0x7f   : > { %2529 = vperm.xlu1 %2272, %v2528_v25   ;;  %2524 = vperm.xlu0 %2261, %v2523_v27  }
  0x83   : > { %2539 = vperm.xlu1 %2272, %v2538_v35   ;;  %2534 = vperm.xlu0 %2261, %v2533_v36  }
  0x87   : > { %2549 = vperm.xlu1 %2272, %v2548_v41   ;;  %2544 = vperm.xlu0 %2261, %v2543_v43  }
  0x8b   : > { %2559 = vperm.xlu1 %2272, %v2558_v51   ;;  %2554 = vperm.xlu0 %2261, %v2553_v52   ;;  %v2725_v51 = vld [vmem:[%s3599_s1 + $0x2] ss:$0 sm:$0xff] }
  0x8f   : > { %2569 = vperm.xlu1 %2272, %v2568_v57   ;;  %2564 = vperm.xlu0 %2261, %v2563_v59  }
  0x93   : > { %2579 = vperm.xlu1 %2272, %v2578_v63   ;;  %2574 = vperm.xlu0 %2261, %v2573_v0  }
  0x96   : > { %v2275_v1 = vpop.permute.xlu1 %2274  ;;  %v2264_v2 = vpop.permute.xlu0 %2263 }
  0x97   : > { %v2277_v5 = vunpack.i.h.bf16 %v2275_v1  ;;  %v2276_v6 = vunpack.i.l.bf16 %v2275_v1  ;;  %v2266_v7 = vunpack.i.h.bf16 %v2264_v2  ;;  %v2265_v8 = vunpack.i.l.bf16 %v2264_v2 }
  0x99   : > { %v500_v21 = vmul.f32 %v2277_v5, %v2695_v9  ;;  %v499_v22 = vmul.f32 %v2276_v6, %v2695_v9  ;;  %v496_v23 = vmul.f32 %v2266_v7, %v2695_v9  ;;  %v495_v24 = vmul.f32 %v2265_v8, %v2695_v9 }
  0x9a   : > { %v2280_v3 = vpop.permute.xlu1 %2279  ;;  %v2269_v4 = vpop.permute.xlu0 %2268 }
  0x9b   : > { %v2271_v10 = vunpack.i.h.bf16 %v2269_v4  ;;  %v2270_v11 = vunpack.i.l.bf16 %v2269_v4  ;;  %v2282_v12 = vunpack.i.h.bf16 %v2280_v3  ;;  %v2281_v13 = vunpack.i.l.bf16 %v2280_v3 }
  0x9d   : > { %v498_v25 = vmul.f32 %v2271_v10, %v2695_v9  ;;  %v497_v26 = vmul.f32 %v2270_v11, %v2695_v9  ;;  %v502_v29 = vmul.f32 %v2282_v12, %v2695_v9  ;;  %v501_v30 = vmul.f32 %v2281_v13, %v2695_v9 }
  0x9e   : > { %v2290_v15 = vpop.permute.xlu1 %2289  ;;  %v2285_v16 = vpop.permute.xlu0 %2284 }
  0x9f   : > { %v2292_v17 = vunpack.i.h.bf16 %v2290_v15  ;;  %v2291_v18 = vunpack.i.l.bf16 %v2290_v15  ;;  %v2287_v19 = vunpack.i.h.bf16 %v2285_v16  ;;  %v2286_v20 = vunpack.i.l.bf16 %v2285_v16 }
  0xa1   : > { %v550_v27 = vmul.f32 %v2292_v17, %v2700_v14  ;;  %v549_v28 = vmul.f32 %v2291_v18, %v2700_v14  ;;  %v548_v31 = vmul.f32 %v2287_v19, %v2700_v14  ;;  %v547_v32 = vmul.f32 %v2286_v20, %v2700_v14 }
  0xa2   : > { %v2300_v33 = vpop.permute.xlu1 %2299  ;;  %v2295_v34 = vpop.permute.xlu0 %2294  ;;  %v986_v43 = vmul.f32 %v2292_v17, %v2695_v9  ;;  %v985_v44 = vmul.f32 %v2291_v18, %v2695_v9  ;;  %v984_v47 = vmul.f32 %v2287_v19, %v2695_v9  ;;  %v983_v48 = vmul.f32 %v2286_v20, %v2695_v9 }
  0xa3   : > { %v557_v35 = vadd.f32 %v549_v28, %v497_v26  ;;  %v558_v36 = vadd.f32 %v550_v27, %v498_v25  ;;  %v2302_v37 = vunpack.i.h.bf16 %v2300_v33  ;;  %v2301_v38 = vunpack.i.l.bf16 %v2300_v33 }
  0xa4   : > { %v555_v39 = vadd.f32 %v547_v32, %v495_v24  ;;  %v556_v40 = vadd.f32 %v548_v31, %v496_v23  ;;  %v2297_v41 = vunpack.i.h.bf16 %v2295_v34  ;;  %v2296_v42 = vunpack.i.l.bf16 %v2295_v34 }
  0xa5   : > { %v554_v45 = vmul.f32 %v2302_v37, %v2700_v14  ;;  %v553_v46 = vmul.f32 %v2301_v38, %v2700_v14  ;;  %v989_v23 = vmul.f32 %v2301_v38, %v2695_v9 }
  0xa6   : > { %v552_v49 = vmul.f32 %v2297_v41, %v2700_v14  ;;  %v551_v50 = vmul.f32 %v2296_v42, %v2700_v14  ;;  %v2310_v52 = vpop.permute.xlu1 %2309  ;;  %v2305_v53 = vpop.permute.xlu0 %2304  ;;  %v988_v24 = vmul.f32 %v2297_v41, %v2695_v9  ;;  %v987_v25 = vmul.f32 %v2296_v42, %v2695_v9 }
  0xa7   : > { %v561_v54 = vadd.f32 %v553_v46, %v501_v30  ;;  %v562_v55 = vadd.f32 %v554_v45, %v502_v29  ;;  %v2312_v56 = vunpack.i.h.bf16 %v2310_v52  ;;  %v2311_v57 = vunpack.i.l.bf16 %v2310_v52 }
  0xa8   : > { %v560_v58 = vadd.f32 %v552_v49, %v500_v21  ;;  %v559_v59 = vadd.f32 %v551_v50, %v499_v22  ;;  %v2307_v60 = vunpack.i.h.bf16 %v2305_v53  ;;  %v2306_v61 = vunpack.i.l.bf16 %v2305_v53 }
  0xa9   : > { %v610_v62 = vmul.f32 %v2312_v56, %v2725_v51  ;;  %v994_v63 = vmul.f32 %v2312_v56, %v2700_v14  ;;  %v609_v0 = vmul.f32 %v2311_v57, %v2725_v51  ;;  %v993_v1 = vmul.f32 %v2311_v57, %v2700_v14 }
  0xaa   : > { %v608_v2 = vmul.f32 %v2307_v60, %v2725_v51  ;;  %v992_v3 = vmul.f32 %v2307_v60, %v2700_v14  ;;  %v607_v4 = vmul.f32 %v2306_v61, %v2725_v51  ;;  %v991_v5 = vmul.f32 %v2306_v61, %v2700_v14  ;;  %v2320_v6 = vpop.permute.xlu1 %2319  ;;  %v2315_v7 = vpop.permute.xlu0 %2314 }
  0xab   : > { %v617_v8 = vadd.f32 %v609_v0, %v557_v35  ;;  %v618_v10 = vadd.f32 %v610_v62, %v558_v36  ;;  %v2735_v11 = vadd.f32 %v993_v1, %v985_v44  ;;  %v2737_v12 = vadd.f32 %v994_v63, %v986_v43  ;;  %v2766_v44 = vld [vmem:[%s3599_s1 + $0x3] ss:$0 sm:$0xff] }
  0xac   : > { %v615_v13 = vadd.f32 %v607_v4, %v555_v39  ;;  %v616_v15 = vadd.f32 %v608_v2, %v556_v40  ;;  %v2739_v16 = vadd.f32 %v991_v5, %v983_v48  ;;  %v2741_v17 = vadd.f32 %v992_v3, %v984_v47 }
  0xad   : > { %v2322_v18 = vunpack.i.h.bf16 %v2320_v6  ;;  %v2321_v19 = vunpack.i.l.bf16 %v2320_v6  ;;  %v2317_v20 = vunpack.i.h.bf16 %v2315_v7  ;;  %v2316_v21 = vunpack.i.l.bf16 %v2315_v7 }
  0xae   : > { %3634 = vst [vmem:[#allocation4_spill] sm:$0xff] %v2739_v16  ;;  %3635 = vst [vmem:[#allocation5_spill] sm:$0xff] %v2741_v17  ;;  %v990_v22 = vmul.f32 %v2302_v37, %v2695_v9  ;;  %v2330_v26 = vpop.permute.xlu1 %2329  ;;  %v2325_v27 = vpop.permute.xlu0 %2324 }
  0xaf   : > { %v614_v28 = vmul.f32 %v2322_v18, %v2725_v51  ;;  %v998_v29 = vmul.f32 %v2322_v18, %v2700_v14  ;;  %v613_v30 = vmul.f32 %v2321_v19, %v2725_v51  ;;  %v997_v31 = vmul.f32 %v2321_v19, %v2700_v14 }
  0xb0   : > { %v612_v32 = vmul.f32 %v2317_v20, %v2725_v51  ;;  %v996_v33 = vmul.f32 %v2317_v20, %v2700_v14  ;;  %v611_v34 = vmul.f32 %v2316_v21, %v2725_v51  ;;  %v995_v35 = vmul.f32 %v2316_v21, %v2700_v14  ;;  %v2799_v21 = vld [vmem:[%s3599_s1 + $0x4] ss:$0 sm:$0xff] }
  0xb1   : > { %v621_v36 = vadd.f32 %v613_v30, %v561_v54  ;;  %v622_v37 = vadd.f32 %v614_v28, %v562_v55  ;;  %v2755_v38 = vadd.f32 %v997_v31, %v989_v23  ;;  %v2757_v39 = vadd.f32 %v998_v29, %v990_v22 }
  0xb2   : > { %v619_v40 = vadd.f32 %v611_v34, %v559_v59  ;;  %v620_v41 = vadd.f32 %v612_v32, %v560_v58  ;;  %v2759_v42 = vadd.f32 %v995_v35, %v987_v25  ;;  %v2761_v43 = vadd.f32 %v996_v33, %v988_v24  ;;  %v2340_v45 = vpop.permute.xlu1 %2339  ;;  %v2335_v46 = vpop.permute.xlu0 %2334 }
  0xb3   : > { %3636 = vst [vmem:[#allocation6_spill] sm:$0xff] %v2755_v38  ;;  %3637 = vst [vmem:[#allocation7_spill] sm:$0xff] %v2757_v39  ;;  %v2332_v47 = vunpack.i.h.bf16 %v2330_v26  ;;  %v2331_v48 = vunpack.i.l.bf16 %v2330_v26  ;;  %v2327_v49 = vunpack.i.h.bf16 %v2325_v27  ;;  %v2326_v50 = vunpack.i.l.bf16 %v2325_v27 }
  0xb4   : > { %3638 = vst [vmem:[#allocation8_spill] sm:$0xff] %v2759_v42  ;;  %3639 = vst [vmem:[#allocation9_spill] sm:$0xff] %v2761_v43  ;;  %v2342_v52 = vunpack.i.h.bf16 %v2340_v45  ;;  %v2341_v53 = vunpack.i.l.bf16 %v2340_v45  ;;  %v2337_v54 = vunpack.i.h.bf16 %v2335_v46  ;;  %v2336_v58 = vunpack.i.l.bf16 %v2335_v46 }
  0xb5   : > { %v670_v55 = vmul.f32 %v2332_v47, %v2766_v44  ;;  %v2770_v56 = vmul.f32 %v2332_v47, %v2695_v9  ;;  %v669_v57 = vmul.f32 %v2331_v48, %v2766_v44  ;;  %v2774_v59 = vmul.f32 %v2331_v48, %v2695_v9 }
  0xb6   : > { %v668_v60 = vmul.f32 %v2327_v49, %v2766_v44  ;;  %v2778_v61 = vmul.f32 %v2327_v49, %v2695_v9  ;;  %v667_v62 = vmul.f32 %v2326_v50, %v2766_v44  ;;  %v2350_v63 = vpop.permute.xlu1 %2349  ;;  %v2345_v0 = vpop.permute.xlu0 %2344  ;;  %v2782_v3 = vmul.f32 %v2326_v50, %v2695_v9 }
  0xb7   : > { %v677_v1 = vadd.f32 %v669_v57, %v617_v8  ;;  %v678_v2 = vadd.f32 %v670_v55, %v618_v10  ;;  %v674_v4 = vmul.f32 %v2342_v52, %v2766_v44  ;;  %v2786_v7 = vmul.f32 %v2342_v52, %v2695_v9 }
  0xb8   : > { %v675_v5 = vadd.f32 %v667_v62, %v615_v13  ;;  %v676_v6 = vadd.f32 %v668_v60, %v616_v15  ;;  %v673_v18 = vmul.f32 %v2341_v53, %v2766_v44  ;;  %v2792_v20 = vmul.f32 %v2341_v53, %v2695_v9 }
  0xb9   : > { %v2789_v19 = vadd.f32 %v674_v4, %v622_v37  ;;  %v672_v8 = vmul.f32 %v2337_v54, %v2766_v44  ;;  %v671_v10 = vmul.f32 %v2336_v58, %v2766_v44  ;;  %v2804_v15 = vmul.f32 %v2337_v54, %v2695_v9  ;;  %v2854_v54 = vld [vmem:[%s3599_s1 + $0x5] ss:$0 sm:$0xff] }
  0xba   : > { %v2801_v13 = vadd.f32 %v673_v18, %v621_v36  ;;  %v2806_v22 = vunpack.i.h.bf16 %v2350_v63  ;;  %v2808_v23 = vunpack.i.l.bf16 %v2350_v63  ;;  %v2360_v24 = vpop.permute.xlu1 %2359  ;;  %v2355_v25 = vpop.permute.xlu0 %2354  ;;  %v2814_v28 = vunpack.i.h.bf16 %v2345_v0 }
  0xbb   : > { %v2810_v26 = vadd.f32 %v671_v10, %v619_v40  ;;  %v2812_v27 = vadd.f32 %v672_v8, %v620_v41  ;;  %v2816_v29 = vunpack.i.l.bf16 %v2345_v0  ;;  %v2819_v30 = vmul.f32 %v2336_v58, %v2695_v9 }
  0xbc   : > { %v730_v31 = vmul.f32 %v2806_v22, %v2799_v21  ;;  %v1258_v32 = vmul.f32 %v2806_v22, %v2700_v14  ;;  %v729_v33 = vmul.f32 %v2808_v23, %v2799_v21  ;;  %v1257_v34 = vmul.f32 %v2808_v23, %v2700_v14 }
  0xbd   : > { %v728_v35 = vmul.f32 %v2814_v28, %v2799_v21  ;;  %v1256_v36 = vmul.f32 %v2814_v28, %v2700_v14  ;;  %v727_v37 = vmul.f32 %v2816_v29, %v2799_v21  ;;  %v2835_v40 = vunpack.i.h.bf16 %v2360_v24 }
  0xbe   : > { %v2837_v41 = vunpack.i.l.bf16 %v2360_v24  ;;  %v2839_v45 = vunpack.i.h.bf16 %v2355_v25  ;;  %v2841_v46 = vunpack.i.l.bf16 %v2355_v25  ;;  %v2370_v47 = vpop.permute.xlu1 %2369  ;;  %v2365_v48 = vpop.permute.xlu0 %2364  ;;  %v1255_v49 = vmul.f32 %v2816_v29, %v2700_v14 }
  0xbf   : > { %3640 = vst [vmem:[#allocation10_spill] sm:$0xff] %v2835_v40  ;;  %v2845_v50 = vunpack.i.h.bf16 %v2370_v47  ;;  %v2847_v52 = vunpack.i.l.bf16 %v2370_v47  ;;  %v2849_v53 = vunpack.i.h.bf16 %v2365_v48  ;;  %v2858_v55 = vmul.f32 %v2835_v40, %v2799_v21 }
  0xc0   : > { %3641 = vst [vmem:[#allocation11_spill] sm:$0xff] %v2837_v41  ;;  %3642 = vst [vmem:[#allocation12_spill] sm:$0xff] %v2839_v45  ;;  %v2862_v57 = vmul.f32 %v2835_v40, %v2700_v14  ;;  %v733_v58 = vmul.f32 %v2837_v41, %v2799_v21  ;;  %v2866_v60 = vunpack.i.l.bf16 %v2365_v48  ;;  %v2870_v62 = vmul.f32 %v2837_v41, %v2700_v14 }
  0xc1   : > { %3643 = vst [vmem:[#allocation13_spill] sm:$0xff] %v2841_v46  ;;  %3644 = vst [vmem:[#allocation14_spill] sm:$0xff] %v2845_v50  ;;  %v2874_v63 = vmul.f32 %v2839_v45, %v2799_v21  ;;  %v2878_v0 = vmul.f32 %v2839_v45, %v2700_v14  ;;  %v2882_v4 = vmul.f32 %v2841_v46, %v2799_v21 }
  0xc2   : > { %3645 = vst [vmem:[#allocation15_spill] sm:$0xff] %v2847_v52  ;;  %v2380_v18 = vpop.permute.xlu1 %2379  ;;  %v2375_v8 = vpop.permute.xlu0 %2374  ;;  %v737_v10 = vadd.f32 %v729_v33, %v677_v1  ;;  %v738_v24 = vadd.f32 %v730_v31, %v678_v2  ;;  %v789_v25 = vmul.f32 %v2847_v52, %v2854_v54  ;;  %v790_v47 = vmul.f32 %v2845_v50, %v2854_v54 }
  0xc3   : > { %v2890_v48 = vmul.f32 %v2841_v46, %v2700_v14  ;;  %v2892_v9 = vunpack.i.h.bf16 %v2380_v18  ;;  %v2894_v45 = vunpack.i.l.bf16 %v2380_v18  ;;  %v2896_v43 = vunpack.i.h.bf16 %v2375_v8  ;;  %v2907_v18 = vld [vmem:[%s3599_s1 + $0x6] ss:$0 sm:$0xff] }
  0xc4   : > { %v797_v42 = vadd.f32 %v789_v25, %v737_v10  ;;  %v798_v39 = vadd.f32 %v790_v47, %v738_v24  ;;  %v1265_v1 = vadd.f32 %v1257_v34, %v2774_v59  ;;  %v1266_v2 = vadd.f32 %v1258_v32, %v2770_v56 }
  0xc5   : > { %v1273_v31 = vmul.f32 %v2847_v52, %v2725_v51  ;;  %v1274_v33 = vmul.f32 %v2845_v50, %v2725_v51  ;;  %v735_v14 = vadd.f32 %v727_v37, %v675_v5  ;;  %v736_v38 = vadd.f32 %v728_v35, %v676_v6 }
  0xc6   : > { %v2390_v46 = vpop.permute.xlu1 %2389  ;;  %v2385_v10 = vpop.permute.xlu0 %2384  ;;  %v787_v59 = vmul.f32 %v2866_v60, %v2854_v54  ;;  %v788_v56 = vmul.f32 %v2849_v53, %v2854_v54  ;;  %v1263_v32 = vadd.f32 %v1255_v49, %v2782_v3  ;;  %v1264_v34 = vadd.f32 %v1256_v36, %v2778_v61 }
  0xc7   : > { %v2392_v24 = vunpack.i.h.bf16 %v2390_v46  ;;  %v2391_v5 = vunpack.i.l.bf16 %v2390_v46  ;;  %v1281_v6 = vadd.f32 %v1273_v31, %v1265_v1  ;;  %v1282_v35 = vadd.f32 %v1274_v33, %v1266_v2 }
  0xc8   : > { %v2387_v37 = vunpack.i.h.bf16 %v2385_v10  ;;  %v2386_v25 = vunpack.i.l.bf16 %v2385_v10  ;;  %v795_v47 = vadd.f32 %v787_v59, %v735_v14  ;;  %v796_v50 = vadd.f32 %v788_v56, %v736_v38 }
  0xc9   : > { %v850_v52 = vmul.f32 %v2392_v24, %v2907_v18  ;;  %v1290_v40 = vmul.f32 %v2392_v24, %v2766_v44  ;;  %v849_v17 = vmul.f32 %v2391_v5, %v2907_v18  ;;  %v1289_v16 = vmul.f32 %v2391_v5, %v2766_v44 }
  0xca   : > { %v2919_v41 = vunpack.i.l.bf16 %v2375_v8  ;;  %v848_v61 = vmul.f32 %v2387_v37, %v2907_v18  ;;  %v847_v3 = vmul.f32 %v2386_v25, %v2907_v18  ;;  %v1271_v36 = vmul.f32 %v2866_v60, %v2725_v51  ;;  %v2400_v46 = vpop.permute.xlu1 %2399  ;;  %v2395_v14 = vpop.permute.xlu0 %2394 }
  0xcb   : > { %v2925_v38 = vadd.f32 %v849_v17, %v797_v42  ;;  %v2927_v49 = vadd.f32 %v850_v52, %v798_v39  ;;  %v2929_v1 = vadd.f32 %v1289_v16, %v1281_v6  ;;  %v1288_v2 = vmul.f32 %v2387_v37, %v2766_v44 }
  0xcc   : > { %v2932_v31 = vadd.f32 %v1290_v40, %v1282_v35  ;;  %v2934_v8 = vadd.f32 %v847_v3, %v795_v47  ;;  %v1272_v33 = vmul.f32 %v2849_v53, %v2725_v51  ;;  %v1279_v10 = vadd.f32 %v1271_v36, %v1263_v32 }
  0xcd   : > { %3646 = vst [vmem:[#allocation16_spill] sm:$0xff] %v2929_v1  ;;  %v1287_v59 = vmul.f32 %v2386_v25, %v2766_v44  ;;  %v2402_v56 = vunpack.i.h.bf16 %v2400_v46  ;;  %v2401_v24 = vunpack.i.l.bf16 %v2400_v46  ;;  %v741_v17 = vadd.f32 %v733_v58, %v2801_v13 }
  0xce   : > { %3647 = vst [vmem:[#allocation17_spill] sm:$0xff] %v2932_v31  ;;  %3648 = vst [vmem:[#allocation18_spill] sm:$0xff] %v2934_v8  ;;  %v1280_v39 = vadd.f32 %v1272_v33, %v1264_v34  ;;  %v742_v16 = vadd.f32 %v2858_v55, %v2789_v19  ;;  %v793_v42 = vmul.f32 %v2894_v45, %v2854_v54  ;;  %v2410_v52 = vpop.permute.xlu1 %2409  ;;  %v2405_v5 = vpop.permute.xlu0 %2404  ;;  %v2397_v36 = vunpack.i.h.bf16 %v2395_v14 }
  0xcf   : > { %v794_v40 = vmul.f32 %v2892_v9, %v2854_v54  ;;  %v2946_v6 = vadd.f32 %v848_v61, %v796_v50  ;;  %v2948_v32 = vadd.f32 %v1287_v59, %v1279_v10  ;;  %v854_v35 = vmul.f32 %v2402_v56, %v2907_v18 }
  0xd0   : > { %v853_v13 = vmul.f32 %v2401_v24, %v2907_v18  ;;  %v1294_v58 = vmul.f32 %v2402_v56, %v2766_v44  ;;  %v801_v34 = vadd.f32 %v793_v42, %v741_v17  ;;  %v1269_v55 = vadd.f32 %v2870_v62, %v2792_v20  ;;  %v2990_v42 = vld [vmem:[%s3599_s1 + $0x7] ss:$0 sm:$0xff] }
  0xd1   : > { %3649 = vst [vmem:[#allocation19_spill] sm:$0xff] %v2946_v6  ;;  %3650 = vst [vmem:[#allocation20_spill] sm:$0xff] %v2948_v32  ;;  %v802_v19 = vadd.f32 %v794_v40, %v742_v16  ;;  %v1270_v37 = vadd.f32 %v2862_v57, %v2786_v7  ;;  %v1277_v50 = vmul.f32 %v2894_v45, %v2725_v51  ;;  %v2396_v46 = vunpack.i.l.bf16 %v2395_v14 }
  0xd2   : > { %v1278_v25 = vmul.f32 %v2892_v9, %v2725_v51  ;;  %v1293_v47 = vmul.f32 %v2401_v24, %v2766_v44  ;;  %v2962_v61 = vadd.f32 %v1288_v2, %v1280_v39  ;;  %v2964_v3 = vadd.f32 %v853_v13, %v801_v34  ;;  %v2420_v33 = vpop.permute.xlu1 %2419  ;;  %v2415_v10 = vpop.permute.xlu0 %2414 }
  0xd3   : > { %v1285_v20 = vadd.f32 %v1277_v50, %v1269_v55  ;;  %v739_v7 = vadd.f32 %v2882_v4, %v2810_v26  ;;  %v740_v57 = vadd.f32 %v2874_v63, %v2812_v27  ;;  %v2970_v59 = vadd.f32 %v854_v35, %v802_v19 }
  0xd4   : > { %3651 = vst [vmem:[#allocation21_spill] sm:$0xff] %v2962_v61  ;;  %3652 = vst [vmem:[#allocation22_spill] sm:$0xff] %v2964_v3  ;;  %v1286_v62 = vadd.f32 %v1278_v25, %v1270_v37  ;;  %v852_v56 = vmul.f32 %v2397_v36, %v2907_v18  ;;  %v791_v2 = vmul.f32 %v2919_v41, %v2854_v54  ;;  %v2997_v34 = vunpack.i.l.bf16 %v2410_v52 }
  0xd5   : > { %3653 = vst [vmem:[#allocation23_spill] sm:$0xff] %v2970_v59  ;;  %v792_v14 = vmul.f32 %v2896_v43, %v2854_v54  ;;  %v2977_v24 = vadd.f32 %v1293_v47, %v1285_v20  ;;  %v1292_v17 = vmul.f32 %v2397_v36, %v2766_v44  ;;  %v851_v39 = vmul.f32 %v2396_v46, %v2907_v18  ;;  %v3690_v59 = vld [vmem:[#allocation5_spill] sm:$0xff] }
  0xd6   : > { %v1267_v26 = vadd.f32 %v2890_v48, %v2819_v30  ;;  %v799_v27 = vadd.f32 %v791_v2, %v739_v7  ;;  %v1268_v4 = vadd.f32 %v2878_v0, %v2804_v15  ;;  %v1275_v16 = vmul.f32 %v2919_v41, %v2725_v51  ;;  %v2430_v40 = vpop.permute.xlu1 %2429  ;;  %v2425_v35 = vpop.permute.xlu0 %2424 }
  0xd7   : > { %3654 = vst [vmem:[#allocation24_spill] sm:$0xff] %v2977_v24  ;;  %v800_v63 = vadd.f32 %v792_v14, %v740_v57  ;;  %v1276_v13 = vmul.f32 %v2896_v43, %v2725_v51  ;;  %v1291_v30 = vmul.f32 %v2396_v46, %v2766_v44  ;;  %v2995_v48 = vunpack.i.h.bf16 %v2410_v52 }
  0xd8   : > { %v2999_v15 = vadd.f32 %v1294_v58, %v1286_v62  ;;  %v3001_v0 = vadd.f32 %v851_v39, %v799_v27  ;;  %v1283_v19 = vadd.f32 %v1275_v16, %v1267_v26  ;;  %v3003_v55 = vunpack.i.h.bf16 %v2405_v5  ;;  %v3048_v27 = vld [vmem:[%s3599_s1 + $0x8] ss:$0 sm:$0xff] }
  0xd9   : > { %v3005_v37 = vadd.f32 %v852_v56, %v800_v63  ;;  %v1284_v50 = vadd.f32 %v1276_v13, %v1268_v4  ;;  %v3009_v25 = vmul.f32 %v2995_v48, %v2990_v42  ;;  %v3013_v47 = vmul.f32 %v2995_v48, %v2799_v21 }
  0xda   : > { %3655 = vst [vmem:[#allocation25_spill] sm:$0xff] %v2999_v15  ;;  %3656 = vst [vmem:[#allocation26_spill] sm:$0xff] %v3001_v0  ;;  %v3015_v52 = vadd.f32 %v1291_v30, %v1283_v19  ;;  %v3019_v58 = vmul.f32 %v2997_v34, %v2990_v42  ;;  %v3023_v36 = vmul.f32 %v2997_v34, %v2799_v21  ;;  %v2440_v20 = vpop.permute.xlu1 %2439  ;;  %v2435_v62 = vpop.permute.xlu0 %2434  ;;  %v3033_v57 = vunpack.i.l.bf16 %v2405_v5 }
  0xdb   : > { %3657 = vst [vmem:[#allocation27_spill] sm:$0xff] %v3005_v37  ;;  %3658 = vst [vmem:[#allocation28_spill] sm:$0xff] %v3013_v47  ;;  %v3027_v46 = vmul.f32 %v3003_v55, %v2990_v42  ;;  %v3031_v7 = vmul.f32 %v3003_v55, %v2799_v21  ;;  %v3035_v56 = vunpack.i.h.bf16 %v2420_v33  ;;  %v3037_v2 = vunpack.i.l.bf16 %v2420_v33 }
  0xdc   : > { %3659 = vst [vmem:[#allocation29_spill] sm:$0xff] %v3015_v52  ;;  %3660 = vst [vmem:[#allocation30_spill] sm:$0xff] %v3023_v36  ;;  %v3039_v14 = vadd.f32 %v1292_v17, %v1284_v50  ;;  %v3041_v39 = vunpack.i.h.bf16 %v2415_v10  ;;  %v3043_v26 = vunpack.i.l.bf16 %v2415_v10  ;;  %v3050_v63 = vunpack.i.h.bf16 %v2430_v40 }
  0xdd   : > { %3661 = vst [vmem:[#allocation31_spill] sm:$0xff] %v3027_v46  ;;  %3662 = vst [vmem:[#allocation32_spill] sm:$0xff] %v3031_v7  ;;  %v3054_v5 = vmul.f32 %v3033_v57, %v2990_v42  ;;  %v3058_v33 = vmul.f32 %v3033_v57, %v2799_v21  ;;  %v3062_v17 = vmul.f32 %v3035_v56, %v2990_v42  ;;  %v3064_v10 = vunpack.i.l.bf16 %v2430_v40 }
  0xde   : > { %3663 = vst [vmem:[#allocation33_spill] sm:$0xff] %v3039_v14  ;;  %3664 = vst [vmem:[#allocation34_spill] sm:$0xff] %v3050_v63  ;;  %v3068_v4 = vmul.f32 %v3035_v56, %v2799_v21  ;;  %v3072_v16 = vmul.f32 %v3037_v2, %v2990_v42  ;;  %v3076_v13 = vmul.f32 %v3037_v2, %v2799_v21  ;;  %v2450_v19 = vpop.permute.xlu1 %2449  ;;  %v3100_v15 = vunpack.i.l.bf16 %v2425_v35 }
  0xdf   : > { %3665 = vst [vmem:[#allocation35_spill] sm:$0xff] %v3054_v5  ;;  %3666 = vst [vmem:[#allocation36_spill] sm:$0xff] %v3058_v33  ;;  %v3080_v30 = vmul.f32 %v3041_v39, %v2990_v42  ;;  %v3084_v40 = vmul.f32 %v3041_v39, %v2799_v21  ;;  %v3088_v50 = vmul.f32 %v3043_v26, %v2990_v42  ;;  %v3104_v24 = vunpack.i.l.bf16 %v2440_v20 }
  0xe0   : > { %3667 = vst [vmem:[#allocation37_spill] sm:$0xff] %v3062_v17  ;;  %3668 = vst [vmem:[#allocation38_spill] sm:$0xff] %v3068_v4  ;;  %v3092_v14 = vmul.f32 %v3043_v26, %v2799_v21  ;;  %v3096_v52 = vmul.f32 %v3050_v63, %v3048_v27  ;;  %v3098_v4 = vunpack.i.h.bf16 %v2425_v35  ;;  %v3106_v7 = vunpack.i.h.bf16 %v2435_v62  ;;  %v3700_v63 = vld [vmem:[#allocation2_spill] sm:$0xff] }
  0xe1   : > { %3669 = vst [vmem:[#allocation39_spill] sm:$0xff] %v3072_v16  ;;  %3670 = vst [vmem:[#allocation40_spill] sm:$0xff] %v3076_v13  ;;  %v3102_v13 = vunpack.i.h.bf16 %v2440_v20  ;;  %v3108_v61 = vunpack.i.l.bf16 %v2435_v62  ;;  %v2452_v33 = vunpack.i.h.bf16 %v2450_v19  ;;  %v2451_v32 = vunpack.i.l.bf16 %v2450_v19 }
  0xe2   : > { %3671 = vst [vmem:[#allocation41_spill] sm:$0xff] %v3080_v30  ;;  %3672 = vst [vmem:[#allocation42_spill] sm:$0xff] %v3084_v40  ;;  %v2445_v40 = vpop.permute.xlu0 %2444  ;;  %v3116_v47 = vmul.f32 %v3098_v4, %v3048_v27  ;;  %v3120_v35 = vmul.f32 %v3100_v15, %v3048_v27  ;;  %v2460_v62 = vpop.permute.xlu1 %2459  ;;  %v3128_v19 = vmul.f32 %v3104_v24, %v3048_v27 }
  0xe3   : > { %3673 = vst [vmem:[#allocation43_spill] sm:$0xff] %v3088_v50  ;;  %3674 = vst [vmem:[#allocation44_spill] sm:$0xff] %v3092_v14  ;;  %v3112_v14 = vmul.f32 %v3064_v10, %v3048_v27  ;;  %v3124_v20 = vmul.f32 %v3102_v13, %v3048_v27  ;;  %v3132_v31 = vmul.f32 %v3106_v7, %v3048_v27  ;;  %v2447_v50 = vunpack.i.h.bf16 %v2445_v40 }
  0xe4   : > { %3675 = vst [vmem:[#allocation45_spill] sm:$0xff] %v3096_v52  ;;  %3676 = vst [vmem:[#allocation46_spill] sm:$0xff] %v3098_v4  ;;  %v1050_v36 = vmul.f32 %v2452_v33, %v2725_v51  ;;  %v1049_v1 = vmul.f32 %v2451_v32, %v2725_v51  ;;  %v3138_v30 = vmul.f32 %v3108_v61, %v3048_v27  ;;  %v2446_v0 = vunpack.i.l.bf16 %v2445_v40 }
  0xe5   : > { %3677 = vst [vmem:[#allocation47_spill] sm:$0xff] %v3100_v15  ;;  %3678 = vst [vmem:[#allocation48_spill] sm:$0xff] %v3102_v13  ;;  %v1065_v37 = vmul.f32 %v2808_v23, %v2766_v44  ;;  %v1063_v33 = vmul.f32 %v2816_v29, %v2766_v44  ;;  %v1048_v32 = vmul.f32 %v2447_v50, %v2725_v51 }
  0xe6   : > { %3679 = vst [vmem:[#allocation49_spill] sm:$0xff] %v3104_v24  ;;  %3680 = vst [vmem:[#allocation50_spill] sm:$0xff] %v3106_v7  ;;  %v1058_v13 = vadd.f32 %v1050_v36, %v2737_v12  ;;  %v1047_v7 = vmul.f32 %v2446_v0, %v2725_v51  ;;  %v2455_v24 = vpop.permute.xlu0 %2454  ;;  %v3688_v12 = vld [vmem:[#allocation11_spill] sm:$0xff]  ;;  %v3689_v36 = vld [vmem:[#allocation4_spill] sm:$0xff]  ;;  %v2470_v0 = vpop.permute.xlu1 %2469 }
  0xe7   : > { %3681 = vst [vmem:[#allocation51_spill] sm:$0xff] %v3108_v61  ;;  %3682 = vst [vmem:[#allocation52_spill] sm:$0xff] %v3116_v47  ;;  %v2462_v61 = vunpack.i.h.bf16 %v2460_v62  ;;  %v1056_v16 = vadd.f32 %v1048_v32, %v3690_v59  ;;  %v2471_v32 = vunpack.i.l.bf16 %v2470_v0 }
  0xe8   : > { %3683 = vst [vmem:[#allocation53_spill] sm:$0xff] %v3120_v35  ;;  %3684 = vst [vmem:[#allocation54_spill] sm:$0xff] %v3124_v20  ;;  %v1057_v20 = vadd.f32 %v1049_v1, %v2735_v11  ;;  %v1064_v11 = vmul.f32 %v2814_v28, %v2766_v44  ;;  %v1069_v1 = vmul.f32 %v3688_v12, %v2766_v44  ;;  %v3693_v35 = vld [vmem:[#allocation6_spill] sm:$0xff] }
  0xe9   : > { %3685 = vst [vmem:[#allocation55_spill] sm:$0xff] %v3128_v19  ;;  %3686 = vst [vmem:[#allocation56_spill] sm:$0xff] %v3132_v31  ;;  %v1066_v31 = vmul.f32 %v2806_v22, %v2766_v44  ;;  %v1055_v40 = vadd.f32 %v1047_v7, %v3689_v36  ;;  %v1054_v3 = vmul.f32 %v2462_v61, %v2725_v51  ;;  %v3694_v7 = vld [vmem:[#allocation7_spill] sm:$0xff] }
  0xea   : > { %3687 = vst [vmem:[#allocation57_spill] sm:$0xff] %v3138_v30  ;;  %v2461_v30 = vunpack.i.l.bf16 %v2460_v62  ;;  %v1073_v19 = vadd.f32 %v1065_v37, %v1057_v20  ;;  %v3691_v62 = vld [vmem:[#allocation10_spill] sm:$0xff]  ;;  %v2457_v37 = vunpack.i.h.bf16 %v2455_v24  ;;  %v1072_v15 = vadd.f32 %v1064_v11, %v1056_v16  ;;  %v3697_v11 = vld [vmem:[#allocation8_spill] sm:$0xff] }
  0xeb   : > { %v1074_v17 = vadd.f32 %v1066_v31, %v1058_v13  ;;  %v1070_v47 = vmul.f32 %v3691_v62, %v2766_v44  ;;  %v2456_v31 = vunpack.i.l.bf16 %v2455_v24  ;;  %v3692_v13 = vld [vmem:[#allocation13_spill] sm:$0xff]  ;;  %v1071_v4 = vadd.f32 %v1063_v33, %v1055_v40  ;;  %v3695_v24 = vld [vmem:[#allocation15_spill] sm:$0xff]  ;;  %v3696_v33 = vld [vmem:[#allocation14_spill] sm:$0xff] }
  0xec   : > { %v1053_v50 = vmul.f32 %v2461_v30, %v2725_v51  ;;  %v1067_v20 = vmul.f32 %v3692_v13, %v2766_v44  ;;  %v1062_v36 = vadd.f32 %v1054_v3, %v3694_v7  ;;  %v1052_v59 = vmul.f32 %v2457_v37, %v2725_v51  ;;  %v3698_v40 = vld [vmem:[#allocation9_spill] sm:$0xff] }
  0xed   : > { %v1051_v61 = vmul.f32 %v2456_v31, %v2725_v51  ;;  %v2472_v30 = vunpack.i.h.bf16 %v2470_v0  ;;  %v1081_v8 = vmul.f32 %v3695_v24, %v2799_v21  ;;  %v1082_v16 = vmul.f32 %v3696_v33, %v2799_v21 }
  0xee   : > { %v1061_v46 = vadd.f32 %v1053_v50, %v3693_v35  ;;  %v3168_v5 = vadd.f32 %v1070_v47, %v1062_v36  ;;  %v1060_v3 = vadd.f32 %v1052_v59, %v3698_v40  ;;  %v3699_v50 = vld [vmem:[#allocation12_spill] sm:$0xff]  ;;  %v1137_v0 = vmul.f32 %v2471_v32, %v2854_v54 }
  0xef   : > { %v1059_v35 = vadd.f32 %v1051_v61, %v3697_v11  ;;  %v1068_v37 = vmul.f32 %v3699_v50, %v2766_v44  ;;  %v1138_v31 = vmul.f32 %v2472_v30, %v2854_v54  ;;  %v1090_v47 = vadd.f32 %v1082_v16, %v1074_v17  ;;  %v2465_v11 = vpop.permute.xlu0 %2464 }
  0xf0   : > { %v3166_v6 = vadd.f32 %v1069_v1, %v1061_v46  ;;  %v1538_v46 = vmul.f32 %v2472_v30, %v2725_v51  ;;  %v1089_v1 = vadd.f32 %v1081_v8, %v1073_v19  ;;  %v1153_v61 = vmul.f32 %v2997_v34, %v2907_v18  ;;  %v3701_v8 = vld [vmem:[#allocation3_spill] sm:$0xff] }
  0xf1   : > { %v3181_v7 = vadd.f32 %v1067_v20, %v1059_v35  ;;  %v3183_v36 = vadd.f32 %v1068_v37, %v1060_v3  ;;  %v1154_v59 = vmul.f32 %v2995_v48, %v2907_v18  ;;  %v1146_v52 = vadd.f32 %v1138_v31, %v1090_v47 }
  0xf2   : > { %v1145_v40 = vadd.f32 %v1137_v0, %v1089_v1  ;;  %v1513_v30 = vmul.f32 %v2808_v23, %v3700_v63  ;;  %v1521_v17 = vmul.f32 %v3695_v24, %v3701_v8  ;;  %v1514_v19 = vmul.f32 %v2806_v22, %v3700_v63 }
  0xf3   : > { %v1522_v20 = vmul.f32 %v3696_v33, %v3701_v8  ;;  %v1537_v16 = vmul.f32 %v2471_v32, %v2725_v51  ;;  %v1553_v35 = vmul.f32 %v2997_v34, %v2766_v44  ;;  %v1554_v23 = vmul.f32 %v2995_v48, %v2766_v44 }
  0xf4   : > { %v3200_v3 = vadd.f32 %v1153_v61, %v1145_v40  ;;  %v1529_v37 = vadd.f32 %v1521_v17, %v1513_v30  ;;  %v2467_v31 = vunpack.i.h.bf16 %v2465_v11  ;;  %v2466_v24 = vunpack.i.l.bf16 %v2465_v11 }
  0xf5   : > { %v1530_v1 = vadd.f32 %v1522_v20, %v1514_v19  ;;  %v1079_v22 = vmul.f32 %v2866_v60, %v2799_v21  ;;  %v1080_v33 = vmul.f32 %v2849_v53, %v2799_v21  ;;  %v3208_v47 = vadd.f32 %v1154_v59, %v1146_v52  ;;  %v2480_v59 = vpop.permute.xlu1 %2479 }
  0xf6   : > { %v1545_v32 = vadd.f32 %v1537_v16, %v1529_v37  ;;  %v1136_v34 = vmul.f32 %v2467_v31, %v2854_v54  ;;  %v1536_v0 = vmul.f32 %v2467_v31, %v2725_v51  ;;  %v1135_v48 = vmul.f32 %v2466_v24, %v2854_v54 }
  0xf7   : > { %v1546_v61 = vadd.f32 %v1538_v46, %v1530_v1  ;;  %v1087_v40 = vadd.f32 %v1079_v22, %v1071_v4  ;;  %v1088_v30 = vadd.f32 %v1080_v33, %v1072_v15  ;;  %v1151_v11 = vmul.f32 %v3033_v57, %v2907_v18 }
  0xf8   : > { %v3213_v17 = vadd.f32 %v1553_v35, %v1545_v32  ;;  %v1152_v19 = vmul.f32 %v3003_v55, %v2907_v18  ;;  %v1511_v52 = vmul.f32 %v2816_v29, %v3700_v63  ;;  %v1512_v4 = vmul.f32 %v2814_v28, %v3700_v63 }
  0xf9   : > { %v1143_v20 = vadd.f32 %v1135_v48, %v1087_v40  ;;  %v1144_v16 = vadd.f32 %v1136_v34, %v1088_v30  ;;  %v1519_v15 = vmul.f32 %v2866_v60, %v3701_v8  ;;  %v3225_v46 = vadd.f32 %v1554_v23, %v1546_v61 }
  0xfa   : > { %v1520_v35 = vmul.f32 %v2849_v53, %v3701_v8  ;;  %v1535_v37 = vmul.f32 %v2466_v24, %v2725_v51  ;;  %v1551_v31 = vmul.f32 %v3033_v57, %v2766_v44  ;;  %v1552_v22 = vmul.f32 %v3003_v55, %v2766_v44 }
  0xfb   : > { %v3232_v29 = vadd.f32 %v1151_v11, %v1143_v20  ;;  %v1527_v1 = vadd.f32 %v1519_v15, %v1511_v52  ;;  %v2482_v28 = vunpack.i.h.bf16 %v2480_v59  ;;  %v2481_v32 = vunpack.i.l.bf16 %v2480_v59  ;;  %v2475_v59 = vpop.permute.xlu0 %2474 }
  0xfc   : > { %v1528_v33 = vadd.f32 %v1520_v35, %v1512_v4  ;;  %v1085_v60 = vmul.f32 %v2894_v45, %v2799_v21  ;;  %v1086_v53 = vmul.f32 %v2892_v9, %v2799_v21  ;;  %v3240_v23 = vadd.f32 %v1152_v19, %v1144_v16 }
  0xfd   : > { %v1543_v24 = vadd.f32 %v1535_v37, %v1527_v1  ;;  %v1142_v57 = vmul.f32 %v2482_v28, %v2854_v54  ;;  %v1542_v34 = vmul.f32 %v2482_v28, %v2725_v51  ;;  %v1141_v30 = vmul.f32 %v2481_v32, %v2854_v54 }
  0xfe   : > { %v1544_v61 = vadd.f32 %v1536_v0, %v1528_v33  ;;  %v1093_v40 = vadd.f32 %v1085_v60, %v3166_v6  ;;  %v1094_v55 = vadd.f32 %v1086_v53, %v3168_v5  ;;  %v1157_v11 = vmul.f32 %v3037_v2, %v2907_v18 }
  0xff   : > { %v3247_v48 = vadd.f32 %v1551_v31, %v1543_v24  ;;  %v1158_v19 = vmul.f32 %v3035_v56, %v2907_v18  ;;  %v1517_v52 = vmul.f32 %v3688_v12, %v3700_v63  ;;  %v1518_v6 = vmul.f32 %v3691_v62, %v3700_v63 }
 0x100   : > { %v1149_v20 = vadd.f32 %v1141_v30, %v1093_v40  ;;  %v1150_v0 = vadd.f32 %v1142_v57, %v1094_v55  ;;  %v1525_v5 = vmul.f32 %v2894_v45, %v3701_v8  ;;  %v3259_v16 = vadd.f32 %v1552_v22, %v1544_v61  ;;  %v2490_v30 = vpop.permute.xlu1 %2489 }
 0x101   : > { %v1526_v4 = vmul.f32 %v2892_v9, %v3701_v8  ;;  %v1541_v15 = vmul.f32 %v2481_v32, %v2725_v51  ;;  %v1557_v35 = vmul.f32 %v3037_v2, %v2766_v44  ;;  %v1558_v31 = vmul.f32 %v3035_v56, %v2766_v44 }
 0x102   : > { %v3266_v12 = vadd.f32 %v1157_v11, %v1149_v20  ;;  %v1533_v37 = vadd.f32 %v1525_v5, %v1517_v52  ;;  %v2477_v62 = vunpack.i.h.bf16 %v2475_v59  ;;  %v2476_v28 = vunpack.i.l.bf16 %v2475_v59 }
 0x103   : > { %v1534_v1 = vadd.f32 %v1526_v4, %v1518_v6  ;;  %v1083_v45 = vmul.f32 %v2919_v41, %v2799_v21  ;;  %v1084_v9 = vmul.f32 %v2896_v43, %v2799_v21  ;;  %v3274_v22 = vadd.f32 %v1158_v19, %v1150_v0 }
 0x104   : > { %v1549_v33 = vadd.f32 %v1541_v15, %v1533_v37  ;;  %v1140_v2 = vmul.f32 %v2477_v62, %v2854_v54  ;;  %v1540_v32 = vmul.f32 %v2477_v62, %v2725_v51  ;;  %v1139_v24 = vmul.f32 %v2476_v28, %v2854_v54 }
 0x105   : > { %v1550_v60 = vadd.f32 %v1542_v34, %v1534_v1  ;;  %v1091_v53 = vadd.f32 %v1083_v45, %v3181_v7  ;;  %v1092_v56 = vadd.f32 %v1084_v9, %v3183_v36  ;;  %v1155_v61 = vmul.f32 %v3043_v26, %v2907_v18 }
 0x106   : > { %v3281_v57 = vadd.f32 %v1557_v35, %v1549_v33  ;;  %v1156_v40 = vmul.f32 %v3041_v39, %v2907_v18  ;;  %v1515_v55 = vmul.f32 %v3692_v13, %v3700_v63  ;;  %v1516_v7 = vmul.f32 %v3699_v50, %v3700_v63  ;;  %v3702_v35 = vld [vmem:[#allocation34_spill] sm:$0xff] }
 0x107   : > { %v1147_v11 = vadd.f32 %v1139_v24, %v1091_v53  ;;  %v1148_v34 = vadd.f32 %v1140_v2, %v1092_v56  ;;  %v1523_v36 = vmul.f32 %v2919_v41, %v3701_v8  ;;  %v3293_v19 = vadd.f32 %v1558_v31, %v1550_v60  ;;  %v2485_v31 = vpop.permute.xlu0 %2484  ;;  %v3704_v56 = vld [vmem:[#allocation18_spill] sm:$0xff]  ;;  %v3705_v24 = vld [vmem:[#allocation35_spill] sm:$0xff] }
 0x108   : > { %v1524_v52 = vmul.f32 %v2896_v43, %v3701_v8  ;;  %v1539_v59 = vmul.f32 %v2476_v28, %v2725_v51  ;;  %v1555_v20 = vmul.f32 %v3043_v26, %v2766_v44  ;;  %v1556_v6 = vmul.f32 %v3041_v39, %v2766_v44 }
 0x109   : > { %v3300_v13 = vadd.f32 %v1155_v61, %v1147_v11  ;;  %v1531_v0 = vadd.f32 %v1523_v36, %v1515_v55  ;;  %v2492_v63 = vunpack.i.h.bf16 %v2490_v30  ;;  %v3304_v50 = vadd.f32 %v1156_v40, %v1148_v34  ;;  %v2500_v34 = vpop.permute.xlu1 %2499 }
 0x10a   : > { %v1532_v41 = vadd.f32 %v1524_v52, %v1516_v7  ;;  %v2491_v5 = vunpack.i.l.bf16 %v2490_v30  ;;  %v917_v4 = vadd.f32 %v3019_v58, %v2925_v38  ;;  %v918_v26 = vadd.f32 %v3009_v25, %v2927_v49  ;;  %v3703_v38 = vld [vmem:[#allocation45_spill] sm:$0xff]  ;;  %v3706_v30 = vld [vmem:[#allocation19_spill] sm:$0xff] }
 0x10b   : > { %v1547_v43 = vadd.f32 %v1539_v59, %v1531_v0  ;;  %v1226_v51 = vmul.f32 %v2492_v63, %v3048_v27  ;;  %v1169_v8 = vmul.f32 %v3064_v10, %v2990_v42  ;;  %v1586_v44 = vmul.f32 %v2492_v63, %v2854_v54  ;;  %v3708_v52 = vld [vmem:[#allocation53_spill] sm:$0xff] }
 0x10c   : > { %v1548_v15 = vadd.f32 %v1540_v32, %v1532_v41  ;;  %v3315_v39 = vadd.f32 %v3112_v14, %v917_v4  ;;  %v1170_v37 = vmul.f32 %v3702_v35, %v2990_v42  ;;  %v3320_v58 = vadd.f32 %v3703_v38, %v918_v26  ;;  %v3711_v4 = vld [vmem:[#allocation52_spill] sm:$0xff] }
 0x10d   : > { %v1177_v62 = vadd.f32 %v1169_v8, %v3200_v3  ;;  %v1225_v49 = vmul.f32 %v2491_v5, %v3048_v27  ;;  %v1569_v25 = vmul.f32 %v3064_v10, %v2799_v21  ;;  %v3326_v1 = vadd.f32 %v1555_v20, %v1547_v43  ;;  %v3709_v20 = vld [vmem:[#allocation47_spill] sm:$0xff] }
 0x10e   : > { %v1178_v28 = vadd.f32 %v1170_v37, %v3208_v47  ;;  %v1570_v14 = vmul.f32 %v3702_v35, %v2799_v21  ;;  %v1585_v45 = vmul.f32 %v2491_v5, %v2854_v54  ;;  %v2487_v2 = vunpack.i.h.bf16 %v2485_v31 }
 0x10f   : > { %v3332_v9 = vadd.f32 %v1225_v49, %v1177_v62  ;;  %v1577_v33 = vadd.f32 %v1569_v25, %v3213_v17  ;;  %v2486_v3 = vunpack.i.l.bf16 %v2485_v31  ;;  %v3335_v32 = vadd.f32 %v1556_v6, %v1548_v15  ;;  %v3707_v17 = vld [vmem:[#allocation31_spill] sm:$0xff]  ;;  %v3710_v6 = vld [vmem:[#allocation46_spill] sm:$0xff]  ;;  %v2495_v15 = vpop.permute.xlu0 %2494 }
 0x110   : > { %v3337_v60 = vadd.f32 %v1226_v51, %v1178_v28  ;;  %v1578_v53 = vadd.f32 %v1570_v14, %v3225_v46  ;;  %v915_v47 = vadd.f32 %v3705_v24, %v3704_v56  ;;  %v1224_v55 = vmul.f32 %v2487_v2, %v3048_v27  ;;  %v3712_v28 = vld [vmem:[#allocation22_spill] sm:$0xff]  ;;  %v3713_v14 = vld [vmem:[#allocation39_spill] sm:$0xff]  ;;  %v3717_v24 = vld [vmem:[#allocation49_spill] sm:$0xff] }
 0x111   : > { %v3344_v40 = vadd.f32 %v1585_v45, %v1577_v33  ;;  %v916_v11 = vadd.f32 %v3707_v17, %v3706_v30  ;;  %v1584_v46 = vmul.f32 %v2487_v2, %v2854_v54  ;;  %v1167_v0 = vmul.f32 %v3709_v20, %v2990_v42  ;;  %v3716_v56 = vld [vmem:[#allocation55_spill] sm:$0xff]  ;;  %v3718_v30 = vld [vmem:[#allocation48_spill] sm:$0xff] }
 0x112   : > { %v3351_v36 = vadd.f32 %v1586_v44, %v1578_v53  ;;  %v3355_v59 = vadd.f32 %v3708_v52, %v915_v47  ;;  %v1168_v63 = vmul.f32 %v3710_v6, %v2990_v42  ;;  %v1223_v41 = vmul.f32 %v2486_v3, %v3048_v27  ;;  %v2510_v52 = vpop.permute.xlu1 %2509 }
 0x113   : > { %v1567_v5 = vmul.f32 %v3709_v20, %v2799_v21  ;;  %v3365_v43 = vadd.f32 %v3711_v4, %v916_v11  ;;  %v1568_v51 = vmul.f32 %v3710_v6, %v2799_v21  ;;  %v1583_v26 = vmul.f32 %v2486_v3, %v2854_v54  ;;  %v2505_v4 = vpop.permute.xlu0 %2504 }
 0x114   : > { %v2502_v8 = vunpack.i.h.bf16 %v2500_v34  ;;  %v1175_v44 = vadd.f32 %v1167_v0, %v3232_v29  ;;  %v1176_v37 = vadd.f32 %v1168_v63, %v3240_v23  ;;  %v2501_v38 = vunpack.i.l.bf16 %v2500_v34  ;;  %v3714_v29 = vld [vmem:[#allocation23_spill] sm:$0xff]  ;;  %v3715_v23 = vld [vmem:[#allocation37_spill] sm:$0xff] }
 0x115   : > { %v1575_v31 = vadd.f32 %v1567_v5, %v3247_v48  ;;  %v1576_v62 = vadd.f32 %v1568_v51, %v3259_v16  ;;  %v921_v45 = vadd.f32 %v3713_v14, %v3712_v28  ;;  %v922_v53 = vadd.f32 %v3715_v23, %v3714_v29  ;;  %v3719_v51 = vld [vmem:[#allocation54_spill] sm:$0xff]  ;;  %v3721_v28 = vld [vmem:[#allocation43_spill] sm:$0xff] }
 0x116   : > { %v1230_v49 = vmul.f32 %v2502_v8, %v3048_v27  ;;  %v1590_v25 = vmul.f32 %v2502_v8, %v2854_v54  ;;  %v3378_v33 = vadd.f32 %v1223_v41, %v1175_v44  ;;  %v3380_v2 = vadd.f32 %v1224_v55, %v1176_v37  ;;  %v3722_v23 = vld [vmem:[#allocation27_spill] sm:$0xff] }
 0x117   : > { %v3382_v3 = vadd.f32 %v1583_v26, %v1575_v31  ;;  %v3386_v48 = vadd.f32 %v1584_v46, %v1576_v62  ;;  %v3389_v16 = vadd.f32 %v3716_v56, %v921_v45  ;;  %v1173_v47 = vmul.f32 %v3717_v24, %v2990_v42 }
 0x118   : > { %v1174_v17 = vmul.f32 %v3718_v30, %v2990_v42  ;;  %v1229_v34 = vmul.f32 %v2501_v38, %v3048_v27  ;;  %v1573_v46 = vmul.f32 %v3717_v24, %v2799_v21  ;;  %v1574_v41 = vmul.f32 %v3718_v30, %v2799_v21 }
 0x119   : > { %v1181_v0 = vadd.f32 %v1173_v47, %v3266_v12  ;;  %v1589_v5 = vmul.f32 %v2501_v38, %v2854_v54  ;;  %v3408_v26 = vadd.f32 %v3719_v51, %v922_v53  ;;  %v2497_v44 = vunpack.i.h.bf16 %v2495_v15  ;;  %v3723_v53 = vld [vmem:[#allocation41_spill] sm:$0xff] }
 0x11a   : > { %v1182_v63 = vadd.f32 %v1174_v17, %v3274_v22  ;;  %v1581_v8 = vadd.f32 %v1573_v46, %v3281_v57  ;;  %v2496_v37 = vunpack.i.l.bf16 %v2495_v15  ;;  %v1582_v12 = vadd.f32 %v1574_v41, %v3293_v19  ;;  %v3720_v22 = vld [vmem:[#allocation26_spill] sm:$0xff]  ;;  %v3724_v19 = vld [vmem:[#allocation57_spill] sm:$0xff]  ;;  %v3725_v17 = vld [vmem:[#allocation51_spill] sm:$0xff] }
 0x11b   : > { %v3411_v31 = vadd.f32 %v1229_v34, %v1181_v0  ;;  %v919_v14 = vadd.f32 %v3721_v28, %v3720_v22  ;;  %v1228_v38 = vmul.f32 %v2497_v44, %v3048_v27  ;;  %v1588_v29 = vmul.f32 %v2497_v44, %v2854_v54  ;;  %v3726_v46 = vld [vmem:[#allocation50_spill] sm:$0xff]  ;;  %v3727_v22 = vld [vmem:[#allocation56_spill] sm:$0xff] }
 0x11c   : > { %v3413_v62 = vadd.f32 %v1230_v49, %v1182_v63  ;;  %v3418_v45 = vadd.f32 %v1589_v5, %v1581_v8  ;;  %v920_v57 = vadd.f32 %v3723_v53, %v3722_v23  ;;  %v3428_v56 = vadd.f32 %v1590_v25, %v1582_v12  ;;  %v2520_v5 = vpop.permute.xlu1 %2519  ;;  %v2515_v12 = vpop.permute.xlu0 %2514  ;;  %v3728_v49 = vld [vmem:[#allocation16_spill] sm:$0xff] }
 0x11d   : > { %v3431_v47 = vadd.f32 %v3724_v19, %v919_v14  ;;  %v1171_v34 = vmul.f32 %v3725_v17, %v2990_v42  ;;  %v1172_v0 = vmul.f32 %v3726_v46, %v2990_v42  ;;  %v1227_v63 = vmul.f32 %v2496_v37, %v3048_v27 }
 0x11e   : > { %v1571_v41 = vmul.f32 %v3725_v17, %v2799_v21  ;;  %v1572_v51 = vmul.f32 %v3726_v46, %v2799_v21  ;;  %v1587_v25 = vmul.f32 %v2496_v37, %v2854_v54  ;;  %v2512_v8 = vunpack.i.h.bf16 %v2510_v52  ;;  %v3729_v21 = vld [vmem:[#allocation30_spill] sm:$0xff] }
 0x11f   : > { %v2511_v44 = vunpack.i.l.bf16 %v2510_v52  ;;  %v3444_v28 = vadd.f32 %v3727_v22, %v920_v57  ;;  %v1179_v14 = vadd.f32 %v1171_v34, %v3300_v13  ;;  %v1180_v23 = vadd.f32 %v1172_v0, %v3304_v50  ;;  %v3730_v22 = vld [vmem:[#allocation17_spill] sm:$0xff]  ;;  %v3731_v13 = vld [vmem:[#allocation28_spill] sm:$0xff] }
 0x120   : > { %v1579_v53 = vadd.f32 %v1571_v41, %v3326_v1  ;;  %v1580_v19 = vadd.f32 %v1572_v51, %v3335_v32  ;;  %v1378_v15 = vmul.f32 %v2512_v8, %v2907_v18  ;;  %v1313_v55 = vadd.f32 %v3729_v21, %v3728_v49  ;;  %v2530_v51 = vpop.permute.xlu1 %2529  ;;  %v3735_v21 = vld [vmem:[#allocation32_spill] sm:$0xff] }
 0x121   : > { %v1321_v52 = vmul.f32 %v3064_v10, %v2854_v54  ;;  %v3455_v37 = vadd.f32 %v1227_v63, %v1179_v14  ;;  %v3457_v57 = vadd.f32 %v1228_v38, %v1180_v23  ;;  %v1314_v34 = vadd.f32 %v3731_v13, %v3730_v22  ;;  %v3733_v23 = vld [vmem:[#allocation36_spill] sm:$0xff] }
 0x122   : > { %v1322_v50 = vmul.f32 %v3702_v35, %v2854_v54  ;;  %v3463_v1 = vadd.f32 %v1587_v25, %v1579_v53  ;;  %v1377_v0 = vmul.f32 %v2511_v44, %v2907_v18  ;;  %v2507_v41 = vunpack.i.h.bf16 %v2505_v4  ;;  %v3732_v25 = vld [vmem:[#allocation20_spill] sm:$0xff]  ;;  %v2525_v53 = vpop.permute.xlu0 %2524  ;;  %v3734_v44 = vld [vmem:[#allocation21_spill] sm:$0xff] }
 0x123   : > { %v1329_v32 = vadd.f32 %v1321_v52, %v1313_v55  ;;  %v3470_v38 = vadd.f32 %v1588_v29, %v1580_v19  ;;  %v2506_v63 = vunpack.i.l.bf16 %v2505_v4  ;;  %v1311_v55 = vadd.f32 %v3733_v23, %v3732_v25 }
 0x124   : > { %v1330_v8 = vadd.f32 %v1322_v50, %v1314_v34  ;;  %v1376_v35 = vmul.f32 %v2507_v41, %v2907_v18  ;;  %v1312_v52 = vadd.f32 %v3735_v21, %v3734_v44  ;;  %v1319_v22 = vmul.f32 %v3709_v20, %v2854_v54  ;;  %v3736_v34 = vld [vmem:[#allocation24_spill] sm:$0xff]  ;;  %v3739_v41 = vld [vmem:[#allocation38_spill] sm:$0xff]  ;;  %v2540_v61 = vpop.permute.xlu1 %2539 }
 0x125   : > { %v1385_v14 = vadd.f32 %v1377_v0, %v1329_v32  ;;  %v1320_v29 = vmul.f32 %v3710_v6, %v2854_v54  ;;  %v1375_v4 = vmul.f32 %v2506_v63, %v2907_v18  ;;  %v2522_v19 = vunpack.i.h.bf16 %v2520_v5  ;;  %v3737_v50 = vld [vmem:[#allocation40_spill] sm:$0xff]  ;;  %v3738_v0 = vld [vmem:[#allocation25_spill] sm:$0xff] }
 0x126   : > { %v2521_v13 = vunpack.i.l.bf16 %v2520_v5  ;;  %v1317_v32 = vadd.f32 %v3737_v50, %v3736_v34  ;;  %v1318_v25 = vadd.f32 %v3739_v41, %v3738_v0  ;;  %v1327_v23 = vadd.f32 %v1319_v22, %v1311_v55  ;;  %v3741_v22 = vld [vmem:[#allocation44_spill] sm:$0xff]  ;;  %v3742_v41 = vld [vmem:[#allocation33_spill] sm:$0xff] }
 0x127   : > { %v1328_v49 = vadd.f32 %v1320_v29, %v1312_v52  ;;  %v1325_v44 = vmul.f32 %v3717_v24, %v2854_v54  ;;  %v1326_v20 = vmul.f32 %v3718_v30, %v2854_v54  ;;  %v1382_v6 = vmul.f32 %v2522_v19, %v2907_v18  ;;  %v3740_v52 = vld [vmem:[#allocation29_spill] sm:$0xff]  ;;  %v2535_v29 = vpop.permute.xlu0 %2534 }
 0x128   : > { %v1381_v63 = vmul.f32 %v2521_v13, %v2907_v18  ;;  %v2517_v21 = vunpack.i.h.bf16 %v2515_v12  ;;  %v2516_v5 = vunpack.i.l.bf16 %v2515_v12  ;;  %v1386_v10 = vadd.f32 %v1378_v15, %v1330_v8  ;;  %v3743_v13 = vld [vmem:[#allocation42_spill] sm:$0xff] }
 0x129   : > { %v1383_v11 = vadd.f32 %v1375_v4, %v1327_v23  ;;  %v1384_v34 = vadd.f32 %v1376_v35, %v1328_v49  ;;  %v1333_v50 = vadd.f32 %v1325_v44, %v1317_v32  ;;  %v1334_v0 = vadd.f32 %v1326_v20, %v1318_v25 }
 0x12a   : > { %v1380_v55 = vmul.f32 %v2517_v21, %v2907_v18  ;;  %v1315_v24 = vadd.f32 %v3741_v22, %v3740_v52  ;;  %v1323_v30 = vmul.f32 %v3725_v17, %v2854_v54  ;;  %v1316_v7 = vadd.f32 %v3743_v13, %v3742_v41 }
 0x12b   : > { %v1389_v19 = vadd.f32 %v1381_v63, %v1333_v50  ;;  %v1324_v15 = vmul.f32 %v3726_v46, %v2854_v54  ;;  %v1379_v12 = vmul.f32 %v2516_v5, %v2907_v18  ;;  %v1390_v49 = vadd.f32 %v1382_v6, %v1334_v0  ;;  %v2545_v52 = vpop.permute.xlu0 %2544 }
 0x12c   : > { %v2532_v8 = vunpack.i.h.bf16 %v2530_v51  ;;  %v2531_v35 = vunpack.i.l.bf16 %v2530_v51  ;;  %v2527_v4 = vunpack.i.h.bf16 %v2525_v53  ;;  %v1331_v32 = vadd.f32 %v1323_v30, %v1315_v24  ;;  %v2550_v51 = vpop.permute.xlu1 %2549 }
 0x12d   : > { %v1332_v25 = vadd.f32 %v1324_v15, %v1316_v7  ;;  %v2526_v23 = vunpack.i.l.bf16 %v2525_v53  ;;  %v2542_v44 = vunpack.i.h.bf16 %v2540_v61  ;;  %v2541_v21 = vunpack.i.l.bf16 %v2540_v61 }
 0x12e   : > { %v1434_v17 = vmul.f32 %v2532_v8, %v2990_v42  ;;  %v1602_v20 = vmul.f32 %v2532_v8, %v2907_v18  ;;  %v1433_v63 = vmul.f32 %v2531_v35, %v2990_v42  ;;  %v1387_v50 = vadd.f32 %v1379_v12, %v1331_v32 }
 0x12f   : > { %v1601_v54 = vmul.f32 %v2531_v35, %v2907_v18  ;;  %v1432_v46 = vmul.f32 %v2527_v4, %v2990_v42  ;;  %v1600_v6 = vmul.f32 %v2527_v4, %v2907_v18  ;;  %v1388_v5 = vadd.f32 %v1380_v55, %v1332_v25 }
 0x130   : > { %v1441_v0 = vadd.f32 %v1433_v63, %v1385_v14  ;;  %v1442_v7 = vadd.f32 %v1434_v17, %v1386_v10  ;;  %v1431_v53 = vmul.f32 %v2526_v23, %v2990_v42  ;;  %v1610_v24 = vadd.f32 %v1602_v20, %v3351_v36 }
 0x131   : > { %v1609_v22 = vadd.f32 %v1601_v54, %v3344_v40  ;;  %v1440_v30 = vadd.f32 %v1432_v46, %v1384_v34  ;;  %v1599_v61 = vmul.f32 %v2526_v23, %v2907_v18  ;;  %v1608_v41 = vadd.f32 %v1600_v6, %v3386_v48  ;;  %v2560_v23 = vpop.permute.xlu1 %2559 }
 0x132   : > { %v1438_v13 = vmul.f32 %v2542_v44, %v2990_v42  ;;  %v1606_v15 = vmul.f32 %v2542_v44, %v2907_v18  ;;  %v1437_v55 = vmul.f32 %v2541_v21, %v2990_v42  ;;  %v1439_v14 = vadd.f32 %v1431_v53, %v1383_v11 }
 0x133   : > { %v1605_v10 = vmul.f32 %v2541_v21, %v2907_v18  ;;  %v2537_v12 = vunpack.i.h.bf16 %v2535_v29  ;;  %v2536_v8 = vunpack.i.l.bf16 %v2535_v29  ;;  %v1607_v40 = vadd.f32 %v1599_v61, %v3382_v3  ;;  %v2555_v3 = vpop.permute.xlu0 %2554 }
 0x134   : > { %v1445_v35 = vadd.f32 %v1437_v55, %v1389_v19  ;;  %v1446_v36 = vadd.f32 %v1438_v13, %v1390_v49  ;;  %v2552_v34 = vunpack.i.h.bf16 %v2550_v51  ;;  %v1614_v4 = vadd.f32 %v1606_v15, %v3428_v56 }
 0x135   : > { %v1436_v48 = vmul.f32 %v2537_v12, %v2990_v42  ;;  %v1604_v32 = vmul.f32 %v2537_v12, %v2907_v18  ;;  %v1435_v25 = vmul.f32 %v2536_v8, %v2990_v42  ;;  %v1603_v11 = vmul.f32 %v2536_v8, %v2907_v18 }
 0x136   : > { %v1490_v44 = vmul.f32 %v2552_v34, %v3048_v27  ;;  %v1618_v29 = vmul.f32 %v2552_v34, %v2990_v42  ;;  %v2551_v17 = vunpack.i.l.bf16 %v2550_v51  ;;  %v1613_v19 = vadd.f32 %v1605_v10, %v3418_v45 }
 0x137   : > { %v1443_v49 = vadd.f32 %v1435_v25, %v1387_v50  ;;  %v1444_v20 = vadd.f32 %v1436_v48, %v1388_v5  ;;  %v2547_v56 = vunpack.i.h.bf16 %v2545_v52  ;;  %v1612_v63 = vadd.f32 %v1604_v32, %v3470_v38 }
 0x138   : > { %v1489_v21 = vmul.f32 %v2551_v17, %v3048_v27  ;;  %v1498_v54 = vadd.f32 %v1490_v44, %v1442_v7  ;;  %v1617_v46 = vmul.f32 %v2551_v17, %v2990_v42  ;;  %v1611_v18 = vadd.f32 %v1603_v11, %v3463_v1  ;;  %v2570_v1 = vpop.permute.xlu1 %2569 }
 0x139   : > { %v1488_v6 = vmul.f32 %v2547_v56, %v3048_v27  ;;  %v1616_v53 = vmul.f32 %v2547_v56, %v2990_v42  ;;  %v2546_v51 = vunpack.i.l.bf16 %v2545_v52  ;;  %v3744_v45 = vmax.f32 %v3320_v58, %v3337_v60  ;;  %v2565_v52 = vpop.permute.xlu0 %2564 }
 0x13a   : > { %v1497_v61 = vadd.f32 %v1489_v21, %v1441_v0  ;;  %v1626_v5 = vadd.f32 %v1618_v29, %v1610_v24  ;;  %v2562_v38 = vunpack.i.h.bf16 %v2560_v23  ;;  %v1625_v13 = vadd.f32 %v1617_v46, %v1609_v22 }
 0x13b   : > { %v3535_v50 = vmax.f32 %v3744_v45, %v1498_v54  ;;  %v1487_v7 = vmul.f32 %v2546_v51, %v3048_v27  ;;  %v1496_v15 = vadd.f32 %v1488_v6, %v1440_v30  ;;  %v1615_v55 = vmul.f32 %v2546_v51, %v2990_v42 }
 0x13c   : > { %v3745_v10 = vmax.f32 %v3315_v39, %v3332_v9  ;;  %v1494_v0 = vmul.f32 %v2562_v38, %v3048_v27  ;;  %v1622_v58 = vmul.f32 %v2562_v38, %v2990_v42  ;;  %v2561_v60 = vunpack.i.l.bf16 %v2560_v23 }
 0x13d   : > { %v1495_v24 = vadd.f32 %v1487_v7, %v1439_v14  ;;  %v3746_v22 = vmax.f32 %v3365_v43, %v3380_v2  ;;  %v1624_v30 = vadd.f32 %v1616_v53, %v1608_v41  ;;  %v2557_v34 = vunpack.i.h.bf16 %v2555_v3  ;;  %v2575_v6 = vpop.permute.xlu0 %2574  ;;  %v1928_v7 = vld [vmem:[%s3600_s2] ss:$0 sm:$0xff] }
 0x13e   : > { %v3542_v12 = vmax.f32 %v3745_v10, %v1497_v61  ;;  %v1623_v48 = vadd.f32 %v1615_v55, %v1607_v40  ;;  %v1493_v32 = vmul.f32 %v2561_v60, %v3048_v27  ;;  %v1502_v25 = vadd.f32 %v1494_v0, %v1446_v36 }
 0x13f   : > { %v1504_v8 = vmax.f32 %v3746_v22, %v1496_v15  ;;  %v1621_v39 = vmul.f32 %v2561_v60, %v2990_v42  ;;  %v3747_v9 = vmax.f32 %v3355_v59, %v3378_v33  ;;  %v1492_v23 = vmul.f32 %v2557_v34, %v3048_v27  ;;  %v2580_v59 = vpop.permute.xlu1 %2579 }
 0x140   : > { %v1620_v14 = vmul.f32 %v2557_v34, %v2990_v42  ;;  %v2556_v44 = vunpack.i.l.bf16 %v2555_v3  ;;  %v1501_v29 = vadd.f32 %v1493_v32, %v1445_v35  ;;  %v3748_v43 = vmax.f32 %v3408_v26, %v3413_v62 }
 0x141   : > { %v1503_v11 = vmax.f32 %v3747_v9, %v1495_v24  ;;  %v1629_v41 = vadd.f32 %v1621_v39, %v1613_v19  ;;  %v1630_v40 = vadd.f32 %v1622_v58, %v1614_v4  ;;  %v1500_v17 = vadd.f32 %v1492_v23, %v1444_v20 }
 0x142   : > { %v1510_v2 = vmax.f32 %v3748_v43, %v1502_v25  ;;  %v1491_v36 = vmul.f32 %v2556_v44, %v3048_v27  ;;  %v1619_v56 = vmul.f32 %v2556_v44, %v2990_v42  ;;  %v1628_v21 = vadd.f32 %v1620_v14, %v1612_v63 }
 0x143   : > { %v3749_v33 = vmax.f32 %v3389_v16, %v3411_v31  ;;  %v2572_v46 = vunpack.i.h.bf16 %v2570_v1  ;;  %v2571_v3 = vunpack.i.l.bf16 %v2570_v1  ;;  %v2567_v35 = vunpack.i.h.bf16 %v2565_v52 }
 0x144   : > { %v1499_v53 = vadd.f32 %v1491_v36, %v1443_v49  ;;  %v3750_v26 = vmax.f32 %v3444_v28, %v3457_v57  ;;  %v1627_v4 = vadd.f32 %v1619_v56, %v1611_v18  ;;  %v2566_v19 = vunpack.i.l.bf16 %v2565_v52 }
 0x145   : > { %v1509_v54 = vmax.f32 %v3749_v33, %v1501_v29  ;;  %v1674_v20 = vmul.f32 %v2572_v46, %v3048_v27  ;;  %v1673_v42 = vmul.f32 %v2571_v3, %v3048_v27  ;;  %v1672_v63 = vmul.f32 %v2567_v35, %v3048_v27 }
 0x146   : > { %v1508_v62 = vmax.f32 %v3750_v26, %v1500_v17  ;;  %v2582_v51 = vunpack.i.h.bf16 %v2580_v59  ;;  %v3751_v16 = vmax.f32 %v3431_v47, %v3455_v37  ;;  %v1671_v49 = vmul.f32 %v2566_v19, %v3048_v27 }
 0x147   : > { %v2581_v61 = vunpack.i.l.bf16 %v2580_v59  ;;  %v2577_v45 = vunpack.i.h.bf16 %v2575_v6  ;;  %v1681_v28 = vadd.f32 %v1673_v42, %v1625_v13  ;;  %v1682_v57 = vadd.f32 %v1674_v20, %v1626_v5 }
 0x148   : > { %v1507_v31 = vmax.f32 %v3751_v16, %v1499_v53  ;;  %v1680_v18 = vadd.f32 %v1672_v63, %v1624_v30  ;;  %v1678_v38 = vmul.f32 %v2582_v51, %v3048_v27  ;;  %v1679_v15 = vadd.f32 %v1671_v49, %v1623_v48 }
 0x149   : > { %v1677_v55 = vmul.f32 %v2581_v61, %v3048_v27  ;;  %v1676_v47 = vmul.f32 %v2577_v45, %v3048_v27  ;;  %v2576_v37 = vunpack.i.l.bf16 %v2575_v6  ;;  %v1689_v1 = vmax.f32 %v3542_v12, %v1681_v28 }
 0x14a   : > { %v1690_v10 = vmax.f32 %v3535_v50, %v1682_v57  ;;  %v1688_v13 = vmax.f32 %v1504_v8, %v1680_v18  ;;  %v1686_v5 = vadd.f32 %v1678_v38, %v1630_v40  ;;  %v1687_v0 = vmax.f32 %v1503_v11, %v1679_v15 }
 0x14b   : > { %v1685_v58 = vadd.f32 %v1677_v55, %v1629_v41  ;;  %v1675_v60 = vmul.f32 %v2576_v37, %v3048_v27  ;;  %v1684_v52 = vadd.f32 %v1676_v47, %v1628_v21  ;;  %v1704_v24 = vadd.f32 %v1928_v7, %v1689_v1 }
 0x14c   : > { %v1705_v22 = vadd.f32 %v1928_v7, %v1690_v10  ;;  %v1703_v30 = vadd.f32 %v1928_v7, %v1688_v13  ;;  %v1694_v34 = vmax.f32 %v1510_v2, %v1686_v5  ;;  %v1702_v48 = vadd.f32 %v1928_v7, %v1687_v0 }
 0x14d   : > { %v1693_v32 = vmax.f32 %v1509_v54, %v1685_v58  ;;  %v1683_v25 = vadd.f32 %v1675_v60, %v1627_v4  ;;  %v1692_v39 = vmax.f32 %v1508_v62, %v1684_v52  ;;  %v1712_v9 = vmax.f32 %v1704_v24, 0.0 }
 0x14e   : > { %v1713_v12 = vmax.f32 %v1705_v22, 0.0  ;;  %v1711_v23 = vmax.f32 %v1703_v30, 0.0  ;;  %v1709_v50 = vadd.f32 %v1928_v7, %v1694_v34  ;;  %v1710_v8 = vmax.f32 %v1702_v48, 0.0 }
 0x14f   : > { %v1708_v27 = vadd.f32 %v1928_v7, %v1693_v32  ;;  %v1691_v11 = vmax.f32 %v1507_v31, %v1683_v25  ;;  %v1707_v14 = vadd.f32 %v1928_v7, %v1692_v39  ;;  %v1720_v44 = vpack.c.bf16 %v1712_v9, %v1712_v9 }
 0x150   : > { %v1721_v29 = vpack.c.bf16 %v1713_v12, %v1713_v12  ;;  %v1719_v43 = vpack.c.bf16 %v1711_v23, %v1711_v23  ;;  %v1717_v2 = vmax.f32 %v1709_v50, 0.0  ;;  %v1718_v41 = vpack.c.bf16 %v1710_v8, %v1710_v8 }
 0x151   : > { %v1716_v40 = vmax.f32 %v1708_v27, 0.0  ;;  %v1706_v36 = vadd.f32 %v1928_v7, %v1691_v11  ;;  %v1715_v17 = vmax.f32 %v1707_v14, 0.0  ;;  %1729 = vst.msk [vmem:[%s170_s16 + $0x8] sm:$0xf] %vm1726_vm0, %v1720_v44 }
 0x152   : > { %1730 = vst.msk [vmem:[%s170_s16 + $0xc] sm:$0xf] %vm1726_vm0, %v1721_v29  ;;  %1728 = vst.msk [vmem:[%s170_s16 + $0x4] sm:$0xf] %vm1726_vm0, %v1719_v43  ;;  %v1725_v56 = vpack.c.bf16 %v1717_v2, %v1717_v2 }
 0x153   : > { %1727 = vst.msk [vmem:[%s170_s16] sm:$0xf] %vm1726_vm0, %v1718_v41  ;;  %v1724_v21 = vpack.c.bf16 %v1716_v40, %v1716_v40  ;;  %v1714_v59 = vmax.f32 %v1706_v36, 0.0  ;;  %v1723_v33 = vpack.c.bf16 %v1715_v17, %v1715_v17 }
 0x154   : > { %1734 = vst.msk [vmem:[%s170_s16 + $0x1c] sm:$0xf] %vm1726_vm0, %v1725_v56 }
 0x155   : > { %1733 = vst.msk [vmem:[%s170_s16 + $0x18] sm:$0xf] %vm1726_vm0, %v1724_v21  ;;  %v1722_v54 = vpack.c.bf16 %v1714_v59, %v1714_v59  ;;  %1732 = vst.msk [vmem:[%s170_s16 + $0x14] sm:$0xf] %vm1726_vm0, %v1723_v33 }
 0x157   : > { %1731 = vst.msk [vmem:[%s170_s16 + $0x10] sm:$0xf] %vm1726_vm0, %v1722_v54 }
 0x158 PF: > { %s13_s12 = sadd.s32 1, %s2589_s12  }
 0x159   : > { %p10_p4 = scmp.ge.s32.totalorder %s13_s12, 4  }
 0x15b   :  { %12 = sbr.rel (!%p10_p4) target bundleno = 1 (0x1), region = 77 }

// kernel: convnet_forward.5
= control target key start
LH: loop header
LB: loop body
LE: loop exit
PB: predicated region body
PF: predicated region fallthrough
CT: control target
= control target key end

     0   :  { %v2518_v38 = vmov 1966171168   ;;  %v236_v40 = vlaneseq  ;;  %s3229_s0 = inlined_call_operand.vmem [shape: bf16[2,512], index: 0, kind: input, shape index: {}]   ;;  %s3230_s1 = inlined_call_operand.vmem [shape: bf16[512,600], index: 1, kind: input, shape index: {}]   ;;  %s3231_s2 = inlined_call_operand.vmem [shape: f32[1,600], index: 2, kind: input, shape index: {}]   ;;  %s3232_s3 = inlined_call_operand.vmem [shape: bf16[600,16], index: 3, kind: input, shape index: {}]   ;;  %s3233_s4 = inlined_call_operand.vmem [shape: f32[1,16], index: 4, kind: input, shape index: {}]   ;;  %s3234_s5 = inlined_call_operand.hbm [shape: f32[2,16], index: 5, kind: output, shape index: {}]  }
   0x1   :  { %v2232_v0 = vld [vmem:[%s3230_s1 + $0x4] ss:$20 sps:$4 sm:$0xff]   ;;  %v2234_v1 = vld [vmem:[%s3230_s1 + $0xc] ss:$20 sps:$4 sm:$0xff]   ;;  %v2237_v3 = vld [vmem:[%s3230_s1 + $0x8] ss:$20 sps:$4 sm:$0xff]   ;;  %v234_v39 = vunpack.c.l.s4 %v2518_v38 }
   0x2   :  { %1085 = vmatprep.subr.bf16.mxu0 %v2232_v0  ;;  %v2236_v2 = vld [vmem:[%s3230_s1] ss:$20 sps:$4 sm:$0xff]   ;;  %1167 = vmatprep.subr.bf16.mxu1 %v2234_v1  ;;  %v2242_v6 = vld [vmem:[%s3230_s1 + $0x28] ss:$20 sps:$4 sm:$0xff]   ;;  %v2243_v7 = vld [vmem:[%s3230_s1 + $0x30] ss:$20 sps:$4 sm:$0xff]  }
   0x3   :  { %v2238_v4 = vld [vmem:[%s3230_s1 + $0x2c] ss:$20 sps:$4 sm:$0xff]   ;;  %1086 = vmatpush1.bf16.msra.mxu0 %v2236_v2  ;;  %1168 = vmatpush1.bf16.msra.mxu1 %v2237_v3  ;;  %v2240_v5 = vld [vmem:[%s3230_s1 + $0x34] ss:$20 sps:$4 sm:$0xff]   ;;  %v2246_v9 = vld [vmem:[%s3230_s1 + $0x5c] ss:$20 sps:$4 sm:$0xff]   ;;  %v235_v45 = vunpack.c.0.s8 %v234_v39 }
   0x4   :  { %1087 = vmatprep.subr.bf16.mxu0 %v2238_v4  ;;  %1169 = vmatprep.subr.bf16.mxu1 %v2240_v5  ;;  %v2244_v8 = vld [vmem:[%s3230_s1 + $0x54] ss:$20 sps:$4 sm:$0xff]   ;;  %v2248_v10 = vld [vmem:[%s3230_s1 + $0x50] ss:$20 sps:$4 sm:$0xff]   ;;  %v2249_v11 = vld [vmem:[%s3230_s1 + $0x58] ss:$20 sps:$4 sm:$0xff]  }
   0x5   :  { %v2250_v12 = vld [vmem:[%s3230_s1 + $0x7c] ss:$20 sps:$4 sm:$0xff]   ;;  %v2252_v13 = vld [vmem:[%s3230_s1 + $0x84] ss:$20 sps:$4 sm:$0xff]   ;;  %v2255_v15 = vld [vmem:[%s3230_s1 + $0x80] ss:$20 sps:$4 sm:$0xff]  }
   0x6   :  { %v2254_v14 = vld [vmem:[%s3230_s1 + $0x78] ss:$20 sps:$4 sm:$0xff]   ;;  %v2260_v18 = vld [vmem:[%s3230_s1 + $0xa0] ss:$20 sps:$4 sm:$0xff]   ;;  %v2261_v19 = vld [vmem:[%s3230_s1 + $0xa8] ss:$20 sps:$4 sm:$0xff]  }
   0x7   :  { %1088 = vmatpush1.bf16.msra.mxu0 %v2242_v6  ;;  %1170 = vmatpush1.bf16.msra.mxu1 %v2243_v7  ;;  %v2256_v16 = vld [vmem:[%s3230_s1 + $0xa4] ss:$20 sps:$4 sm:$0xff]   ;;  %v2258_v17 = vld [vmem:[%s3230_s1 + $0xac] ss:$20 sps:$4 sm:$0xff]   ;;  %v2264_v21 = vld [vmem:[%s3230_s1 + $0xd4] ss:$20 sps:$4 sm:$0xff]  }
   0x8   :  { %1089 = vmatprep.subr.bf16.mxu0 %v2244_v8  ;;  %1171 = vmatprep.subr.bf16.mxu1 %v2246_v9  ;;  %v2262_v20 = vld [vmem:[%s3230_s1 + $0xcc] ss:$20 sps:$4 sm:$0xff]   ;;  %v2266_v22 = vld [vmem:[%s3230_s1 + $0xc8] ss:$20 sps:$4 sm:$0xff]   ;;  %v2267_v23 = vld [vmem:[%s3230_s1 + $0xd0] ss:$20 sps:$4 sm:$0xff]  }
   0x9   :  { %v2268_v24 = vld [vmem:[%s3230_s1 + $0xf4] ss:$20 sps:$4 sm:$0xff]   ;;  %v2270_v25 = vld [vmem:[%s3230_s1 + $0xfc] ss:$20 sps:$4 sm:$0xff]   ;;  %v2273_v27 = vld [vmem:[%s3230_s1 + $0xf8] ss:$20 sps:$4 sm:$0xff]  }
   0xa   :  { %v2272_v26 = vld [vmem:[%s3230_s1 + $0xf0] ss:$20 sps:$4 sm:$0xff]   ;;  %v2278_v30 = vld [vmem:[%s3230_s1 + $0x118] ss:$20 sps:$4 sm:$0xff]   ;;  %v2279_v31 = vld [vmem:[%s3230_s1 + $0x120] ss:$20 sps:$4 sm:$0xff]  }
   0xb   :  { %1090 = vmatpush1.bf16.msra.mxu0 %v2248_v10  ;;  %1172 = vmatpush1.bf16.msra.mxu1 %v2249_v11  ;;  %v2274_v28 = vld [vmem:[%s3230_s1 + $0x11c] ss:$20 sps:$4 sm:$0xff]   ;;  %v2276_v29 = vld [vmem:[%s3230_s1 + $0x124] ss:$20 sps:$4 sm:$0xff]   ;;  %v2282_v33 = vld [vmem:[%s3230_s1 + $0x14c] ss:$20 sps:$4 sm:$0xff]  }
   0xc   :  { %1091 = vmatprep.subr.bf16.mxu0 %v2250_v12  ;;  %1173 = vmatprep.subr.bf16.mxu1 %v2252_v13  ;;  %v2280_v32 = vld [vmem:[%s3230_s1 + $0x144] ss:$20 sps:$4 sm:$0xff]   ;;  %v2284_v34 = vld [vmem:[%s3230_s1 + $0x140] ss:$20 sps:$4 sm:$0xff]   ;;  %v2285_v35 = vld [vmem:[%s3230_s1 + $0x148] ss:$20 sps:$4 sm:$0xff]  }
   0xd   :  { %v2286_v36 = vld [vmem:[%s3230_s1 + $0x16c] ss:$20 sps:$4 sm:$0xff]   ;;  %v2288_v37 = vld [vmem:[%s3230_s1 + $0x174] ss:$20 sps:$4 sm:$0xff]   ;;  %v2291_v42 = vld [vmem:[%s3230_s1 + $0x170] ss:$20 sps:$4 sm:$0xff]  }
   0xe   :  { %v2290_v41 = vld [vmem:[%s3230_s1 + $0x168] ss:$20 sps:$4 sm:$0xff]   ;;  %v2679_v46 = vshrl.u32 %v236_v40, 7  ;;  %v2296_v47 = vld [vmem:[%s3230_s1 + $0x190] ss:$20 sps:$4 sm:$0xff]  }
   0xf   :  { %1092 = vmatpush1.bf16.msra.mxu0 %v2254_v14  ;;  %1174 = vmatpush1.bf16.msra.mxu1 %v2255_v15  ;;  %v2292_v43 = vld [vmem:[%s3230_s1 + $0x194] ss:$20 sps:$4 sm:$0xff]   ;;  %v2294_v44 = vld [vmem:[%s3230_s1 + $0x19c] ss:$20 sps:$4 sm:$0xff]   ;;  %v2297_v48 = vld [vmem:[%s3230_s1 + $0x198] ss:$20 sps:$4 sm:$0xff]  }
  0x10   :  { %1093 = vmatprep.subr.bf16.mxu0 %v2256_v16  ;;  %1175 = vmatprep.subr.bf16.mxu1 %v2258_v17  ;;  %v2298_v49 = vld [vmem:[%s3230_s1 + $0x1bc] ss:$20 sps:$4 sm:$0xff]   ;;  %v2300_v50 = vld [vmem:[%s3230_s1 + $0x1c4] ss:$20 sps:$4 sm:$0xff]   ;;  %v238_v51 = vsub.s32 %v235_v45, %v2679_v46  ;;  %v2303_v54 = vld [vmem:[%s3230_s1 + $0x1c0] ss:$20 sps:$4 sm:$0xff]  }
  0x11   :  { %v1907_v52 = vld.sshfl [vmem:[%s3229_s0] sm:$0x33 pattern:$0x75316420]  ;;  %v2302_v53 = vld [vmem:[%s3230_s1 + $0x1b8] ss:$20 sps:$4 sm:$0xff]  }
  0x12   :  { %v232_v55 = vcombine.high %v1907_v52, %v1907_v52  ;;  %v2304_v56 = vld [vmem:[%s3230_s1 + $0x1e4] ss:$20 sps:$4 sm:$0xff]   ;;  %v2306_v57 = vld [vmem:[%s3230_s1 + $0x1ec] ss:$20 sps:$4 sm:$0xff]   ;;  %v2309_v60 = vld [vmem:[%s3230_s1 + $0x1e8] ss:$20 sps:$4 sm:$0xff]   ;;  %v2764_v12 = vrot.slane %v1907_v52, %v238_v51 }
  0x13   :  { %1094 = vmatpush1.bf16.msra.mxu0 %v2260_v18  ;;  %1176 = vmatpush1.bf16.msra.mxu1 %v2261_v19  ;;  %v2308_v59 = vld [vmem:[%s3230_s1 + $0x1e0] ss:$20 sps:$4 sm:$0xff]   ;;  %v2314_v63 = vld [vmem:[%s3230_s1 + $0x208] ss:$20 sps:$4 sm:$0xff]   ;;  %v2315_v0 = vld [vmem:[%s3230_s1 + $0x210] ss:$20 sps:$4 sm:$0xff]  }
  0x14   :  { %1095 = vmatprep.subr.bf16.mxu0 %v2262_v20  ;;  %1177 = vmatprep.subr.bf16.mxu1 %v2264_v21  ;;  %v2709_v58 = vrot.slane %v232_v55, %v238_v51  ;;  %v2310_v61 = vld [vmem:[%s3230_s1 + $0x20c] ss:$20 sps:$4 sm:$0xff]   ;;  %v2312_v62 = vld [vmem:[%s3230_s1 + $0x214] ss:$20 sps:$4 sm:$0xff]   ;;  %v2318_v2 = vld [vmem:[%s3230_s1 + $0x23c] ss:$20 sps:$4 sm:$0xff]  }
  0x15   :  { %v2316_v1 = vld [vmem:[%s3230_s1 + $0x234] ss:$20 sps:$4 sm:$0xff]   ;;  %v2320_v3 = vld [vmem:[%s3230_s1 + $0x230] ss:$20 sps:$4 sm:$0xff]   ;;  %v2321_v4 = vld [vmem:[%s3230_s1 + $0x238] ss:$20 sps:$4 sm:$0xff]  }
  0x16   :  { %1117 = vmatprep.mubr.bf16.mxu0 %v2709_v58  ;;  %1199 = vmatprep.mubr.bf16.mxu1 %v2709_v58  ;;  %v2322_v5 = vld [vmem:[%s3230_s1 + $0x25c] ss:$20 sps:$4 sm:$0xff]   ;;  %v2324_v6 = vld [vmem:[%s3230_s1 + $0x264] ss:$20 sps:$4 sm:$0xff]   ;;  %v2327_v8 = vld [vmem:[%s3230_s1 + $0x260] ss:$20 sps:$4 sm:$0xff]   ;;  %v2777_v16 = vcombine.high %v2709_v58, %v2709_v58 }
  0x17   :  { %1096 = vmatpush1.bf16.msra.mxu0 %v2266_v22  ;;  %1178 = vmatpush1.bf16.msra.mxu1 %v2267_v23  ;;  %v2326_v7 = vld [vmem:[%s3230_s1 + $0x258] ss:$20 sps:$4 sm:$0xff]   ;;  %v2328_v11 = vld [vmem:[%s3230_s1 + $0x280] ss:$20 sps:$4 sm:$0xff]   ;;  %v2331_v13 = vld [vmem:[%s3230_s1 + $0x288] ss:$20 sps:$4 sm:$0xff]  }
  0x18   :  { %1097 = vmatprep.subr.bf16.mxu0 %v2268_v24  ;;  %1179 = vmatprep.subr.bf16.mxu1 %v2270_v25  ;;  %v2330_v9 = vld [vmem:[%s3230_s1 + $0x284] ss:$20 sps:$4 sm:$0xff]   ;;  %v2333_v10 = vld [vmem:[%s3230_s1 + $0x28c] ss:$20 sps:$4 sm:$0xff]   ;;  %v2339_v15 = vld [vmem:[%s3230_s1 + $0x2b4] ss:$20 sps:$4 sm:$0xff]  }
  0x19   :  { %v2336_v14 = vld [vmem:[%s3230_s1 + $0x2ac] ss:$20 sps:$4 sm:$0xff]   ;;  %v2334_v17 = vld [vmem:[%s3230_s1 + $0x2a8] ss:$20 sps:$4 sm:$0xff]   ;;  %v2337_v18 = vld [vmem:[%s3230_s1 + $0x2b0] ss:$20 sps:$4 sm:$0xff]  }
  0x1a   :  { %v2342_v19 = vld [vmem:[%s3230_s1 + $0x2d4] ss:$20 sps:$4 sm:$0xff]   ;;  %v2345_v20 = vld [vmem:[%s3230_s1 + $0x2dc] ss:$20 sps:$4 sm:$0xff]   ;;  %v2343_v22 = vld [vmem:[%s3230_s1 + $0x2d8] ss:$20 sps:$4 sm:$0xff]  }
  0x1b   :  { %1098 = vmatpush1.bf16.msra.mxu0 %v2272_v26  ;;  %1180 = vmatpush1.bf16.msra.mxu1 %v2273_v27  ;;  %v2340_v21 = vld [vmem:[%s3230_s1 + $0x2d0] ss:$20 sps:$4 sm:$0xff]   ;;  %v2346_v25 = vld [vmem:[%s3230_s1 + $0x2f8] ss:$20 sps:$4 sm:$0xff]   ;;  %v2349_v26 = vld [vmem:[%s3230_s1 + $0x300] ss:$20 sps:$4 sm:$0xff]  }
  0x1c   :  { %1099 = vmatprep.subr.bf16.mxu0 %v2274_v28  ;;  %1181 = vmatprep.subr.bf16.mxu1 %v2276_v29  ;;  %v2348_v23 = vld [vmem:[%s3230_s1 + $0x2fc] ss:$20 sps:$4 sm:$0xff]   ;;  %v2351_v24 = vld [vmem:[%s3230_s1 + $0x304] ss:$20 sps:$4 sm:$0xff]   ;;  %v2357_v28 = vld [vmem:[%s3230_s1 + $0x32c] ss:$20 sps:$4 sm:$0xff]  }
  0x1d   :  { %v2354_v27 = vld [vmem:[%s3230_s1 + $0x324] ss:$20 sps:$4 sm:$0xff]   ;;  %v2352_v29 = vld [vmem:[%s3230_s1 + $0x320] ss:$20 sps:$4 sm:$0xff]   ;;  %v2372_v39 = vld [vmem:[%s3230_s1 + $0x39c] ss:$20 sps:$4 sm:$0xff]  }
  0x1e   :  { %v2367_v38 = vld [vmem:[%s3230_s1 + $0x378] ss:$20 sps:$4 sm:$0xff]   ;;  %v2376_v45 = vld [vmem:[%s3230_s1 + $0x3c0] ss:$20 sps:$4 sm:$0xff]   ;;  %v2385_v51 = vld [vmem:[%s3230_s1 + $0x3f0] ss:$20 sps:$4 sm:$0xff]  }
  0x1f   :  { %1100 = vmatpush1.bf16.msra.mxu0 %v2278_v30  ;;  %1182 = vmatpush1.bf16.msra.mxu1 %v2279_v31  ;;  %v2355_v30 = vld [vmem:[%s3230_s1 + $0x328] ss:$20 sps:$4 sm:$0xff]   ;;  %v2360_v31 = vld [vmem:[%s3230_s1 + $0x34c] ss:$20 sps:$4 sm:$0xff]   ;;  %v2375_v40 = vld [vmem:[%s3230_s1 + $0x3a4] ss:$20 sps:$4 sm:$0xff]  }
  0x20   :  { %1101 = vmatprep.subr.bf16.mxu0 %v2280_v32  ;;  %1183 = vmatprep.subr.bf16.mxu1 %v2282_v33  ;;  %v2363_v32 = vld [vmem:[%s3230_s1 + $0x354] ss:$20 sps:$4 sm:$0xff]   ;;  %v2391_v55 = vld [vmem:[%s3230_s1 + $0x418] ss:$20 sps:$4 sm:$0xff]  }
  0x21   :  { %v2358_v33 = vld [vmem:[%s3230_s1 + $0x348] ss:$20 sps:$4 sm:$0xff]  }
  0x22   :  { %v2390_v52 = vld [vmem:[%s3230_s1 + $0x414] ss:$20 sps:$4 sm:$0xff]  }
  0x23   :  { %1102 = vmatpush1.bf16.msra.mxu0 %v2284_v34  ;;  %1184 = vmatpush1.bf16.msra.mxu1 %v2285_v35  ;;  %v2361_v34 = vld [vmem:[%s3230_s1 + $0x350] ss:$20 sps:$4 sm:$0xff]   ;;  %v2366_v35 = vld [vmem:[%s3230_s1 + $0x374] ss:$20 sps:$4 sm:$0xff]  }
  0x24   :  { %1103 = vmatprep.subr.bf16.mxu0 %v2286_v36  ;;  %1185 = vmatprep.subr.bf16.mxu1 %v2288_v37  ;;  %v2369_v36 = vld [vmem:[%s3230_s1 + $0x37c] ss:$20 sps:$4 sm:$0xff]  }
  0x25   :  { %v2364_v37 = vld [vmem:[%s3230_s1 + $0x370] ss:$20 sps:$4 sm:$0xff]  }
  0x27   :  { %1104 = vmatpush1.bf16.msra.mxu0 %v2290_v41  ;;  %1186 = vmatpush1.bf16.msra.mxu1 %v2291_v42  ;;  %v2370_v41 = vld [vmem:[%s3230_s1 + $0x398] ss:$20 sps:$4 sm:$0xff]   ;;  %v2373_v42 = vld [vmem:[%s3230_s1 + $0x3a0] ss:$20 sps:$4 sm:$0xff]  }
  0x28   :  { %1105 = vmatprep.subr.bf16.mxu0 %v2292_v43  ;;  %1187 = vmatprep.subr.bf16.mxu1 %v2294_v44  ;;  %v2378_v43 = vld [vmem:[%s3230_s1 + $0x3c4] ss:$20 sps:$4 sm:$0xff]   ;;  %v2381_v44 = vld [vmem:[%s3230_s1 + $0x3cc] ss:$20 sps:$4 sm:$0xff]  }
  0x2b   :  { %1106 = vmatpush1.bf16.msra.mxu0 %v2296_v47  ;;  %1188 = vmatpush1.bf16.msra.mxu1 %v2297_v48  ;;  %v2379_v47 = vld [vmem:[%s3230_s1 + $0x3c8] ss:$20 sps:$4 sm:$0xff]   ;;  %v2384_v48 = vld [vmem:[%s3230_s1 + $0x3ec] ss:$20 sps:$4 sm:$0xff]  }
  0x2c   :  { %1107 = vmatprep.subr.bf16.mxu0 %v2298_v49  ;;  %1189 = vmatprep.subr.bf16.mxu1 %v2300_v50  ;;  %v2387_v49 = vld [vmem:[%s3230_s1 + $0x3f4] ss:$20 sps:$4 sm:$0xff]  }
  0x2d   :  { %v2382_v50 = vld [vmem:[%s3230_s1 + $0x3e8] ss:$20 sps:$4 sm:$0xff]  }
  0x2f   :  { %1108 = vmatpush1.bf16.msra.mxu0 %v2302_v53  ;;  %1190 = vmatpush1.bf16.msra.mxu1 %v2303_v54  ;;  %v2393_v53 = vld [vmem:[%s3230_s1 + $0x41c] ss:$20 sps:$4 sm:$0xff]  }
  0x30   :  { %1109 = vmatprep.subr.bf16.mxu0 %v2304_v56  ;;  %1191 = vmatprep.subr.bf16.mxu1 %v2306_v57  ;;  %v2388_v54 = vld [vmem:[%s3230_s1 + $0x410] ss:$20 sps:$4 sm:$0xff]  }
  0x31   :  { %v2396_v56 = vld [vmem:[%s3230_s1 + $0x43c] ss:$20 sps:$4 sm:$0xff]   ;;  %v2399_v57 = vld [vmem:[%s3230_s1 + $0x444] ss:$20 sps:$4 sm:$0xff]  }
  0x33   :  { %1110 = vmatpush1.bf16.msra.mxu0 %v2308_v59  ;;  %1192 = vmatpush1.bf16.msra.mxu1 %v2309_v60  ;;  %v2394_v59 = vld [vmem:[%s3230_s1 + $0x438] ss:$20 sps:$4 sm:$0xff]   ;;  %v2397_v60 = vld [vmem:[%s3230_s1 + $0x440] ss:$20 sps:$4 sm:$0xff]  }
  0x34   :  { %1111 = vmatprep.subr.bf16.mxu0 %v2310_v61  ;;  %1193 = vmatprep.subr.bf16.mxu1 %v2312_v62  ;;  %v2402_v61 = vld [vmem:[%s3230_s1 + $0x464] ss:$20 sps:$4 sm:$0xff]   ;;  %v2405_v62 = vld [vmem:[%s3230_s1 + $0x46c] ss:$20 sps:$4 sm:$0xff]  }
  0x37   :  { %1112 = vmatpush1.bf16.msra.mxu0 %v2314_v63  ;;  %1194 = vmatpush1.bf16.msra.mxu1 %v2315_v0  ;;  %v2400_v63 = vld [vmem:[%s3230_s1 + $0x460] ss:$20 sps:$4 sm:$0xff]   ;;  %v2403_v0 = vld [vmem:[%s3230_s1 + $0x468] ss:$20 sps:$4 sm:$0xff]  }
  0x38   :  { %1113 = vmatprep.subr.bf16.mxu0 %v2316_v1  ;;  %1195 = vmatprep.subr.bf16.mxu1 %v2318_v2  ;;  %v2408_v1 = vld [vmem:[%s3230_s1 + $0x48c] ss:$20 sps:$4 sm:$0xff]   ;;  %v2411_v2 = vld [vmem:[%s3230_s1 + $0x494] ss:$20 sps:$4 sm:$0xff]  }
  0x3b   :  { %1114 = vmatpush1.bf16.msra.mxu0 %v2320_v3  ;;  %1196 = vmatpush1.bf16.msra.mxu1 %v2321_v4  ;;  %v2406_v3 = vld [vmem:[%s3230_s1 + $0x488] ss:$20 sps:$4 sm:$0xff]   ;;  %v2409_v4 = vld [vmem:[%s3230_s1 + $0x490] ss:$20 sps:$4 sm:$0xff]  }
  0x3c   :  { %1115 = vmatprep.subr.bf16.mxu0 %v2322_v5  ;;  %1197 = vmatprep.subr.bf16.mxu1 %v2324_v6  ;;  %v2414_v5 = vld [vmem:[%s3230_s1 + $0x4b4] ss:$20 sps:$4 sm:$0xff]   ;;  %v2417_v6 = vld [vmem:[%s3230_s1 + $0x4bc] ss:$20 sps:$4 sm:$0xff]  }
  0x3f   :  { %1116 = vmatpush1.bf16.msra.mxu0 %v2326_v7  ;;  %1198 = vmatpush1.bf16.msra.mxu1 %v2327_v8  ;;  %v2412_v7 = vld [vmem:[%s3230_s1 + $0x4b0] ss:$20 sps:$4 sm:$0xff]   ;;  %v2415_v8 = vld [vmem:[%s3230_s1 + $0x4b8] ss:$20 sps:$4 sm:$0xff]  }
  0x40   :  { %1126 = vmatprep.subr.bf16.mxu0 %v2330_v9  ;;  %1208 = vmatprep.subr.bf16.mxu1 %v2333_v10  ;;  %v2420_v9 = vld [vmem:[%s3230_s1 + $0x4dc] ss:$20 sps:$4 sm:$0xff]   ;;  %v2423_v10 = vld [vmem:[%s3230_s1 + $0x4e4] ss:$20 sps:$4 sm:$0xff]  }
  0x42   :  { %1118 = vmatmul.mubr.bf16.vlgmr.msra.gmra.mrb[0].mxu0 %v2764_v12  ;;  %1200 = vmatmul.mubr.bf16.vlgmr.msra.gmra.mrb[0].mxu1 %v2764_v12 }
  0x43   :  { %1127 = vmatpush1.bf16.msra.mxu0 %v2328_v11  ;;  %1209 = vmatpush1.bf16.msra.mxu1 %v2331_v13  ;;  %v2418_v11 = vld [vmem:[%s3230_s1 + $0x4d8] ss:$20 sps:$4 sm:$0xff]   ;;  %v2421_v13 = vld [vmem:[%s3230_s1 + $0x4e0] ss:$20 sps:$4 sm:$0xff]  }
  0x44   :  { %1128 = vmatprep.subr.bf16.mxu0 %v2336_v14  ;;  %1210 = vmatprep.subr.bf16.mxu1 %v2339_v15  ;;  %v2424_v14 = vld [vmem:[%s3230_s1 + $0x150] ss:$20 sps:$4 sm:$0xff]  }
  0x45   :  { %1158 = vmatprep.mubr.bf16.mxu0 %v2777_v16  ;;  %1240 = vmatprep.mubr.bf16.mxu1 %v2777_v16  ;;  %v2425_v15 = vld [vmem:[%s3230_s1 + $0x3d0] ss:$20 sps:$4 sm:$0xff]  }
  0x47   :  { %1129 = vmatpush1.bf16.msra.mxu0 %v2334_v17  ;;  %1211 = vmatpush1.bf16.msra.mxu1 %v2337_v18  ;;  %v2426_v17 = vld [vmem:[%s3230_s1 + $0x10] ss:$20 sps:$4 sm:$0xff]  }
  0x48   :  { %1130 = vmatprep.subr.bf16.mxu0 %v2342_v19  ;;  %1212 = vmatprep.subr.bf16.mxu1 %v2345_v20  ;;  %v2427_v18 = vld [vmem:[%s3230_s1 + $0x290] ss:$20 sps:$4 sm:$0xff]   ;;  %v2971_v19 = vcombine.high %v2764_v12, %v2764_v12  ;;  %v2428_v20 = vld [vmem:[%s3230_s1 + $0x178] ss:$20 sps:$4 sm:$0xff]  }
  0x4b   :  { %1131 = vmatpush1.bf16.msra.mxu0 %v2340_v21  ;;  %1213 = vmatpush1.bf16.msra.mxu1 %v2343_v22  ;;  %v2429_v21 = vld [vmem:[%s3230_s1 + $0x3f8] ss:$20 sps:$4 sm:$0xff]  }
  0x4c   :  { %1132 = vmatprep.subr.bf16.mxu0 %v2348_v23  ;;  %1214 = vmatprep.subr.bf16.mxu1 %v2351_v24  ;;  %v2430_v22 = vld [vmem:[%s3230_s1 + $0x38] ss:$20 sps:$4 sm:$0xff]   ;;  %v2432_v24 = vld [vmem:[%s3230_s1 + $0x1a0] ss:$20 sps:$4 sm:$0xff]  }
  0x4d   :  { %v2431_v23 = vld [vmem:[%s3230_s1 + $0x2b8] ss:$20 sps:$4 sm:$0xff]  }
  0x4f   :  { %1133 = vmatpush1.bf16.msra.mxu0 %v2346_v25  ;;  %1215 = vmatpush1.bf16.msra.mxu1 %v2349_v26  ;;  %v2433_v25 = vld [vmem:[%s3230_s1 + $0x420] ss:$20 sps:$4 sm:$0xff]  }
  0x50   :  { %1134 = vmatprep.subr.bf16.mxu0 %v2354_v27  ;;  %1216 = vmatprep.subr.bf16.mxu1 %v2357_v28  ;;  %v2434_v26 = vld [vmem:[%s3230_s1 + $0x60] ss:$20 sps:$4 sm:$0xff]   ;;  %v2436_v28 = vld [vmem:[%s3230_s1 + $0x1c8] ss:$20 sps:$4 sm:$0xff]  }
  0x51   :  { %v2435_v27 = vld [vmem:[%s3230_s1 + $0x2e0] ss:$20 sps:$4 sm:$0xff]  }
  0x53   :  { %1135 = vmatpush1.bf16.msra.mxu0 %v2352_v29  ;;  %1217 = vmatpush1.bf16.msra.mxu1 %v2355_v30  ;;  %v2437_v29 = vld [vmem:[%s3230_s1 + $0x448] ss:$20 sps:$4 sm:$0xff]  }
  0x54   :  { %1136 = vmatprep.subr.bf16.mxu0 %v2360_v31  ;;  %1218 = vmatprep.subr.bf16.mxu1 %v2363_v32  ;;  %v2438_v30 = vld [vmem:[%s3230_s1 + $0x88] ss:$20 sps:$4 sm:$0xff]   ;;  %v2441_v31 = vld [vmem:[%s3230_s1 + $0x470] ss:$20 sps:$4 sm:$0xff]  }
  0x55   :  { %v2442_v32 = vld [vmem:[%s3230_s1 + $0xb0] ss:$20 sps:$4 sm:$0xff]  }
  0x57   :  { %1137 = vmatpush1.bf16.msra.mxu0 %v2358_v33  ;;  %1219 = vmatpush1.bf16.msra.mxu1 %v2361_v34  ;;  %v2443_v33 = vld [vmem:[%s3230_s1 + $0x330] ss:$20 sps:$4 sm:$0xff]  }
  0x58   :  { %1138 = vmatprep.subr.bf16.mxu0 %v2366_v35  ;;  %1220 = vmatprep.subr.bf16.mxu1 %v2369_v36 }
  0x5b   :  { %1139 = vmatpush1.bf16.msra.mxu0 %v2364_v37  ;;  %1221 = vmatpush1.bf16.msra.mxu1 %v2367_v38 }
  0x5c   :  { %1140 = vmatprep.subr.bf16.mxu0 %v2372_v39  ;;  %1222 = vmatprep.subr.bf16.mxu1 %v2375_v40 }
  0x5f   :  { %1141 = vmatpush1.bf16.msra.mxu0 %v2370_v41  ;;  %1223 = vmatpush1.bf16.msra.mxu1 %v2373_v42 }
  0x60   :  { %1142 = vmatprep.subr.bf16.mxu0 %v2378_v43  ;;  %1224 = vmatprep.subr.bf16.mxu1 %v2381_v44 }
  0x63   :  { %1143 = vmatpush1.bf16.msra.mxu0 %v2376_v45  ;;  %1225 = vmatpush1.bf16.msra.mxu1 %v2379_v47 }
  0x64   :  { %1144 = vmatprep.subr.bf16.mxu0 %v2384_v48  ;;  %1226 = vmatprep.subr.bf16.mxu1 %v2387_v49 }
  0x67   :  { %1145 = vmatpush1.bf16.msra.mxu0 %v2382_v50  ;;  %1227 = vmatpush1.bf16.msra.mxu1 %v2385_v51 }
  0x68   :  { %1146 = vmatprep.subr.bf16.mxu0 %v2390_v52  ;;  %1228 = vmatprep.subr.bf16.mxu1 %v2393_v53 }
  0x6b   :  { %1147 = vmatpush1.bf16.msra.mxu0 %v2388_v54  ;;  %1229 = vmatpush1.bf16.msra.mxu1 %v2391_v55 }
  0x6c   :  { %1148 = vmatprep.subr.bf16.mxu0 %v2396_v56  ;;  %1230 = vmatprep.subr.bf16.mxu1 %v2399_v57 }
  0x6f   :  { %1149 = vmatpush1.bf16.msra.mxu0 %v2394_v59  ;;  %1231 = vmatpush1.bf16.msra.mxu1 %v2397_v60 }
  0x70   :  { %1150 = vmatprep.subr.bf16.mxu0 %v2402_v61  ;;  %1232 = vmatprep.subr.bf16.mxu1 %v2405_v62 }
  0x73   :  { %1151 = vmatpush1.bf16.msra.mxu0 %v2400_v63  ;;  %1233 = vmatpush1.bf16.msra.mxu1 %v2403_v0 }
  0x74   :  { %1152 = vmatprep.subr.bf16.mxu0 %v2408_v1  ;;  %1234 = vmatprep.subr.bf16.mxu1 %v2411_v2 }
  0x77   :  { %1153 = vmatpush1.bf16.msra.mxu0 %v2406_v3  ;;  %1235 = vmatpush1.bf16.msra.mxu1 %v2409_v4 }
  0x78   :  { %1154 = vmatprep.subr.bf16.mxu0 %v2414_v5  ;;  %1236 = vmatprep.subr.bf16.mxu1 %v2417_v6 }
  0x7b   :  { %1155 = vmatpush1.bf16.msra.mxu0 %v2412_v7  ;;  %1237 = vmatpush1.bf16.msra.mxu1 %v2415_v8 }
  0x7c   :  { %1156 = vmatprep.subr.bf16.mxu0 %v2420_v9  ;;  %1238 = vmatprep.subr.bf16.mxu1 %v2423_v10 }
  0x7f   :  { %1157 = vmatpush1.bf16.msra.mxu0 %v2418_v11  ;;  %1239 = vmatpush1.bf16.msra.mxu1 %v2421_v13 }
  0x80   :  { %2108 = vmatprep.subr.bf16.mxu0 %v2424_v14  ;;  %2130 = vmatprep.subr.bf16.mxu1 %v2425_v15 }
  0x82   :  { %1159 = vmatmul.mubr.bf16.vlgmr.msra.gmra.mrb[0].mxu0 %v2971_v19  ;;  %1241 = vmatmul.mubr.bf16.vlgmr.msra.gmra.mrb[0].mxu1 %v2971_v19 }
  0x83   :  { %2109 = vmatpush3.bf16.msra.mxu0 %v2426_v17  ;;  %2131 = vmatpush3.bf16.msra.mxu1 %v2427_v18 }
  0x84   :  { %2110 = vmatprep.subr.bf16.mxu0 %v2428_v20  ;;  %2132 = vmatprep.subr.bf16.mxu1 %v2429_v21 }
  0x85   :  { %1281 = vmatprep.mubr.bf16.mxu0 %v2709_v58  ;;  %1321 = vmatprep.mubr.bf16.mxu1 %v2777_v16  ;;  %v2439_v58 = vld [vmem:[%s3230_s1 + $0x308] ss:$20 sps:$4 sm:$0xff]   ;;  %v2440_v16 = vld [vmem:[%s3230_s1 + $0x1f0] ss:$20 sps:$4 sm:$0xff]  }
  0x87   :  { %2111 = vmatpush3.bf16.msra.mxu0 %v2430_v22  ;;  %2133 = vmatpush3.bf16.msra.mxu1 %v2431_v23 }
  0x88   :  { %2112 = vmatprep.subr.bf16.mxu0 %v2432_v24  ;;  %2134 = vmatprep.subr.bf16.mxu1 %v2433_v25 }
  0x8b   :  { %2113 = vmatpush3.bf16.msra.mxu0 %v2434_v26  ;;  %2135 = vmatpush3.bf16.msra.mxu1 %v2435_v27 }
  0x8c   :  { %2114 = vmatprep.subr.bf16.mxu0 %v2436_v28  ;;  %2136 = vmatprep.subr.bf16.mxu1 %v2437_v29 }
  0x8f   :  { %2115 = vmatpush3.bf16.msra.mxu0 %v2438_v30  ;;  %2137 = vmatpush3.bf16.msra.mxu1 %v2439_v58 }
  0x90   :  { %10 = vsyncpa [#allocation4], 0  ;;  %2116 = vmatprep.subr.bf16.mxu0 %v2440_v16  ;;  %2138 = vmatprep.subr.bf16.mxu1 %v2441_v31  ;;  %v2444_v34 = vld [vmem:[%s3230_s1 + $0x218] ss:$20 sps:$4 sm:$0xff]   ;;  %v2448_v38 = vld [vmem:[%s3230_s1 + $0x240] ss:$20 sps:$4 sm:$0xff]  }
  0x91   :  { %v2445_v35 = vld [vmem:[%s3230_s1 + $0x498] ss:$20 sps:$4 sm:$0xff]   ;;  %v2449_v39 = vld [vmem:[%s3230_s1 + $0x4c0] ss:$20 sps:$4 sm:$0xff]   ;;  %v2452_v42 = vld [vmem:[%s3230_s1 + $0x268] ss:$20 sps:$4 sm:$0xff]  }
  0x92   :  { %v2446_v36 = vld [vmem:[%s3230_s1 + $0xd8] ss:$20 sps:$4 sm:$0xff]   ;;  %v2450_v40 = vld [vmem:[%s3230_s1 + $0x100] ss:$20 sps:$4 sm:$0xff]   ;;  %v2453_v43 = vld [vmem:[%s3230_s1 + $0x4e8] ss:$20 sps:$4 sm:$0xff]  }
  0x93   :  { %2117 = vmatpush3.bf16.msra.mxu0 %v2442_v32  ;;  %2139 = vmatpush3.bf16.msra.mxu1 %v2443_v33  ;;  %v2447_v37 = vld [vmem:[%s3230_s1 + $0x358] ss:$20 sps:$4 sm:$0xff]   ;;  %v2451_v41 = vld [vmem:[%s3230_s1 + $0x380] ss:$20 sps:$4 sm:$0xff]   ;;  %v2454_v44 = vld [vmem:[%s3230_s1 + $0x128] ss:$20 sps:$4 sm:$0xff]  }
  0x94   :  { %2118 = vmatprep.subr.bf16.mxu0 %v2444_v34  ;;  %2140 = vmatprep.subr.bf16.mxu1 %v2445_v35  ;;  %v2455_v45 = vld [vmem:[%s3230_s1 + $0x3a8] ss:$20 sps:$4 sm:$0xff]   ;;  %v2456_v47 = vld [vmem:[%s3232_s3 + $0x40] sm:$0xff]   ;;  %v2465_v55 = vld [vmem:[%s3232_s3 + $0x10] sm:$0xff]   ;;  %v2519_v17 = vmov 0.0   ;;  %vm27_vm0 = vcmask 713728  }
  0x95   :  { %v2458_v48 = vld [vmem:[%s3232_s3 + $0xc0] sm:$0xff]   ;;  %v2460_v51 = vld [vmem:[%s3232_s3 + $0x48] sm:$0xff]   ;;  %v2466_v56 = vld [vmem:[%s3232_s3 + $0xd0] sm:$0xff]   ;;  %28 = vst.msk [vmem:[#allocation2 + $0x8] sm:$0x3] %vm27_vm0, %v2519_v17  ;;  %v1374_v18 = vsub.s32 0, %v2679_v46 }
  0x96   :  { %v2457_v49 = vld [vmem:[%s3232_s3] sm:$0xff]   ;;  %v2461_v52 = vld [vmem:[%s3232_s3 + $0x8] sm:$0xff]   ;;  %v2467_v57 = vld [vmem:[%s3232_s3 + $0x90] sm:$0xff]   ;;  %v1382_v20 = vsub.s32 2, %v2679_v46  ;;  %v1386_v21 = vsub.s32 3, %v2679_v46  ;;  %vm2521_vm1 = vmmov 0  }
  0x97   :  { %2119 = vmatpush3.bf16.msra.mxu0 %v2446_v36  ;;  %2141 = vmatpush3.bf16.msra.mxu1 %v2447_v37  ;;  %v2459_v50 = vld [vmem:[%s3232_s3 + $0x80] sm:$0xff]   ;;  %v2462_v53 = vld [vmem:[%s3232_s3 + $0xc8] sm:$0xff]   ;;  %v2468_v59 = vld [vmem:[%s3232_s3 + $0x58] sm:$0xff]   ;;  %v2520_v23 = vmov 1983009808   ;;  %vm1767_vm2 = vcmask 1043456  }
  0x98   :  { %2120 = vmatprep.subr.bf16.mxu0 %v2448_v38  ;;  %2142 = vmatprep.subr.bf16.mxu1 %v2449_v39  ;;  %v2463_v54 = vld [vmem:[%s3232_s3 + $0x88] sm:$0xff]   ;;  %v2469_v60 = vld [vmem:[%s3232_s3 + $0x18] sm:$0xff]   ;;  %v2472_v63 = vld [vmem:[%s3232_s3 + $0x60] sm:$0xff]   ;;  %v1337_v24 = vunpack.c.l.s4 %v2520_v23  ;;  %vm1763_vm3 = vcmask 719872   ;;  %s2522_s28 = smov [#allocation3]   ;;  %vm1891_vm4 = vcmask 123904  }
  0x99   :  { %v2470_v61 = vld [vmem:[%s3232_s3 + $0xd8] sm:$0xff]   ;;  %v2473_v0 = vld [vmem:[%s3232_s3 + $0x20] sm:$0xff]   ;;  %v2476_v3 = vld [vmem:[%s3232_s3 + $0x68] sm:$0xff]   ;;  %s1899_s29 = sshll.u32 %s2522_s28, 4  ;;  %s1900_s29 = int_to_ptr.vmem [resolvable:$true] %s1899_s29 }
  0x9a   :  { %v2471_v62 = vld [vmem:[%s3232_s3 + $0x98] sm:$0xff]   ;;  %v2474_v1 = vld [vmem:[%s3232_s3 + $0xe0] sm:$0xff]   ;;  %v2477_v4 = vld [vmem:[%s3232_s3 + $0x28] sm:$0xff]   ;;  %v1338_v29 = vunpack.c.0.s8 %v1337_v24  ;;  %p2499_p1 = scmp.lt.s32.totalorder %s1900_s29, %s1900_s29 }
  0x9b   :  { %2121 = vmatpush3.bf16.msra.mxu0 %v2450_v40  ;;  %2143 = vmatpush3.bf16.msra.mxu1 %v2451_v41  ;;  %v2475_v2 = vld [vmem:[%s3232_s3 + $0xa0] sm:$0xff]   ;;  %v2478_v5 = vld [vmem:[%s3232_s3 + $0xe8] sm:$0xff]   ;;  %v2480_v7 = vld [vmem:[%s3232_s3 + $0x70] sm:$0xff]  }
  0x9c   :  { %2122 = vmatprep.subr.bf16.mxu0 %v2452_v42  ;;  %2144 = vmatprep.subr.bf16.mxu1 %v2453_v43  ;;  %v2479_v6 = vld [vmem:[%s3232_s3 + $0xa8] sm:$0xff]   ;;  %v2481_v8 = vld [vmem:[%s3232_s3 + $0x30] sm:$0xff]   ;;  %v2484_v11 = vld [vmem:[%s3232_s3 + $0x78] sm:$0xff]   ;;  %v3176_v32 = vsub.s32 %v1338_v29, %v2679_v46 }
  0x9d   :  { %v2482_v9 = vld [vmem:[%s3232_s3 + $0xf0] sm:$0xff]   ;;  %v2486_v13 = vld [vmem:[%s3232_s3 + $0xf8] sm:$0xff]   ;;  %v3169_v22 = vld [vmem:[%s3231_s2] sm:$0x1f] }
  0x9e   :  { %v2483_v10 = vld [vmem:[%s3232_s3 + $0xb0] sm:$0xff]   ;;  %v2485_v14 = vld [vmem:[%s3232_s3 + $0x38] sm:$0xff]   ;;  %v1375_v25 = vrot.slane %v3169_v22, %v1374_v18  ;;  %v1383_v27 = vrot.slane %v3169_v22, %v1382_v20  ;;  %v1387_v28 = vrot.slane %v3169_v22, %v1386_v21 }
  0x9f   :  { %2123 = vmatpush3.bf16.msra.mxu0 %v2454_v44  ;;  %2145 = vmatpush3.bf16.msra.mxu1 %v2455_v45  ;;  %v2487_v15 = vld [vmem:[%s3232_s3 + $0xb8] sm:$0xff]  }
  0xa0   :  { %2152 = vmatprep.subr.bf16.mxu0 %v2456_v47  ;;  %2174 = vmatprep.subr.bf16.mxu1 %v2458_v48  ;;  %v1393_v58 = vcombine.low %v1383_v27, %v1387_v28 }
  0xa2   :  { %1282 = vmatmul.mubr.bf16.vlgmr.msra.gmra.mrb[4].mxu0 %v2764_v12  ;;  %1322 = vmatmul.mubr.bf16.vlgmr.msra.gmra.mrb[4].mxu1 %v2971_v19  ;;  %v2464_v12 = vld [vmem:[%s3232_s3 + $0x50] sm:$0xff]   ;;  %v1378_v19 = vsub.s32 1, %v2679_v46  ;;  %v1407_v40 = vrot.slane %v1393_v58, %v3176_v32 }
  0xa3   :  { %2153 = vmatpush3.bf16.msra.mxu0 %v2457_v49  ;;  %2175 = vmatpush3.bf16.msra.mxu1 %v2459_v50 }
  0xa4   :  { %2154 = vmatprep.subr.bf16.mxu0 %v2460_v51  ;;  %2176 = vmatprep.subr.bf16.mxu1 %v2462_v53  ;;  %v1379_v26 = vrot.slane %v3169_v22, %v1378_v19 }
  0xa6   :  { %v1392_v30 = vcombine.low %v1375_v25, %v1379_v26 }
  0xa7   :  { %2155 = vmatpush3.bf16.msra.mxu0 %v2461_v52  ;;  %2177 = vmatpush3.bf16.msra.mxu1 %v2463_v54 }
  0xa8   :  { %2156 = vmatprep.subr.bf16.mxu0 %v2464_v12  ;;  %2178 = vmatprep.subr.bf16.mxu1 %v2466_v56  ;;  %v1400_v39 = vrot.slane %v1392_v30, %v3176_v32  ;;  %v2488_v12 = vld [vmem:[%s3232_s3 + $0x100] sm:$0xff]  }
  0xaa   :  { %v1408_v47 = vcombine.low %v1400_v39, %v1407_v40 }
  0xab   :  { %2157 = vmatpush3.bf16.msra.mxu0 %v2465_v55  ;;  %2179 = vmatpush3.bf16.msra.mxu1 %v2467_v57 }
  0xac   :  { %2158 = vmatprep.subr.bf16.mxu0 %v2468_v59  ;;  %2180 = vmatprep.subr.bf16.mxu1 %v2470_v61  ;;  %v2489_v59 = vld [vmem:[%s3232_s3 + $0x108] sm:$0xff]   ;;  %v2491_v61 = vld [vmem:[%s3232_s3 + $0x118] sm:$0xff]  }
  0xaf   :  { %2159 = vmatpush3.bf16.msra.mxu0 %v2469_v60  ;;  %2181 = vmatpush3.bf16.msra.mxu1 %v2471_v62  ;;  %v2490_v60 = vld [vmem:[%s3232_s3 + $0x110] sm:$0xff]  }
  0xb0   :  { %2160 = vmatprep.subr.bf16.mxu0 %v2472_v63  ;;  %2182 = vmatprep.subr.bf16.mxu1 %v2474_v1 }
  0xb3   :  { %2161 = vmatpush3.bf16.msra.mxu0 %v2473_v0  ;;  %2183 = vmatpush3.bf16.msra.mxu1 %v2475_v2  ;;  %v2492_v0 = vld [vmem:[%s3232_s3 + $0x120] sm:$0xff]  }
  0xb4   :  { %2162 = vmatprep.subr.bf16.mxu0 %v2476_v3  ;;  %2184 = vmatprep.subr.bf16.mxu1 %v2478_v5  ;;  %v2493_v3 = vld [vmem:[%s3232_s3 + $0x128] ss:$0 sps:$4 sm:$0xff]  }
  0xb7   :  { %2163 = vmatpush3.bf16.msra.mxu0 %v2477_v4  ;;  %2185 = vmatpush3.bf16.msra.mxu1 %v2479_v6 }
  0xb8   :  { %2164 = vmatprep.subr.bf16.mxu0 %v2480_v7  ;;  %2186 = vmatprep.subr.bf16.mxu1 %v2482_v9 }
  0xbb   :  { %2165 = vmatpush3.bf16.msra.mxu0 %v2481_v8  ;;  %2187 = vmatpush3.bf16.msra.mxu1 %v2483_v10 }
  0xbc   :  { %2166 = vmatprep.subr.bf16.mxu0 %v2484_v11  ;;  %2188 = vmatprep.subr.bf16.mxu1 %v2486_v13  ;;  %v30_v11 = vld [vmem:[#allocation2 + $0x8] sm:$0x3]  ;;  %v1769_v13 = vsel %vm1767_vm2, %v2493_v3, 0 }
  0xbf   :  { %2167 = vmatpush3.bf16.msra.mxu0 %v2485_v14  ;;  %2189 = vmatpush3.bf16.msra.mxu1 %v2487_v15  ;;  %v1390_v15 = vsub.s32 4, %v2679_v46  ;;  %v2068_v46 = vld [vmem:[%s3233_s4] ss:$0 sm:$0xff]  ;;  %s2494_s4 = scalar_lea.vmem %s1900_s29, 32 }
  0xc0   :  { %2203 = vmatprep.subr.bf16.mxu0 %v2519_v17  ;;  %p2495_p0 = scmp.ne.s32.totalorder %s1900_s29, %s2494_s4  ;;  %p2500_p2 = scmp.lt.s32.totalorder %s2494_s4, %s2494_s4 }
  0xc1   :  { %v1391_v19 = vrot.slane %v3169_v22, %v1390_v15 }
  0xc2   :  { %p2501_p3 = por %p2500_p2, %p2499_p1 }
  0xc3   :  { %v1415_v20 = vrot.slane %v1391_v19, %v3176_v32 }
  0xc4   :  { %p2502_p4 = pnand %p2501_p3, %p2495_p0 }
 0x155   :  { %v1160_v16 = vpop.f32.mrb[0].mxu0  ;;  %v1242_v31 = vpop.f32.mrb[0].mxu1 }
 0x156   :  { %v1162_v33 = vpop.f32.mrb[1].mxu0  ;;  %v1244_v34 = vpop.f32.mrb[1].mxu1 }
 0x157   :  { %v1334_v35 = vcombine.low %v1160_v16, %v1162_v33  ;;  %v1335_v36 = vcombine.low %v1242_v31, %v1244_v34  ;;  %v1164_v37 = vpop.f32.mrb[2].mxu0  ;;  %v1246_v38 = vpop.f32.mrb[2].mxu1 }
 0x158   :  { %v1165_v41 = vpop.f32.mrb[3].mxu0  ;;  %v1247_v42 = vpop.f32.mrb[3].mxu1 }
 0x159   :  { %v1342_v43 = vrot.slane %v1334_v35, %v3176_v32  ;;  %v1349_v44 = vrot.slane %v1335_v36, %v3176_v32 }
 0x15b   :  { %v1350_v45 = vcombine.low %v1342_v43, %v1349_v44 }
 0x15d   :  { %v1418_v48 = vadd.f32 %v1408_v47, %v1350_v45 }
 0x15f   :  { %v1429_v49 = vrot.slane %v1418_v48, %v3176_v32  ;;  %v1422_v50 = vcombine.high %v1418_v48, %v1418_v48 }
 0x161   :  { %v1437_v51 = vcombine.high %v1429_v49, %v1429_v49  ;;  %v1436_v52 = vrot.slane %v1422_v50, %v3176_v32  ;;  %v1451_v55 = vpack.c.bf16 %v1429_v49, %v1429_v49 }
 0x163   :  { %v1452_v53 = vpack.c.bf16 %v1437_v51, %v1437_v51  ;;  %v1438_v54 = vcombine.high %v1436_v52, %v1436_v52  ;;  %v1453_v57 = vpack.c.bf16 %v1436_v52, %v1436_v52 }
 0x165   :  { %1803 = vmatprep.mubr.bf16.mxu0 %v1452_v53  ;;  %v1454_v56 = vpack.c.bf16 %v1438_v54, %v1438_v54 }
 0x166   :  { %1804 = vmatmul.mubr.bf16.vlgmr.msra.gmra.mrb[8].mxu0 %v1451_v55 }
 0x167   :  { %1843 = vmatprep.mubr.bf16.mxu1 %v1454_v56  ;;  %2204 = vmatpush3.bf16.msra.mxu0 %v2488_v12 }
 0x168   :  { %1844 = vmatmul.mubr.bf16.vlgmr.msra.gmra.mrb[8].mxu1 %v1453_v57  ;;  %2205 = vmatprep.subr.bf16.mxu0 %v2519_v17 }
 0x169   :  { %2215 = vmatprep.mubr.msk.bf16.mxu0 %vm2521_vm1, %v2519_v17 }
 0x16b   :  { %2206 = vmatpush3.bf16.msra.mxu0 %v2489_v59 }
 0x16c   :  { %2207 = vmatprep.subr.bf16.mxu0 %v2519_v17 }
 0x16f   :  { %2208 = vmatpush3.bf16.msra.mxu0 %v2490_v60 }
 0x170   :  { %2209 = vmatprep.subr.bf16.mxu0 %v2519_v17 }
 0x173   :  { %2210 = vmatpush3.bf16.msra.mxu0 %v2491_v61 }
 0x174   :  { %2211 = vmatprep.subr.bf16.mxu0 %v2519_v17 }
 0x175   :  { %v2124_v62 = vpop.f32.mrb[4].mxu0  ;;  %v2146_v63 = vpop.f32.mrb[4].mxu1 }
 0x176   :  { %v2125_v1 = vpop.f32.mrb[5].mxu0  ;;  %v2147_v2 = vpop.f32.mrb[5].mxu1 }
 0x177   :  { %v2126_v4 = vadd.f32 %v2125_v1, %v2124_v62  ;;  %v2148_v5 = vadd.f32 %v2147_v2, %v2146_v63  ;;  %v2127_v6 = vpop.f32.mrb[6].mxu0  ;;  %v2149_v7 = vpop.f32.mrb[6].mxu1  ;;  %2212 = vmatpush3.bf16.msra.mxu0 %v2492_v0 }
 0x178   :  { %v2128_v8 = vpop.f32.mrb[7].mxu0  ;;  %v2150_v9 = vpop.f32.mrb[7].mxu1  ;;  %2213 = vmatprep.subr.bf16.mxu0 %v2519_v17 }
 0x179   :  { %v1324_v10 = vadd.f32 %v2148_v5, %v2126_v4 }
 0x17b   :  { %v1357_v14 = vrot.slane %v1324_v10, %v3176_v32  ;;  %2214 = vmatpush3.bf16.msra.mxu0 %v1769_v13 }
 0x17d   :  { %v1361_v18 = vadd.f32 %v1357_v14, %v30_v11 }
 0x17f   :  { %1364 = vst.msk [vmem:[#allocation2 + $0x8] sm:$0x3] %vm27_vm0, %v1361_v18 }
 0x186   :  { %v1369_v21 = vld [vmem:[#allocation2 + $0x8] sm:$0x3] }
 0x187   :  { %v1419_v23 = vadd.f32 %v1415_v20, %v1369_v21 }
 0x189   :  { %v1445_v24 = vrot.slane %v1419_v23, %v3176_v32 }
 0x18b   :  { %v1455_v25 = vpack.c.bf16 %v1445_v24, %v1445_v24 }
 0x18d   :  { %2216 = vmatmul.mubr.msk.bf16.vlgmr.msra.gmra.mrb[12].mxu0 %vm1763_vm3, %v1455_v25 }
 0x239   :  { %v2168_v17 = vpop.f32.mrb[8].mxu0 }
 0x23a   :  { %v2169_v26 = vpop.f32.mrb[9].mxu0 }
 0x23b   :  { %v2170_v27 = vadd.f32 %v2169_v26, %v2168_v17  ;;  %v2171_v28 = vpop.f32.mrb[10].mxu0  ;;  %v2190_v29 = vpop.f32.mrb[8].mxu1 }
 0x23c   :  { %v2172_v30 = vpop.f32.mrb[11].mxu0  ;;  %v2191_v22 = vpop.f32.mrb[9].mxu1 }
 0x23d   :  { %v1806_v58 = vadd.f32 %v2170_v27, %v2068_v46  ;;  %v2192_v16 = vadd.f32 %v2191_v22, %v2190_v29  ;;  %v2193_v31 = vpop.f32.mrb[10].mxu1 }
 0x23e   :  { %v2194_v33 = vpop.f32.mrb[11].mxu1 }
 0x23f   :  { %v1846_v34 = vadd.f32 %v2192_v16, %v1806_v58 }
 0x260   :  { %v1885_v32 = vpop.f32.mrb[12].mxu0 }
 0x261   :  { %v1886_v35 = vadd.f32 %v1885_v32, %v1846_v34  ;;  %v2217_v36 = vpop.f32.mrb[13].mxu0 }
 0x262   :  { %v1888_v37 = vpop.f32.mrb[14].mxu0 }
 0x263   :  { %v2218_v38 = vpop.f32.mrb[15].mxu0  ;;  %1892 = vst.msk [vmem:[#allocation3] sm:$0x3] %vm1891_vm4, %v1886_v35 }
 0x264   :  { %2505 = shalt.err (!%p2502_p4)
}
 0x265   :  { %s2506_s7 = scalar_lea.hbm %s3234_s5, 32 }
 0x266   :  { %p2507_p5 = scmp.ne.s32.totalorder %s3234_s5, %s2506_s7  ;;  %p2510_p6 = scmp.lt.u32.totalorder %s2506_s7, %s3234_s5 }
 0x268   :  { %p2512_p7 = pnand %p2510_p6, %p2507_p5 }
 0x26a   :  { %2515 = shalt.err (!%p2512_p7)
}
 0x26b   :  { %1902 = dma.vmem_to_hbm [thread:$0]  %s1900_s29, 32, %s3234_s5, [#allocation4]  }
 0x26c   :  { %2516 = dma.done.wait [#allocation4], 32  }
 0x26d   :  { %2517 = vsyncadd [#allocation4], 4294967264 }
 0x26e   :  { %1906 = vsyncpa [#allocation4], 1 }

</bundles_post_ra>
